<compile_context>
chip_gen: v5e
topology: v5e:2x2
jax: 0.10.0
libtpu: 0.0.40
codegen_flags: <defaults>
</compile_context>

<pallas_src>
import jax
import jax.numpy as jnp
from jax import lax
from jax.experimental import pallas as pl
from jax.experimental.pallas import tpu as pltpu


def _round_up(x, m):
    return (x + m - 1) // m * m


def _pick_row_chunk(H, W, Cout, target_bytes=2 << 20):
    """Largest even divisor of H whose f32 conv-output chunk is ~target_bytes."""
    cap = max(2, min(H, (target_bytes // max(1, W * Cout * 4)) & ~1))
    best = 2
    for r in range(2, cap + 1, 2):
        if H % r == 0:
            best = r
    return best


def _vmem_limit_bytes(H, W, Cin, Cout, compute_dtype):
    """Rough pass-1 VMEM footprint (+headroom); floor at the 32 MiB default."""
    cit = jnp.dtype(compute_dtype).itemsize
    Hp, Wp = H // 2, W // 2
    lane_ci, lane_co = _round_up(Cin, 128), _round_up(Cout, 128)
    est = 0
    est += 2 * H * _round_up(W, 8) * lane_ci * 4              # x block, double-buffered
    est += 2 * 9 * _round_up(Cin, 8) * lane_co * cit          # weights
    est += 2 * Hp * _round_up(Wp, 8) * lane_co * 4            # pooled out, double-buffered
    est += (H + 2) * _round_up(W + 2, 16) * lane_ci * cit     # halo scratch
    est += 16 * 8 * lane_co * 4                               # stats / gamma / beta / accs
    return max(32 * 1024 * 1024, int(est * 1.5) + (4 << 20))


def _make_main_kernel(N, H, W, Cin, Cout, eps, rows, compute_dtype):
    Hp, Wp = H // 2, W // 2
    num_chunks = H // rows
    half = rows // 2
    inv_count = 1.0 / float(N * H * W)      # BN stats over (N, H, W) per channel
    inv_chunk = 1.0 / float(rows * W)

    def kernel(x_ref, w_ref, gamma_ref, beta_ref, o_ref, ss_ref,
               sum_ref, sq_ref, c_ref, pad_ref):
        n = pl.program_id(0)

        @pl.when(n == 0)
        def _init():
            sum_ref[...] = jnp.zeros_like(sum_ref)
            sq_ref[...] = jnp.zeros_like(sq_ref)
            # Zero the halo ONCE: the interior is overwritten every grid step and
            # the 1-pixel border never changes (requires a sequential grid axis).
            pad_ref[...] = jnp.zeros_like(pad_ref)

        x = x_ref[0]                                     # (H, W, Cin)
        h = jnp.where(x >= 0, x, 0.1 * x)                # LeakyReLU(0.1)
        pad_ref[1:H + 1, 1:W + 1, :] = h.astype(pad_ref.dtype)

        # Row-chunked conv + BN partial sums + fused 2x2 avg pool.
        # TODO(synk): for very large H switch this static unroll to lax.fori_loop
        # with pl.ds row indexing to bound trace size / live ranges.
        for ci in range(num_chunks):
            r0 = ci * rows
            # 3x3 conv as nine shifted K=Cin matmuls (f32 accumulation), read
            # directly from the halo scratch — no im2col materialization.
            acc = jnp.zeros((rows * W, Cout), jnp.float32)
            for di in range(3):
                for dj in range(3):
                    tap = pad_ref[r0 + di:r0 + di + rows, dj:dj + W, :]
                    tap = tap.reshape(rows * W, Cin)
                    acc = acc + jnp.dot(tap, w_ref[di * 3 + dj],
                                        preferred_element_type=jnp.float32)

            # BN batch statistics accumulated around a per-channel reference point
            # (first chunk of image 0) to avoid E[x^2]-E[x]^2 cancellation.
            if ci == 0:
                @pl.when(n == 0)
                def _set_ref_point():
                    c_ref[...] = jnp.sum(acc, axis=0, keepdims=True) * inv_chunk
            d = acc - c_ref[...]
            sum_ref[...] += jnp.sum(d, axis=0, keepdims=True)
            sq_ref[...] += jnp.sum(d * d, axis=0, keepdims=True)

            # 2x2 / stride-2 average pool of this chunk (scanline order).
            # TODO(synk): strided pl.ds reads on an acc scratch would avoid these
            # deinterleave temporaries if this shows up as an XLU/store bottleneck.
            t = acc.reshape(rows * Wp, 2, Cout)
            t = t[:, 0, :] + t[:, 1, :]                      # pooled along W
            t = t.reshape(half, 2, Wp, Cout)
            pooled = (t[:, 0] + t[:, 1]) * 0.25              # pooled along H
            o_ref[0, ci * half:(ci + 1) * half, :, :] = pooled.astype(o_ref.dtype)

        # Last step: fold batch stats + gamma/beta into a per-channel scale/shift
        # (a per-channel affine commutes with average pooling).
        @pl.when(n == pl.num_programs(0) - 1)
        def _finalize():
            mean_d = sum_ref[...] * inv_count
            var = sq_ref[...] * inv_count - mean_d * mean_d   # biased variance
            mean = mean_d + c_ref[...]
            scale = gamma_ref[...] * lax.rsqrt(var + eps)     # (1, Cout)
            shift = beta_ref[...] - mean * scale
            ss_ref[0:1, :] = scale
            ss_ref[1:2, :] = shift

    return kernel


def _affine_kernel(y_ref, ss_ref, o_ref):
    scale = ss_ref[0:1, :]                 # (1, Cout) broadcasts over (1,Hp,Wp,Cout)
    shift = ss_ref[1:2, :]
    o_ref[...] = (y_ref[...] * scale + shift).astype(o_ref.dtype)


def dblock_forward_nhwc(x_nhwc, params, eps=1e-5, compute_dtype=jnp.float32,
                        out_dtype=jnp.float32):
    """Fused DBlock forward on an NHWC activation.

    compute_dtype=jnp.bfloat16 stores the activation halo and weights in bf16 and
    feeds the MXU in bf16 with f32 accumulation — valid on v5e/v6e/v7x (pool and
    BN math stay in f32).
    """
    N, H, W, Cin = x_nhwc.shape
    Cout = params["conv1_w"].shape[-1]
    assert H % 2 == 0 and W % 2 == 0, "AvgPool2d(2,2) needs even spatial dims"
    Hp, Wp = H // 2, W // 2
    rows = _pick_row_chunk(H, W, Cout)

    # HWIO (3,3,Cin,Cout) -> (9, Cin, Cout); tap index t = di*3 + dj.
    w = params["conv1_w"].reshape(9, Cin, Cout).astype(compute_dtype)
    gamma = params["bn1_gamma"].reshape(1, Cout).astype(jnp.float32)
    beta = params["bn1_beta"].reshape(1, Cout).astype(jnp.float32)
    # conv1 bias intentionally not passed: it cancels exactly through the
    # training-mode BN mean subtraction (zero numerical effect on the output).
    # TODO(synk): production channel counts should be padded to multiples of 128
    # (lane axis) for MXU/VPU utilization; skipped at these tiny demo shapes.

    kernel = _make_main_kernel(N, H, W, Cin, Cout, eps, rows, compute_dtype)

    pooled_raw, scale_shift = pl.pallas_call(
        kernel,
        out_shape=(
            jax.ShapeDtypeStruct((N, Hp, Wp, Cout), jnp.float32),  # un-normalized pool
            jax.ShapeDtypeStruct((2, Cout), jnp.float32),          # folded BN affine
        ),
        grid=(N,),
        in_specs=[
            pl.BlockSpec((1, H, W, Cin), lambda n: (n, 0, 0, 0)),
            pl.BlockSpec((9, Cin, Cout), lambda n: (0, 0, 0)),
            pl.BlockSpec((1, Cout), lambda n: (0, 0)),
            pl.BlockSpec((1, Cout), lambda n: (0, 0)),
        ],
        out_specs=(
            # Per-n block: writeback pipelines instead of one giant final flush.
            pl.BlockSpec((1, Hp, Wp, Cout), lambda n: (n, 0, 0, 0)),
            # Constant block: written once at the last grid step.
            pl.BlockSpec((2, Cout), lambda n: (0, 0)),
        ),
        scratch_shapes=[
            pltpu.VMEM((1, Cout), jnp.float32),               # shifted sum
            pltpu.VMEM((1, Cout), jnp.float32),               # shifted sum of squares
            pltpu.VMEM((1, Cout), jnp.float32),               # per-channel shift point
            pltpu.VMEM((H + 2, W + 2, Cin), compute_dtype),   # zero-padded halo
        ],
        compiler_params=pltpu.CompilerParams(
            # Sequential: cross-batch BN accumulation + zero-once halo border.
            # TODO(synk): v7x megacore needs per-core BN partial sums to go "parallel".
            dimension_semantics=("arbitrary",),
            vmem_limit_bytes=_vmem_limit_bytes(H, W, Cin, Cout, compute_dtype),
        ),
    )(x_nhwc, w, gamma, beta)

    # Pass 2: tiny per-channel affine over the 4x-smaller pooled tensor.
    out = pl.pallas_call(
        _affine_kernel,
        out_shape=jax.ShapeDtypeStruct((N, Hp, Wp, Cout), out_dtype),
        grid=(N,),
        in_specs=[
            pl.BlockSpec((1, Hp, Wp, Cout), lambda n: (n, 0, 0, 0)),
            pl.BlockSpec((2, Cout), lambda n: (0, 0)),
        ],
        out_specs=pl.BlockSpec((1, Hp, Wp, Cout), lambda n: (n, 0, 0, 0)),
        compiler_params=pltpu.CompilerParams(dimension_semantics=("parallel",)),
    )(pooled_raw, scale_shift)
    return out


def dblock_forward(x_nchw, params, eps=1e-5, compute_dtype=jnp.float32):
    """PyTorch-layout (NCHW) entry point. Prefer dblock_forward_nhwc inside an
    NHWC model: these boundary transposes are full HBM round trips of the
    activation and can dominate this memory-bound block."""
    x = jnp.transpose(x_nchw, (0, 2, 3, 1))                  # NCHW -> NHWC
    out = dblock_forward_nhwc(x, params, eps=eps, compute_dtype=compute_dtype)
    return jnp.transpose(out, (0, 3, 1, 2))                  # NHWC -> NCHW


def dblock_reference(x_nchw, params, eps=1e-5):
    """Pure-JAX reference mirroring the PyTorch forward (training-mode BN)."""
    w = params["conv1_w"]
    b = params["conv1_b"]
    gamma = params["bn1_gamma"]
    beta = params["bn1_beta"]
    h = jnp.where(x_nchw >= 0, x_nchw, 0.1 * x_nchw)
    y = jax.lax.conv_general_dilated(
        h, w, window_strides=(1, 1), padding=((1, 1), (1, 1)),
        dimension_numbers=("NCHW", "HWIO", "NCHW"))
    y = y + b[None, :, None, None]
    mean = jnp.mean(y, axis=(0, 2, 3), keepdims=True)
    var = jnp.var(y, axis=(0, 2, 3), keepdims=True)          # biased, as in BN
    y = (y - mean) / jnp.sqrt(var + eps)
    y = y * gamma[None, :, None, None] + beta[None, :, None, None]
    N, C, H, W = y.shape
    return y.reshape(N, C, H // 2, 2, W // 2, 2).mean(axis=(3, 5))


if __name__ == "__main__":
    key = jax.random.PRNGKey(0)
    k1, k2, k3, k4, k5 = jax.random.split(key, 5)

    N, Cin, H, W = 2, 4, 16, 16
    Cout = 8  # out_channels; wide=True -> hidden_channels == out_channels

    x = jax.random.normal(k1, (N, Cin, H, W), jnp.float32)
    params = {
        "conv1_w": 0.1 * jax.random.normal(k2, (3, 3, Cin, Cout), jnp.float32),
        "conv1_b": 0.1 * jax.random.normal(k3, (Cout,), jnp.float32),
        "bn1_gamma": 1.0 + 0.1 * jax.random.normal(k4, (Cout,), jnp.float32),
        "bn1_beta": 0.1 * jax.random.normal(k5, (Cout,), jnp.float32),
    }

    ref = jax.block_until_ready(dblock_reference(x, params))

    # f32 MXU path (near-exact parity check).
    out = jax.block_until_ready(dblock_forward(x, params))
    assert out.shape == (N, Cout, H // 2, W // 2), out.shape
    max_err = float(jnp.max(jnp.abs(out - ref)))
    assert jnp.allclose(out, ref, atol=2e-3, rtol=2e-3), max_err

    # bf16 MXU inputs + bf16 halo, f32 accumulation (valid on v5e/v6e/v7x).
    out_bf16 = jax.block_until_ready(
        dblock_forward(x, params, compute_dtype=jnp.bfloat16))
    max_err_bf16 = float(jnp.max(jnp.abs(out_bf16 - ref)))
    assert jnp.allclose(out_bf16, ref, atol=5e-2, rtol=5e-2), max_err_bf16

    print("KERNEL_OK")
</pallas_src>

<mosaic_0001>
module attributes {stable_mosaic.version = 11 : i64} {
  func.func @kernel(%arg0: i32, %arg1: memref<1x16x16x4xf32, #tpu.memory_space<vmem>>, %arg2: memref<9x4x8xf32, #tpu.memory_space<vmem>>, %arg3: memref<1x8xf32, #tpu.memory_space<vmem>>, %arg4: memref<1x8xf32, #tpu.memory_space<vmem>>, %arg5: memref<1x8x8x8xf32, #tpu.memory_space<vmem>>, %arg6: memref<2x8xf32, #tpu.memory_space<vmem>>, %arg7: memref<1x8xf32, #tpu.memory_space<vmem>>, %arg8: memref<1x8xf32, #tpu.memory_space<vmem>>, %arg9: memref<1x8xf32, #tpu.memory_space<vmem>>, %arg10: memref<18x18x4xf32, #tpu.memory_space<vmem>>) attributes {dimension_semantics = [#tpu.dimension_semantics<arbitrary>], iteration_bounds = array<i64: 2>, scalar_prefetch = 0 : i64, scratch_operands = 4 : i64, tpu.core_type = #tpu.core_type<tc>, window_params = [{transform_indices = @transform_0, window_bounds = array<i64: 1, 16, 16, 4>}, {pipeline_mode = #tpu.pipeline_mode<synchronous>, transform_indices = @transform_1, window_bounds = array<i64: 9, 4, 8>}, {pipeline_mode = #tpu.pipeline_mode<synchronous>, transform_indices = @transform_2, window_bounds = array<i64: 1, 8>}, {pipeline_mode = #tpu.pipeline_mode<synchronous>, transform_indices = @transform_3, window_bounds = array<i64: 1, 8>}, {transform_indices = @transform_4, window_bounds = array<i64: 1, 8, 8, 8>}, {pipeline_mode = #tpu.pipeline_mode<synchronous>, transform_indices = @transform_5, window_bounds = array<i64: 2, 8>}]} {
    %c0_i32 = arith.constant 0 : i32
    %0 = arith.cmpi eq, %arg0, %c0_i32 : i32
    %1 = arith.extui %0 : i1 to i32
    %c0_i32_0 = arith.constant 0 : i32
    %2 = arith.cmpi ne, %1, %c0_i32_0 : i32
    scf.if %2 {
      %cst_84 = arith.constant 0.000000e+00 : f32
      %103 = vector.broadcast %cst_84 : f32 to vector<1x8xf32>
      %c0_85 = arith.constant 0 : index
      %c0_86 = arith.constant 0 : index
      %104 = vector.load %arg7[%c0_85, %c0_86] : memref<1x8xf32, #tpu.memory_space<vmem>>, vector<1x8xf32>
      tpu.vector_store %arg7[%c0_85, %c0_86], %103 {strides = array<i32>} : memref<1x8xf32, #tpu.memory_space<vmem>>, vector<1x8xf32>,
      %cst_87 = arith.constant 0.000000e+00 : f32
      %105 = vector.broadcast %cst_87 : f32 to vector<1x8xf32>
      %c0_88 = arith.constant 0 : index
      %c0_89 = arith.constant 0 : index
      %106 = vector.load %arg8[%c0_88, %c0_89] : memref<1x8xf32, #tpu.memory_space<vmem>>, vector<1x8xf32>
      tpu.vector_store %arg8[%c0_88, %c0_89], %105 {strides = array<i32>} : memref<1x8xf32, #tpu.memory_space<vmem>>, vector<1x8xf32>,
      %cst_90 = arith.constant 0.000000e+00 : f32
      %107 = vector.broadcast %cst_90 : f32 to vector<18x18x4xf32>
      %c0_91 = arith.constant 0 : index
      %c0_92 = arith.constant 0 : index
      %c0_93 = arith.constant 0 : index
      %108 = vector.load %arg10[%c0_91, %c0_92, %c0_93] : memref<18x18x4xf32, #tpu.memory_space<vmem>>, vector<18x18x4xf32>
      tpu.vector_store %arg10[%c0_91, %c0_92, %c0_93], %107 {strides = array<i32>} : memref<18x18x4xf32, #tpu.memory_space<vmem>>, vector<18x18x4xf32>,
    } else {
    }
    %c0 = arith.constant 0 : index
    %c0_1 = arith.constant 0 : index
    %c0_2 = arith.constant 0 : index
    %c0_3 = arith.constant 0 : index
    %3 = vector.load %arg1[%c0, %c0_1, %c0_2, %c0_3] : memref<1x16x16x4xf32, #tpu.memory_space<vmem>>, vector<1x16x16x4xf32>
    %4 = vector.shape_cast %3 : vector<1x16x16x4xf32> to vector<16x16x4xf32>
    %cst = arith.constant 0.000000e+00 : f32
    %5 = vector.broadcast %cst : f32 to vector<16x16x4xf32>
    %6 = arith.cmpf oge, %4, %5 : vector<16x16x4xf32>
    %cst_4 = arith.constant 1.000000e-01 : f32
    %7 = vector.broadcast %cst_4 : f32 to vector<16x16x4xf32>
    %8 = arith.mulf %7, %4 : vector<16x16x4xf32>
    %9 = arith.select %6, %4, %8 : vector<16x16x4xi1>, vector<16x16x4xf32>
    %c1 = arith.constant 1 : index
    %c1_5 = arith.constant 1 : index
    %c0_6 = arith.constant 0 : index
    %10 = vector.load %arg10[%c1, %c1_5, %c0_6] : memref<18x18x4xf32, #tpu.memory_space<vmem>>, vector<16x16x4xf32>
    tpu.vector_store %arg10[%c1, %c1_5, %c0_6], %9 {strides = array<i32>} : memref<18x18x4xf32, #tpu.memory_space<vmem>>, vector<16x16x4xf32>,
    %cst_7 = arith.constant 0.000000e+00 : f32
    %11 = vector.broadcast %cst_7 : f32 to vector<256x8xf32>
    %c0_8 = arith.constant 0 : index
    %c0_9 = arith.constant 0 : index
    %c0_10 = arith.constant 0 : index
    %12 = vector.load %arg10[%c0_8, %c0_9, %c0_10] : memref<18x18x4xf32, #tpu.memory_space<vmem>>, vector<16x16x4xf32>
    %13 = vector.shape_cast %12 : vector<16x16x4xf32> to vector<256x4xf32>
    %c0_11 = arith.constant 0 : index
    %c0_12 = arith.constant 0 : index
    %c0_13 = arith.constant 0 : index
    %14 = vector.load %arg2[%c0_11, %c0_12, %c0_13] : memref<9x4x8xf32, #tpu.memory_space<vmem>>, vector<1x4x8xf32>
    %15 = vector.shape_cast %14 : vector<1x4x8xf32> to vector<4x8xf32>
    %cst_14 = arith.constant dense<0.000000e+00> : vector<256x8xf32>
    %16 = tpu.matmul %13, %15, %cst_14 {dimension_numbers = #tpu.dot_dimension_numbers<[1], [0], [0], [1], [0, 0, 1, 1], [], []>} : vector<256x4xf32>, vector<4x8xf32>, vector<256x8xf32> -> vector<256x8xf32>
    %17 = arith.addf %11, %16 : vector<256x8xf32>
    %c0_15 = arith.constant 0 : index
    %c1_16 = arith.constant 1 : index
    %c0_17 = arith.constant 0 : index
    %18 = vector.load %arg10[%c0_15, %c1_16, %c0_17] : memref<18x18x4xf32, #tpu.memory_space<vmem>>, vector<16x16x4xf32>
    %19 = vector.shape_cast %18 : vector<16x16x4xf32> to vector<256x4xf32>
    %c1_18 = arith.constant 1 : index
    %c0_19 = arith.constant 0 : index
    %c0_20 = arith.constant 0 : index
    %20 = vector.load %arg2[%c1_18, %c0_19, %c0_20] : memref<9x4x8xf32, #tpu.memory_space<vmem>>, vector<1x4x8xf32>
    %21 = vector.shape_cast %20 : vector<1x4x8xf32> to vector<4x8xf32>
    %cst_21 = arith.constant dense<0.000000e+00> : vector<256x8xf32>
    %22 = tpu.matmul %19, %21, %cst_21 {dimension_numbers = #tpu.dot_dimension_numbers<[1], [0], [0], [1], [0, 0, 1, 1], [], []>} : vector<256x4xf32>, vector<4x8xf32>, vector<256x8xf32> -> vector<256x8xf32>
    %23 = arith.addf %17, %22 : vector<256x8xf32>
    %c0_22 = arith.constant 0 : index
    %c2 = arith.constant 2 : index
    %c0_23 = arith.constant 0 : index
    %24 = vector.load %arg10[%c0_22, %c2, %c0_23] : memref<18x18x4xf32, #tpu.memory_space<vmem>>, vector<16x16x4xf32>
    %25 = vector.shape_cast %24 : vector<16x16x4xf32> to vector<256x4xf32>
    %c2_24 = arith.constant 2 : index
    %c0_25 = arith.constant 0 : index
    %c0_26 = arith.constant 0 : index
    %26 = vector.load %arg2[%c2_24, %c0_25, %c0_26] : memref<9x4x8xf32, #tpu.memory_space<vmem>>, vector<1x4x8xf32>
    %27 = vector.shape_cast %26 : vector<1x4x8xf32> to vector<4x8xf32>
    %cst_27 = arith.constant dense<0.000000e+00> : vector<256x8xf32>
    %28 = tpu.matmul %25, %27, %cst_27 {dimension_numbers = #tpu.dot_dimension_numbers<[1], [0], [0], [1], [0, 0, 1, 1], [], []>} : vector<256x4xf32>, vector<4x8xf32>, vector<256x8xf32> -> vector<256x8xf32>
    %29 = arith.addf %23, %28 : vector<256x8xf32>
    %c1_28 = arith.constant 1 : index
    %c0_29 = arith.constant 0 : index
    %c0_30 = arith.constant 0 : index
    %30 = vector.load %arg10[%c1_28, %c0_29, %c0_30] : memref<18x18x4xf32, #tpu.memory_space<vmem>>, vector<16x16x4xf32>
    %31 = vector.shape_cast %30 : vector<16x16x4xf32> to vector<256x4xf32>
    %c3 = arith.constant 3 : index
    %c0_31 = arith.constant 0 : index
    %c0_32 = arith.constant 0 : index
    %32 = vector.load %arg2[%c3, %c0_31, %c0_32] : memref<9x4x8xf32, #tpu.memory_space<vmem>>, vector<1x4x8xf32>
    %33 = vector.shape_cast %32 : vector<1x4x8xf32> to vector<4x8xf32>
    %cst_33 = arith.constant dense<0.000000e+00> : vector<256x8xf32>
    %34 = tpu.matmul %31, %33, %cst_33 {dimension_numbers = #tpu.dot_dimension_numbers<[1], [0], [0], [1], [0, 0, 1, 1], [], []>} : vector<256x4xf32>, vector<4x8xf32>, vector<256x8xf32> -> vector<256x8xf32>
    %35 = arith.addf %29, %34 : vector<256x8xf32>
    %c1_34 = arith.constant 1 : index
    %c1_35 = arith.constant 1 : index
    %c0_36 = arith.constant 0 : index
    %36 = vector.load %arg10[%c1_34, %c1_35, %c0_36] : memref<18x18x4xf32, #tpu.memory_space<vmem>>, vector<16x16x4xf32>
    %37 = vector.shape_cast %36 : vector<16x16x4xf32> to vector<256x4xf32>
    %c4 = arith.constant 4 : index
    %c0_37 = arith.constant 0 : index
    %c0_38 = arith.constant 0 : index
    %38 = vector.load %arg2[%c4, %c0_37, %c0_38] : memref<9x4x8xf32, #tpu.memory_space<vmem>>, vector<1x4x8xf32>
    %39 = vector.shape_cast %38 : vector<1x4x8xf32> to vector<4x8xf32>
    %cst_39 = arith.constant dense<0.000000e+00> : vector<256x8xf32>
    %40 = tpu.matmul %37, %39, %cst_39 {dimension_numbers = #tpu.dot_dimension_numbers<[1], [0], [0], [1], [0, 0, 1, 1], [], []>} : vector<256x4xf32>, vector<4x8xf32>, vector<256x8xf32> -> vector<256x8xf32>
    %41 = arith.addf %35, %40 : vector<256x8xf32>
    %c1_40 = arith.constant 1 : index
    %c2_41 = arith.constant 2 : index
    %c0_42 = arith.constant 0 : index
    %42 = vector.load %arg10[%c1_40, %c2_41, %c0_42] : memref<18x18x4xf32, #tpu.memory_space<vmem>>, vector<16x16x4xf32>
    %43 = vector.shape_cast %42 : vector<16x16x4xf32> to vector<256x4xf32>
    %c5 = arith.constant 5 : index
    %c0_43 = arith.constant 0 : index
    %c0_44 = arith.constant 0 : index
    %44 = vector.load %arg2[%c5, %c0_43, %c0_44] : memref<9x4x8xf32, #tpu.memory_space<vmem>>, vector<1x4x8xf32>
    %45 = vector.shape_cast %44 : vector<1x4x8xf32> to vector<4x8xf32>
    %cst_45 = arith.constant dense<0.000000e+00> : vector<256x8xf32>
    %46 = tpu.matmul %43, %45, %cst_45 {dimension_numbers = #tpu.dot_dimension_numbers<[1], [0], [0], [1], [0, 0, 1, 1], [], []>} : vector<256x4xf32>, vector<4x8xf32>, vector<256x8xf32> -> vector<256x8xf32>
    %47 = arith.addf %41, %46 : vector<256x8xf32>
    %c2_46 = arith.constant 2 : index
    %c0_47 = arith.constant 0 : index
    %c0_48 = arith.constant 0 : index
    %48 = vector.load %arg10[%c2_46, %c0_47, %c0_48] : memref<18x18x4xf32, #tpu.memory_space<vmem>>, vector<16x16x4xf32>
    %49 = vector.shape_cast %48 : vector<16x16x4xf32> to vector<256x4xf32>
    %c6 = arith.constant 6 : index
    %c0_49 = arith.constant 0 : index
    %c0_50 = arith.constant 0 : index
    %50 = vector.load %arg2[%c6, %c0_49, %c0_50] : memref<9x4x8xf32, #tpu.memory_space<vmem>>, vector<1x4x8xf32>
    %51 = vector.shape_cast %50 : vector<1x4x8xf32> to vector<4x8xf32>
    %cst_51 = arith.constant dense<0.000000e+00> : vector<256x8xf32>
    %52 = tpu.matmul %49, %51, %cst_51 {dimension_numbers = #tpu.dot_dimension_numbers<[1], [0], [0], [1], [0, 0, 1, 1], [], []>} : vector<256x4xf32>, vector<4x8xf32>, vector<256x8xf32> -> vector<256x8xf32>
    %53 = arith.addf %47, %52 : vector<256x8xf32>
    %c2_52 = arith.constant 2 : index
    %c1_53 = arith.constant 1 : index
    %c0_54 = arith.constant 0 : index
    %54 = vector.load %arg10[%c2_52, %c1_53, %c0_54] : memref<18x18x4xf32, #tpu.memory_space<vmem>>, vector<16x16x4xf32>
    %55 = vector.shape_cast %54 : vector<16x16x4xf32> to vector<256x4xf32>
    %c7 = arith.constant 7 : index
    %c0_55 = arith.constant 0 : index
    %c0_56 = arith.constant 0 : index
    %56 = vector.load %arg2[%c7, %c0_55, %c0_56] : memref<9x4x8xf32, #tpu.memory_space<vmem>>, vector<1x4x8xf32>
    %57 = vector.shape_cast %56 : vector<1x4x8xf32> to vector<4x8xf32>
    %cst_57 = arith.constant dense<0.000000e+00> : vector<256x8xf32>
    %58 = tpu.matmul %55, %57, %cst_57 {dimension_numbers = #tpu.dot_dimension_numbers<[1], [0], [0], [1], [0, 0, 1, 1], [], []>} : vector<256x4xf32>, vector<4x8xf32>, vector<256x8xf32> -> vector<256x8xf32>
    %59 = arith.addf %53, %58 : vector<256x8xf32>
    %c2_58 = arith.constant 2 : index
    %c2_59 = arith.constant 2 : index
    %c0_60 = arith.constant 0 : index
    %60 = vector.load %arg10[%c2_58, %c2_59, %c0_60] : memref<18x18x4xf32, #tpu.memory_space<vmem>>, vector<16x16x4xf32>
    %61 = vector.shape_cast %60 : vector<16x16x4xf32> to vector<256x4xf32>
    %c8 = arith.constant 8 : index
    %c0_61 = arith.constant 0 : index
    %c0_62 = arith.constant 0 : index
    %62 = vector.load %arg2[%c8, %c0_61, %c0_62] : memref<9x4x8xf32, #tpu.memory_space<vmem>>, vector<1x4x8xf32>
    %63 = vector.shape_cast %62 : vector<1x4x8xf32> to vector<4x8xf32>
    %cst_63 = arith.constant dense<0.000000e+00> : vector<256x8xf32>
    %64 = tpu.matmul %61, %63, %cst_63 {dimension_numbers = #tpu.dot_dimension_numbers<[1], [0], [0], [1], [0, 0, 1, 1], [], []>} : vector<256x4xf32>, vector<4x8xf32>, vector<256x8xf32> -> vector<256x8xf32>
    %65 = arith.addf %59, %64 : vector<256x8xf32>
    %c0_i32_64 = arith.constant 0 : i32
    %66 = arith.cmpi eq, %arg0, %c0_i32_64 : i32
    %67 = arith.extui %66 : i1 to i32
    %c0_i32_65 = arith.constant 0 : i32
    %68 = arith.cmpi ne, %67, %c0_i32_65 : i32
    scf.if %68 {
      %cst_84 = arith.constant dense<0.000000e+00> : vector<8xf32>
      %103 = vector.multi_reduction <add>, %65, %cst_84 [0] : vector<256x8xf32> to vector<8xf32>
      %104 = vector.shape_cast %103 : vector<8xf32> to vector<1x8xf32>
      %cst_85 = arith.constant 3.906250e-03 : f32
      %105 = vector.broadcast %cst_85 : f32 to vector<1x8xf32>
      %106 = arith.mulf %104, %105 : vector<1x8xf32>
      %c0_86 = arith.constant 0 : index
      %c0_87 = arith.constant 0 : index
      %107 = vector.load %arg9[%c0_86, %c0_87] : memref<1x8xf32, #tpu.memory_space<vmem>>, vector<1x8xf32>
      tpu.vector_store %arg9[%c0_86, %c0_87], %106 {strides = array<i32>} : memref<1x8xf32, #tpu.memory_space<vmem>>, vector<1x8xf32>,
    } else {
    }
    %c0_66 = arith.constant 0 : index
    %c0_67 = arith.constant 0 : index
    %69 = vector.load %arg9[%c0_66, %c0_67] : memref<1x8xf32, #tpu.memory_space<vmem>>, vector<1x8xf32>
    %70 = vector.broadcast %69 : vector<1x8xf32> to vector<256x8xf32>
    %71 = arith.subf %65, %70 : vector<256x8xf32>
    %c0_68 = arith.constant 0 : index
    %c0_69 = arith.constant 0 : index
    %72 = vector.load %arg7[%c0_68, %c0_69] : memref<1x8xf32, #tpu.memory_space<vmem>>, vector<1x8xf32>
    %cst_70 = arith.constant dense<0.000000e+00> : vector<8xf32>
    %73 = vector.multi_reduction <add>, %71, %cst_70 [0] : vector<256x8xf32> to vector<8xf32>
    %74 = vector.shape_cast %73 : vector<8xf32> to vector<1x8xf32>
    %75 = arith.addf %72, %74 : vector<1x8xf32>
    %c0_71 = arith.constant 0 : index
    %c0_72 = arith.constant 0 : index
    %76 = vector.load %arg7[%c0_71, %c0_72] : memref<1x8xf32, #tpu.memory_space<vmem>>, vector<1x8xf32>
    tpu.vector_store %arg7[%c0_71, %c0_72], %75 {strides = array<i32>} : memref<1x8xf32, #tpu.memory_space<vmem>>, vector<1x8xf32>,
    %c0_73 = arith.constant 0 : index
    %c0_74 = arith.constant 0 : index
    %77 = vector.load %arg8[%c0_73, %c0_74] : memref<1x8xf32, #tpu.memory_space<vmem>>, vector<1x8xf32>
    %78 = arith.mulf %71, %71 : vector<256x8xf32>
    %cst_75 = arith.constant dense<0.000000e+00> : vector<8xf32>
    %79 = vector.multi_reduction <add>, %78, %cst_75 [0] : vector<256x8xf32> to vector<8xf32>
    %80 = vector.shape_cast %79 : vector<8xf32> to vector<1x8xf32>
    %81 = arith.addf %77, %80 : vector<1x8xf32>
    %c0_76 = arith.constant 0 : index
    %c0_77 = arith.constant 0 : index
    %82 = vector.load %arg8[%c0_76, %c0_77] : memref<1x8xf32, #tpu.memory_space<vmem>>, vector<1x8xf32>
    tpu.vector_store %arg8[%c0_76, %c0_77], %81 {strides = array<i32>} : memref<1x8xf32, #tpu.memory_space<vmem>>, vector<1x8xf32>,
    %83 = vector.shape_cast %65 : vector<256x8xf32> to vector<128x2x8xf32>
    %84 = vector.extract_strided_slice %83 {offsets = [0, 0, 0], sizes = [128, 1, 8], strides = [1, 1, 1]} : vector<128x2x8xf32> to vector<128x1x8xf32>
    %85 = vector.shape_cast %84 : vector<128x1x8xf32> to vector<128x8xf32>
    %86 = vector.extract_strided_slice %83 {offsets = [0, 1, 0], sizes = [128, 1, 8], strides = [1, 1, 1]} : vector<128x2x8xf32> to vector<128x1x8xf32>
    %87 = vector.shape_cast %86 : vector<128x1x8xf32> to vector<128x8xf32>
    %88 = arith.addf %85, %87 : vector<128x8xf32>
    %89 = vector.shape_cast %88 : vector<128x8xf32> to vector<8x2x8x8xf32>
    %90 = vector.extract_strided_slice %89 {offsets = [0, 0, 0, 0], sizes = [8, 1, 8, 8], strides = [1, 1, 1, 1]} : vector<8x2x8x8xf32> to vector<8x1x8x8xf32>
    %91 = vector.shape_cast %90 : vector<8x1x8x8xf32> to vector<8x8x8xf32>
    %92 = vector.extract_strided_slice %89 {offsets = [0, 1, 0, 0], sizes = [8, 1, 8, 8], strides = [1, 1, 1, 1]} : vector<8x2x8x8xf32> to vector<8x1x8x8xf32>
    %93 = vector.shape_cast %92 : vector<8x1x8x8xf32> to vector<8x8x8xf32>
    %94 = arith.addf %91, %93 : vector<8x8x8xf32>
    %cst_78 = arith.constant 2.500000e-01 : f32
    %95 = vector.broadcast %cst_78 : f32 to vector<8x8x8xf32>
    %96 = arith.mulf %94, %95 : vector<8x8x8xf32>
    %c0_79 = arith.constant 0 : index
    %c0_80 = arith.constant 0 : index
    %c0_81 = arith.constant 0 : index
    %c0_82 = arith.constant 0 : index
    %97 = vector.load %arg5[%c0_79, %c0_80, %c0_81, %c0_82] : memref<1x8x8x8xf32, #tpu.memory_space<vmem>>, vector<1x8x8x8xf32>
    %98 = vector.shape_cast %97 : vector<1x8x8x8xf32> to vector<8x8x8xf32>
    %99 = vector.shape_cast %96 : vector<8x8x8xf32> to vector<1x8x8x8xf32>
    tpu.vector_store %arg5[%c0_79, %c0_80, %c0_81, %c0_82], %99 {strides = array<i32>} : memref<1x8x8x8xf32, #tpu.memory_space<vmem>>, vector<1x8x8x8xf32>,
    %c1_i32 = arith.constant 1 : i32
    %100 = arith.cmpi eq, %arg0, %c1_i32 : i32
    %101 = arith.extui %100 : i1 to i32
    %c0_i32_83 = arith.constant 0 : i32
    %102 = arith.cmpi ne, %101, %c0_i32_83 : i32
    scf.if %102 {
      %c0_84 = arith.constant 0 : index
      %c0_85 = arith.constant 0 : index
      %103 = vector.load %arg7[%c0_84, %c0_85] : memref<1x8xf32, #tpu.memory_space<vmem>>, vector<1x8xf32>
      %cst_86 = arith.constant 0.001953125 : f32
      %104 = vector.broadcast %cst_86 : f32 to vector<1x8xf32>
      %105 = arith.mulf %103, %104 : vector<1x8xf32>
      %c0_87 = arith.constant 0 : index
      %c0_88 = arith.constant 0 : index
      %106 = vector.load %arg8[%c0_87, %c0_88] : memref<1x8xf32, #tpu.memory_space<vmem>>, vector<1x8xf32>
      %cst_89 = arith.constant 0.001953125 : f32
      %107 = vector.broadcast %cst_89 : f32 to vector<1x8xf32>
      %108 = arith.mulf %106, %107 : vector<1x8xf32>
      %109 = arith.mulf %105, %105 : vector<1x8xf32>
      %110 = arith.subf %108, %109 : vector<1x8xf32>
      %c0_90 = arith.constant 0 : index
      %c0_91 = arith.constant 0 : index
      %111 = vector.load %arg9[%c0_90, %c0_91] : memref<1x8xf32, #tpu.memory_space<vmem>>, vector<1x8xf32>
      %112 = arith.addf %105, %111 : vector<1x8xf32>
      %c0_92 = arith.constant 0 : index
      %c0_93 = arith.constant 0 : index
      %113 = vector.load %arg3[%c0_92, %c0_93] : memref<1x8xf32, #tpu.memory_space<vmem>>, vector<1x8xf32>
      %cst_94 = arith.constant 9.99999974E-6 : f32
      %114 = vector.broadcast %cst_94 : f32 to vector<1x8xf32>
      %115 = arith.addf %110, %114 : vector<1x8xf32>
      %116 = math.rsqrt %115 : vector<1x8xf32>
      %117 = arith.mulf %113, %116 : vector<1x8xf32>
      %c0_95 = arith.constant 0 : index
      %c0_96 = arith.constant 0 : index
      %118 = vector.load %arg4[%c0_95, %c0_96] : memref<1x8xf32, #tpu.memory_space<vmem>>, vector<1x8xf32>
      %119 = arith.mulf %112, %117 : vector<1x8xf32>
      %120 = arith.subf %118, %119 : vector<1x8xf32>
      %c0_97 = arith.constant 0 : index
      %c0_98 = arith.constant 0 : index
      %121 = vector.load %arg6[%c0_97, %c0_98] : memref<2x8xf32, #tpu.memory_space<vmem>>, vector<1x8xf32>
      tpu.vector_store %arg6[%c0_97, %c0_98], %117 {strides = array<i32>} : memref<2x8xf32, #tpu.memory_space<vmem>>, vector<1x8xf32>,
      %c1_99 = arith.constant 1 : index
      %c0_100 = arith.constant 0 : index
      %122 = vector.load %arg6[%c1_99, %c0_100] : memref<2x8xf32, #tpu.memory_space<vmem>>, vector<1x8xf32>
      tpu.vector_store %arg6[%c1_99, %c0_100], %120 {strides = array<i32>} : memref<2x8xf32, #tpu.memory_space<vmem>>, vector<1x8xf32>,
    } else {
    }
    return
  }
  func.func @transform_0(%arg0: i32) -> (i32, i32, i32, i32) {
    %c0_i32 = arith.constant 0 : i32
    %c0_i32_0 = arith.constant 0 : i32
    %c0_i32_1 = arith.constant 0 : i32
    %c0_i32_2 = arith.constant 0 : i32
    return %arg0, %c0_i32, %c0_i32_0, %c0_i32_1 : i32, i32, i32, i32
  }
  func.func @transform_1(%arg0: i32) -> (i32, i32, i32) {
    %c0_i32 = arith.constant 0 : i32
    %c0_i32_0 = arith.constant 0 : i32
    %c0_i32_1 = arith.constant 0 : i32
    %c0_i32_2 = arith.constant 0 : i32
    return %c0_i32, %c0_i32_0, %c0_i32_1 : i32, i32, i32
  }
  func.func @transform_2(%arg0: i32) -> (i32, i32) {
    %c0_i32 = arith.constant 0 : i32
    %c0_i32_0 = arith.constant 0 : i32
    %c0_i32_1 = arith.constant 0 : i32
    return %c0_i32, %c0_i32_0 : i32, i32
  }
  func.func @transform_3(%arg0: i32) -> (i32, i32) {
    %c0_i32 = arith.constant 0 : i32
    %c0_i32_0 = arith.constant 0 : i32
    %c0_i32_1 = arith.constant 0 : i32
    return %c0_i32, %c0_i32_0 : i32, i32
  }
  func.func @transform_4(%arg0: i32) -> (i32, i32, i32, i32) {
    %c0_i32 = arith.constant 0 : i32
    %c0_i32_0 = arith.constant 0 : i32
    %c0_i32_1 = arith.constant 0 : i32
    %c0_i32_2 = arith.constant 0 : i32
    return %arg0, %c0_i32, %c0_i32_0, %c0_i32_1 : i32, i32, i32, i32
  }
  func.func @transform_5(%arg0: i32) -> (i32, i32) {
    %c0_i32 = arith.constant 0 : i32
    %c0_i32_0 = arith.constant 0 : i32
    %c0_i32_1 = arith.constant 0 : i32
    return %c0_i32, %c0_i32_0 : i32, i32
  }
}

</mosaic_0001>

<bundles_post_ra>
// kernel: tpu_custom_call.1
= control target key start
LH: loop header
LB: loop body
LE: loop exit
PB: predicated region body
PF: predicated region fallthrough
CT: control target
= control target key end

     0   :  { %11 = vsyncpa [#allocation7], 0  ;;  %s8468_s0 = inlined_call_operand.vmem [shape: f32[2,16,16,4], index: 0, kind: input, shape index: {}]   ;;  %s8469_s1 = inlined_call_operand.vmem [shape: f32[9,4,8], index: 1, kind: input, shape index: {}]   ;;  %s8470_s2 = inlined_call_operand.vmem [shape: f32[1,8], index: 2, kind: input, shape index: {}]   ;;  %s8471_s3 = inlined_call_operand.vmem [shape: f32[1,8], index: 3, kind: input, shape index: {}]   ;;  %s8472_s4 = inlined_call_operand.hbm [shape: f32[2,8,8,8], index: 4, kind: output, shape index: {0}]   ;;  %s8473_s5 = inlined_call_operand.hbm [shape: f32[2,8], index: 5, kind: output, shape index: {1}]  }
   0x1   :  { %13 = vsyncpa [#allocation7 + $0x1], 0 }
   0x2   :  { %14 = vsyncpa [#allocation9], 0  ;;  %s5016_s18 = smov 0   ;;  %s5018_s19 = smov 0  }
   0x3   :  { %s5020_s20 = smov 0   ;;  %s5022_s21 = smov 0  }
   0x4 LB: > { %s5037_s22 = sadd.s32 4294967295, %s4980_s21   ;;  %s4379_s23 = sadd.s32 4294967294, %s4980_s21   ;;  %s4980_s21 = sphi %s5022_s21, %s9321_s21   ;;  %s4976_s20 = sphi %s5020_s20, %s9320_s20   ;;  %s4972_s19 = sphi %s5018_s19, %s9319_s19   ;;  %s4968_s18 = sphi %s5016_s18, %s9318_s18  }
   0x5   : > { %s5041_s24 = sadd.s32 1, %s4980_s21   ;;  %s116_s25 = sadd.s32 1, %s4976_s20 }
   0x6   : > { %s113_s26 = ssub.s32 %s4980_s21, %s5041_s24  ;;  %p126_p0 = scmp.ne.s32.totalorder %s4976_s20, %s4972_s19 }
   0x7   : > { %p114_p1 = scmp.eq.s32.totalorder %s113_s26, 0  ;;  %p127_p2 = scmp.eq.s32.totalorder %s5037_s22, 1 }
   0x8   : > { %p132_p3 = scmp.ne.s32.totalorder %s4972_s19, %s4968_s18  ;;  %p133_p4 = scmp.eq.s32.totalorder %s4379_s23, 1 }
   0x9   : > { %s5052_s27 = scalar_select %p114_p1, %s4976_s20, %s116_s25  }
   0xa   : > { %p5056_p5 = por %p127_p2, %p126_p0  ;;  %p5060_p6 = por %p133_p4, %p132_p3 }
   0xb   : > { %p4382_p7 = scmp.ge.s32.totalorder %s4980_s21, 1  ;;  %p189_p8 = scmp.lt.s32.totalorder %s4980_s21, 3 }
   0xd   : > { %p190_p9 = pnand %p4382_p7, %p189_p8 }
   0xf   : > { %193 = sbr.rel (%p190_p9) target bundleno = 1262 (0x4ee), region = 36 }
  0x14   : > { %s212_s30 = sand.u32 1, %s4972_s19   ;;  %p217_p10 = scmp.lt.s32.totalorder %s5037_s22, 1 }
  0x15   : > { %s4383_s6 = sshll.u32 %s212_s30, 6  ;;  %p4386_p11 = scmp.ne.s32.totalorder %s5037_s22, 0 }
  0x16   : > { %s218_s7 = scalar_select %p217_p10, %s5037_s22, 1 }
  0x17   : > { %s5076_s12 = scalar_lea.vmem [#allocation6], %s4383_s6  ;;  %225 = sbr.rel (%p4386_p11) target bundleno = 85 (0x55), region = 40 }
  0x18   : > { %s4829_s8 = sshll.u32 %s218_s7, 8 }
  0x19   : > { %s5074_s11 = scalar_lea.vmem %s8468_s0, %s4829_s8 }
  0x1c   : > { %vm226_vm0 = vcmask 57344   ;;  %vm229_vm1 = vcmask 31744   ;;  %v4982_v0 = vmov 0.0   ;;  %vm232_vm2 = vcmask 25600  }
  0x1d   : > { %227 = vst.msk [vmem:[#allocation2] sm:$0x1] %vm226_vm0, %v4982_v0 }
  0x1e   : > { %228 = vst.msk [vmem:[#allocation3] sm:$0x1] %vm226_vm0, %v4982_v0 }
  0x1f   : > { %230 = vst.msk [vmem:[#allocation5] sm:$0xff] %vm229_vm1, %v4982_v0 }
  0x20   : > { %231 = vst.msk [vmem:[#allocation5 + $0x8] sm:$0xff] %vm229_vm1, %v4982_v0 }
  0x21   : > { %234 = vst.msk [vmem:[#allocation5 + $0x18] sm:$0xff] %vm229_vm1, %v4982_v0 }
  0x22   : > { %235 = vst.msk [vmem:[#allocation5 + $0x20] sm:$0xff] %vm229_vm1, %v4982_v0 }
  0x23   : > { %237 = vst.msk [vmem:[#allocation5 + $0x30] sm:$0xff] %vm229_vm1, %v4982_v0 }
  0x24   : > { %238 = vst.msk [vmem:[#allocation5 + $0x38] sm:$0xff] %vm229_vm1, %v4982_v0 }
  0x25   : > { %240 = vst.msk [vmem:[#allocation5 + $0x48] sm:$0xff] %vm229_vm1, %v4982_v0 }
  0x26   : > { %241 = vst.msk [vmem:[#allocation5 + $0x50] sm:$0xff] %vm229_vm1, %v4982_v0 }
  0x27   : > { %243 = vst.msk [vmem:[#allocation5 + $0x60] sm:$0xff] %vm229_vm1, %v4982_v0 }
  0x28   : > { %244 = vst.msk [vmem:[#allocation5 + $0x68] sm:$0xff] %vm229_vm1, %v4982_v0 }
  0x29   : > { %246 = vst.msk [vmem:[#allocation5 + $0x78] sm:$0xff] %vm229_vm1, %v4982_v0 }
  0x2a   : > { %247 = vst.msk [vmem:[#allocation5 + $0x80] sm:$0xff] %vm229_vm1, %v4982_v0 }
  0x2b   : > { %249 = vst.msk [vmem:[#allocation5 + $0x90] sm:$0xff] %vm229_vm1, %v4982_v0 }
  0x2c   : > { %250 = vst.msk [vmem:[#allocation5 + $0x98] sm:$0xff] %vm229_vm1, %v4982_v0 }
  0x2d   : > { %252 = vst.msk [vmem:[#allocation5 + $0xa8] sm:$0xff] %vm229_vm1, %v4982_v0 }
  0x2e   : > { %253 = vst.msk [vmem:[#allocation5 + $0xb0] sm:$0xff] %vm229_vm1, %v4982_v0 }
  0x2f   : > { %255 = vst.msk [vmem:[#allocation5 + $0xc0] sm:$0xff] %vm229_vm1, %v4982_v0 }
  0x30   : > { %256 = vst.msk [vmem:[#allocation5 + $0xc8] sm:$0xff] %vm229_vm1, %v4982_v0 }
  0x31   : > { %258 = vst.msk [vmem:[#allocation5 + $0xd8] sm:$0xff] %vm229_vm1, %v4982_v0 }
  0x32   : > { %259 = vst.msk [vmem:[#allocation5 + $0xe0] sm:$0xff] %vm229_vm1, %v4982_v0 }
  0x33   : > { %261 = vst.msk [vmem:[#allocation5 + $0xf0] sm:$0xff] %vm229_vm1, %v4982_v0 }
  0x34   : > { %262 = vst.msk [vmem:[#allocation5 + $0xf8] sm:$0xff] %vm229_vm1, %v4982_v0 }
  0x35   : > { %264 = vst.msk [vmem:[#allocation5 + $0x108] sm:$0xff] %vm229_vm1, %v4982_v0 }
  0x36   : > { %265 = vst.msk [vmem:[#allocation5 + $0x110] sm:$0xff] %vm229_vm1, %v4982_v0 }
  0x37   : > { %267 = vst.msk [vmem:[#allocation5 + $0x120] sm:$0xff] %vm229_vm1, %v4982_v0 }
  0x38   : > { %268 = vst.msk [vmem:[#allocation5 + $0x128] sm:$0xff] %vm229_vm1, %v4982_v0 }
  0x39   : > { %270 = vst.msk [vmem:[#allocation5 + $0x138] sm:$0xff] %vm229_vm1, %v4982_v0 }
  0x3a   : > { %271 = vst.msk [vmem:[#allocation5 + $0x140] sm:$0xff] %vm229_vm1, %v4982_v0 }
  0x3b   : > { %273 = vst.msk [vmem:[#allocation5 + $0x150] sm:$0xff] %vm229_vm1, %v4982_v0 }
  0x3c   : > { %274 = vst.msk [vmem:[#allocation5 + $0x158] sm:$0xff] %vm229_vm1, %v4982_v0 }
  0x3d   : > { %276 = vst.msk [vmem:[#allocation5 + $0x168] sm:$0xff] %vm229_vm1, %v4982_v0 }
  0x3e   : > { %277 = vst.msk [vmem:[#allocation5 + $0x170] sm:$0xff] %vm229_vm1, %v4982_v0 }
  0x3f   : > { %279 = vst.msk [vmem:[#allocation5 + $0x180] sm:$0xff] %vm229_vm1, %v4982_v0 }
  0x40   : > { %280 = vst.msk [vmem:[#allocation5 + $0x188] sm:$0xff] %vm229_vm1, %v4982_v0 }
  0x41   : > { %282 = vst.msk [vmem:[#allocation5 + $0x198] sm:$0xff] %vm229_vm1, %v4982_v0 }
  0x42   : > { %283 = vst.msk [vmem:[#allocation5 + $0x1a0] sm:$0xff] %vm229_vm1, %v4982_v0 }
  0x43   : > { %233 = vst.msk [vmem:[#allocation5 + $0x10] sm:$0x3] %vm232_vm2, %v4982_v0 }
  0x44   : > { %236 = vst.msk [vmem:[#allocation5 + $0x28] sm:$0x3] %vm232_vm2, %v4982_v0 }
  0x45   : > { %239 = vst.msk [vmem:[#allocation5 + $0x40] sm:$0x3] %vm232_vm2, %v4982_v0 }
  0x46   : > { %242 = vst.msk [vmem:[#allocation5 + $0x58] sm:$0x3] %vm232_vm2, %v4982_v0 }
  0x47   : > { %245 = vst.msk [vmem:[#allocation5 + $0x70] sm:$0x3] %vm232_vm2, %v4982_v0 }
  0x48   : > { %248 = vst.msk [vmem:[#allocation5 + $0x88] sm:$0x3] %vm232_vm2, %v4982_v0 }
  0x49   : > { %251 = vst.msk [vmem:[#allocation5 + $0xa0] sm:$0x3] %vm232_vm2, %v4982_v0 }
  0x4a   : > { %254 = vst.msk [vmem:[#allocation5 + $0xb8] sm:$0x3] %vm232_vm2, %v4982_v0 }
  0x4b   : > { %257 = vst.msk [vmem:[#allocation5 + $0xd0] sm:$0x3] %vm232_vm2, %v4982_v0 }
  0x4c   : > { %260 = vst.msk [vmem:[#allocation5 + $0xe8] sm:$0x3] %vm232_vm2, %v4982_v0 }
  0x4d   : > { %263 = vst.msk [vmem:[#allocation5 + $0x100] sm:$0x3] %vm232_vm2, %v4982_v0 }
  0x4e   : > { %266 = vst.msk [vmem:[#allocation5 + $0x118] sm:$0x3] %vm232_vm2, %v4982_v0 }
  0x4f   : > { %269 = vst.msk [vmem:[#allocation5 + $0x130] sm:$0x3] %vm232_vm2, %v4982_v0 }
  0x50   : > { %272 = vst.msk [vmem:[#allocation5 + $0x148] sm:$0x3] %vm232_vm2, %v4982_v0 }
  0x51   : > { %275 = vst.msk [vmem:[#allocation5 + $0x160] sm:$0x3] %vm232_vm2, %v4982_v0 }
  0x52   : > { %278 = vst.msk [vmem:[#allocation5 + $0x178] sm:$0x3] %vm232_vm2, %v4982_v0 }
  0x53   : > { %281 = vst.msk [vmem:[#allocation5 + $0x190] sm:$0x3] %vm232_vm2, %v4982_v0 }
  0x54   : > { %284 = vst.msk [vmem:[#allocation5 + $0x1a8] sm:$0x3] %vm232_vm2, %v4982_v0 }
  0x55 PF: > { %v4387_v1 = vld [vmem:[%s8469_s1 + $0x4] sm:$0xf]  ;;  %vm610_vm3 = vcmask 1043456   ;;  %v291_v2 = vld [vmem:[%s5074_s11 + $0x30] sm:$0xff]  ;;  %vm414_vm4 = vcmask 31744   ;;  %v292_v13 = vld [vmem:[%s5074_s11 + $0x38] sm:$0xff] }
  0x56   : > { %v299_v3 = vld [vmem:[%s5074_s11 + $0x70] sm:$0xff]  ;;  %4831 = vmatpush.msk.msra.mxu1 %vm610_vm3, %v4387_v1  ;;  %4832 = vmatpush.msk.msra.mxu2 %vm610_vm3, %v4387_v1  ;;  %vm323_vm5 = vcmp.ge.f32.partialorder %v291_v2, 0.0  ;;  %v355_v4 = vmul.f32 0.1, %v291_v2  ;;  %v4454_v6 = vld [vmem:[%s8469_s1 + $0x8] sm:$0xf] }
  0x57   : > { %vm331_vm6 = vcmp.ge.f32.partialorder %v299_v3, 0.0  ;;  %v363_v5 = vmul.f32 0.1, %v299_v3  ;;  %4833 = vmatpush.msk.msra.mxu3 %vm610_vm3, %v4387_v1  ;;  %v307_v7 = vld [vmem:[%s5074_s11 + $0xb0] sm:$0xff]  ;;  %v4488_v8 = vld [vmem:[%s8469_s1 + $0xc] sm:$0xf]  ;;  %4388 = vmatpush.msk.msra.mxu0 %vm610_vm3, %v4387_v1 }
  0x58   : > { %v387_v9 = vsel %vm323_vm5, %v291_v2, %v355_v4  ;;  %4455 = vmatpush.msk.msrb.mxu2 %vm610_vm3, %v4454_v6  ;;  %vm339_vm7 = vcmp.ge.f32.partialorder %v307_v7, 0.0  ;;  %v371_v11 = vmul.f32 0.1, %v307_v7  ;;  %v479_v12 = vld [vmem:[%s8469_s1] sm:$0xf]  ;;  %vm324_vm8 = vcmp.ge.f32.partialorder %v292_v13, 0.0 }
  0x59   : > { %v395_v10 = vsel %vm331_vm6, %v299_v3, %v363_v5  ;;  %4489 = vmatpush.msk.msrb.mxu3 %vm610_vm3, %v4488_v8  ;;  %421 = vst.msk [vmem:[#allocation5 + $0x61] sm:$0xff] %vm414_vm4, %v387_v9  ;;  %4421 = vmatpush.msk.msrb.mxu1 %vm610_vm3, %v479_v12  ;;  %v356_v14 = vmul.f32 0.1, %v292_v13  ;;  %v300_v15 = vld [vmem:[%s5074_s11 + $0x78] sm:$0xff]  ;;  %v480_v16 = vld [vmem:[#allocation5 + $0x1] sm:$0xff]  ;;  %v481_v29 = vld [vmem:[#allocation5 + $0x9] sm:$0xff] }
  0x5a   : > { %429 = vst.msk [vmem:[#allocation5 + $0xc1] sm:$0xff] %vm414_vm4, %v395_v10  ;;  %v403_v17 = vsel %vm339_vm7, %v307_v7, %v371_v11  ;;  %vm332_vm9 = vcmp.ge.f32.partialorder %v300_v15, 0.0  ;;  %v364_v18 = vmul.f32 0.1, %v300_v15  ;;  %4389 = vmatmul.msk.f32.vlgmr.msra.gmra.mxu0 %vm414_vm4, %v480_v16  ;;  %v308_v19 = vld [vmem:[%s5074_s11 + $0xb8] sm:$0xff]  ;;  %v293_v20 = vld [vmem:[%s5074_s11 + $0x40] sm:$0xff] }
  0x5b   : > { %437 = vst.msk [vmem:[#allocation5 + $0x121] sm:$0xff] %vm414_vm4, %v403_v17  ;;  %v388_v21 = vsel %vm324_vm8, %v292_v13, %v356_v14  ;;  %vm340_vm10 = vcmp.ge.f32.partialorder %v308_v19, 0.0  ;;  %v372_v22 = vmul.f32 0.1, %v308_v19  ;;  %v4522_v23 = vld [vmem:[%s8469_s1 + $0x10] sm:$0xf] }
  0x5c   : > { %422 = vst.msk [vmem:[#allocation5 + $0x69] sm:$0xff] %vm414_vm4, %v388_v21  ;;  %v396_v24 = vsel %vm332_vm9, %v300_v15, %v364_v18  ;;  %4523 = vmatpush.msk.msrb.mxu0 %vm610_vm3, %v4522_v23  ;;  %vm325_vm11 = vcmp.ge.f32.partialorder %v293_v20, 0.0  ;;  %v357_v25 = vmul.f32 0.1, %v293_v20  ;;  %v301_v26 = vld [vmem:[%s5074_s11 + $0x80] sm:$0xff]  ;;  %v294_v31 = vld [vmem:[%s5074_s11 + $0x48] sm:$0xff] }
  0x5d   : > { %430 = vst.msk [vmem:[#allocation5 + $0xc9] sm:$0xff] %vm414_vm4, %v396_v24  ;;  %v404_v27 = vsel %vm340_vm10, %v308_v19, %v372_v22  ;;  %vm333_vm12 = vcmp.ge.f32.partialorder %v301_v26, 0.0  ;;  %v365_v28 = vmul.f32 0.1, %v301_v26  ;;  %v309_v30 = vld [vmem:[%s5074_s11 + $0xc0] sm:$0xff]  ;;  %vm326_vm14 = vcmp.ge.f32.partialorder %v294_v31, 0.0 }
  0x5e   : > { %438 = vst.msk [vmem:[#allocation5 + $0x129] sm:$0xff] %vm414_vm4, %v404_v27  ;;  %v389_v32 = vsel %vm325_vm11, %v293_v20, %v357_v25  ;;  %vm341_vm13 = vcmp.ge.f32.partialorder %v309_v30, 0.0  ;;  %v373_v33 = vmul.f32 0.1, %v309_v30  ;;  %v302_v34 = vld [vmem:[%s5074_s11 + $0x88] sm:$0xff]  ;;  %v285_v40 = vld [vmem:[%s5074_s11] sm:$0xff] }
  0x5f   : > { %423 = vst.msk [vmem:[#allocation5 + $0x79] sm:$0xff] %vm414_vm4, %v389_v32  ;;  %v397_v35 = vsel %vm333_vm12, %v301_v26, %v365_v28  ;;  %v358_v36 = vmul.f32 0.1, %v294_v31  ;;  %vm334_vm15 = vcmp.ge.f32.partialorder %v302_v34, 0.0  ;;  %v366_v37 = vmul.f32 0.1, %v302_v34 }
  0x60   : > { %v5177_v38 = vld [vmem:[#allocation5 + $0x61] sm:$0xff]  ;;  %431 = vst.msk [vmem:[#allocation5 + $0xd9] sm:$0xff] %vm414_vm4, %v397_v35  ;;  %v405_v39 = vsel %vm341_vm13, %v309_v30, %v373_v33  ;;  %vm317_vm0 = vcmp.ge.f32.partialorder %v285_v40, 0.0  ;;  %v349_v45 = vmul.f32 0.1, %v285_v40  ;;  %v295_v46 = vld [vmem:[%s5074_s11 + $0x50] sm:$0xff] }
  0x61   : > { %v310_v41 = vld [vmem:[%s5074_s11 + $0xc8] sm:$0xff]  ;;  %4397 = vmatmul.msk.f32.vlgmr.msra.gmra.mxu1 %vm414_vm4, %v5177_v38  ;;  %439 = vst.msk [vmem:[#allocation5 + $0x139] sm:$0xff] %vm414_vm4, %v405_v39  ;;  %v390_v43 = vsel %vm326_vm14, %v294_v31, %v358_v36  ;;  %v398_v44 = vsel %vm334_vm15, %v302_v34, %v366_v37  ;;  %vm327_vm2 = vcmp.ge.f32.partialorder %v295_v46, 0.0  ;;  %v359_v50 = vmul.f32 0.1, %v295_v46  ;;  %v303_v51 = vld [vmem:[%s5074_s11 + $0x90] sm:$0xff] }
  0x62   : > { %v5184_v42 = vld [vmem:[#allocation5 + $0xc1] sm:$0xff]  ;;  %4390 = vmatmul.msk.f32.gmra.mxu0 %vm414_vm4, %v481_v29  ;;  %424 = vst.msk [vmem:[#allocation5 + $0x81] sm:$0xff] %vm414_vm4, %v390_v43  ;;  %vm342_vm1 = vcmp.ge.f32.partialorder %v310_v41, 0.0  ;;  %v374_v48 = vmul.f32 0.1, %v310_v41  ;;  %v381_v49 = vsel %vm317_vm0, %v285_v40, %v349_v45  ;;  %vm335_vm5 = vcmp.ge.f32.partialorder %v303_v51, 0.0 }
  0x63   : > { %4405 = vmatmul.msk.f32.vlgmr.msra.gmra.mxu2 %vm414_vm4, %v5184_v42  ;;  %v5190_v47 = vld [vmem:[#allocation5 + $0x121] sm:$0xff]  ;;  %432 = vst.msk [vmem:[#allocation5 + $0xe1] sm:$0xff] %vm414_vm4, %v398_v44  ;;  %v367_v54 = vmul.f32 0.1, %v303_v51  ;;  %v391_v55 = vsel %vm327_vm2, %v295_v46, %v359_v50  ;;  %v311_v57 = vld [vmem:[%s5074_s11 + $0xd0] sm:$0xff]  ;;  %v296_v58 = vld [vmem:[%s5074_s11 + $0x58] sm:$0xff] }
  0x64   : > { %4413 = vmatmul.msk.f32.vlgmr.msra.gmra.mxu3 %vm414_vm4, %v5190_v47  ;;  %v286_v52 = vld [vmem:[%s5074_s11 + $0x8] sm:$0xff]  ;;  %415 = vst.msk [vmem:[#allocation5 + $0x19] sm:$0xff] %vm414_vm4, %v381_v49  ;;  %v406_v53 = vsel %vm342_vm1, %v310_v41, %v374_v48  ;;  %vm343_vm7 = vcmp.ge.f32.partialorder %v311_v57, 0.0  ;;  %v375_v61 = vmul.f32 0.1, %v311_v57  ;;  %vm328_vm8 = vcmp.ge.f32.partialorder %v296_v58, 0.0 }
  0x65   : > { %vm318_vm6 = vcmp.ge.f32.partialorder %v286_v52, 0.0  ;;  %440 = vst.msk [vmem:[#allocation5 + $0x141] sm:$0xff] %vm414_vm4, %v406_v53  ;;  %v350_v56 = vmul.f32 0.1, %v286_v52  ;;  %v5203_v59 = vld [vmem:[#allocation5 + $0x69] sm:$0xff]  ;;  %v399_v60 = vsel %vm335_vm5, %v303_v51, %v367_v54  ;;  %v304_v1 = vld [vmem:[%s5074_s11 + $0x98] sm:$0xff] }
  0x66   : > { %425 = vst.msk [vmem:[#allocation5 + $0x91] sm:$0xff] %vm414_vm4, %v391_v55  ;;  %v5206_v62 = vld [vmem:[#allocation5 + $0xc9] sm:$0xff]  ;;  %v360_v0 = vmul.f32 0.1, %v296_v58  ;;  %v407_v4 = vsel %vm343_vm7, %v311_v57, %v375_v61  ;;  %vm336_vm9 = vcmp.ge.f32.partialorder %v304_v1, 0.0  ;;  %v312_v8 = vld [vmem:[%s5074_s11 + $0xd8] sm:$0xff] }
  0x67   : > { %433 = vst.msk [vmem:[#allocation5 + $0xf1] sm:$0xff] %vm414_vm4, %v399_v60  ;;  %v382_v63 = vsel %vm318_vm6, %v286_v52, %v350_v56  ;;  %v287_v2 = vld [vmem:[%s5074_s11 + $0x10] sm:$0xff]  ;;  %v368_v5 = vmul.f32 0.1, %v304_v1  ;;  %v297_v9 = vld [vmem:[%s5074_s11 + $0x60] sm:$0xff]  ;;  %vm344_vm11 = vcmp.ge.f32.partialorder %v312_v8, 0.0 }
  0x68   : > { %v5211_v3 = vld [vmem:[#allocation5 + $0x129] sm:$0xff]  ;;  %416 = vst.msk [vmem:[#allocation5 + $0x21] sm:$0xff] %vm414_vm4, %v382_v63  ;;  %vm319_vm10 = vcmp.ge.f32.partialorder %v287_v2, 0.0  ;;  %v392_v6 = vsel %vm328_vm8, %v296_v58, %v360_v0  ;;  %v351_v7 = vmul.f32 0.1, %v287_v2  ;;  %vm329_vm12 = vcmp.ge.f32.partialorder %v297_v9, 0.0 }
  0x69   : > { %4398 = vmatmul.msk.f32.gmra.mxu1 %vm414_vm4, %v5203_v59  ;;  %441 = vst.msk [vmem:[#allocation5 + $0x151] sm:$0xff] %vm414_vm4, %v407_v4  ;;  %v400_v10 = vsel %vm336_vm9, %v304_v1, %v368_v5  ;;  %v376_v11 = vmul.f32 0.1, %v312_v8  ;;  %v361_v14 = vmul.f32 0.1, %v297_v9  ;;  %v305_v15 = vld [vmem:[%s5074_s11 + $0xa0] sm:$0xff] }
  0x6a   : > { %426 = vst.msk [vmem:[#allocation5 + $0x99] sm:$0xff] %vm414_vm4, %v392_v6  ;;  %v383_v13 = vsel %vm319_vm10, %v287_v2, %v351_v7  ;;  %v288_v16 = vld [vmem:[%s5074_s11 + $0x18] sm:$0xff]  ;;  %vm337_vm13 = vcmp.ge.f32.partialorder %v305_v15, 0.0  ;;  %v369_v18 = vmul.f32 0.1, %v305_v15  ;;  %v313_v21 = vld [vmem:[%s5074_s11 + $0xe0] sm:$0xff] }
  0x6b   : > { %4406 = vmatmul.msk.f32.gmra.mxu2 %vm414_vm4, %v5206_v62  ;;  %v5224_v12 = vld [vmem:[#allocation5 + $0x19] sm:$0xff]  ;;  %434 = vst.msk [vmem:[#allocation5 + $0xf9] sm:$0xff] %vm414_vm4, %v400_v10  ;;  %v408_v17 = vsel %vm344_vm11, %v312_v8, %v376_v11  ;;  %vm320_vm14 = vcmp.ge.f32.partialorder %v288_v16, 0.0  ;;  %v393_v19 = vsel %vm329_vm12, %v297_v9, %v361_v14  ;;  %v352_v20 = vmul.f32 0.1, %v288_v16  ;;  %v298_v25 = vld [vmem:[%s5074_s11 + $0x68] sm:$0xff] }
  0x6c   : > { %4414 = vmatmul.msk.f32.gmra.mxu3 %vm414_vm4, %v5211_v3  ;;  %4391 = vmatmul.msk.f32.gmra.mxu0 %vm414_vm4, %v5224_v12  ;;  %417 = vst.msk [vmem:[#allocation5 + $0x31] sm:$0xff] %vm414_vm4, %v383_v13  ;;  %v5235_v22 = vld [vmem:[#allocation5 + $0x79] sm:$0xff]  ;;  %v401_v23 = vsel %vm337_vm13, %v305_v15, %v369_v18  ;;  %vm345_vm15 = vcmp.ge.f32.partialorder %v313_v21, 0.0  ;;  %v377_v24 = vmul.f32 0.1, %v313_v21  ;;  %v306_v29 = vld [vmem:[%s5074_s11 + $0xa8] sm:$0xff] }
  0x6d   : > { %442 = vst.msk [vmem:[#allocation5 + $0x159] sm:$0xff] %vm414_vm4, %v408_v17  ;;  %v5239_v26 = vld [vmem:[#allocation5 + $0xd9] sm:$0xff]  ;;  %v384_v27 = vsel %vm320_vm14, %v288_v16, %v352_v20  ;;  %v362_v28 = vmul.f32 0.1, %v298_v25  ;;  %vm330_vm0 = vcmp.ge.f32.partialorder %v298_v25, 0.0  ;;  %vm338_vm1 = vcmp.ge.f32.partialorder %v306_v29, 0.0 }
  0x6e   : > { %427 = vst.msk [vmem:[#allocation5 + $0xa9] sm:$0xff] %vm414_vm4, %v393_v19  ;;  %v5243_v30 = vld [vmem:[#allocation5 + $0x139] sm:$0xff]  ;;  %v409_v31 = vsel %vm345_vm15, %v313_v21, %v377_v24  ;;  %v370_v32 = vmul.f32 0.1, %v306_v29  ;;  %v314_v36 = vld [vmem:[%s5074_s11 + $0xe8] sm:$0xff]  ;;  %v5281_v52 = vld [vmem:[#allocation5 + $0x91] sm:$0xff] }
  0x6f   : > { %435 = vst.msk [vmem:[#allocation5 + $0x109] sm:$0xff] %vm414_vm4, %v401_v23  ;;  %v5248_v33 = vld [vmem:[#allocation5 + $0x21] sm:$0xff]  ;;  %v394_v34 = vsel %vm330_vm0, %v298_v25, %v362_v28  ;;  %vm346_vm5 = vcmp.ge.f32.partialorder %v314_v36, 0.0  ;;  %v378_v40 = vmul.f32 0.1, %v314_v36  ;;  %v5283_v53 = vld [vmem:[#allocation5 + $0xf1] sm:$0xff] }
  0x70   : > { %418 = vst.msk [vmem:[#allocation5 + $0x39] sm:$0xff] %vm414_vm4, %v384_v27  ;;  %v289_v35 = vld [vmem:[%s5074_s11 + $0x20] sm:$0xff]  ;;  %v402_v37 = vsel %vm338_vm1, %v306_v29, %v370_v32  ;;  %v290_v48 = vld [vmem:[%s5074_s11 + $0x28] sm:$0xff]  ;;  %v5285_v54 = vld [vmem:[#allocation5 + $0x151] sm:$0xff] }
  0x71   : > { %4399 = vmatmul.msk.f32.gmra.mxu1 %vm414_vm4, %v5235_v22  ;;  %443 = vst.msk [vmem:[#allocation5 + $0x169] sm:$0xff] %vm414_vm4, %v409_v31  ;;  %vm321_vm2 = vcmp.ge.f32.partialorder %v289_v35, 0.0  ;;  %v353_v39 = vmul.f32 0.1, %v289_v35  ;;  %v410_v43 = vsel %vm346_vm5, %v314_v36, %v378_v40  ;;  %v5262_v44 = vld [vmem:[#allocation5 + $0x81] sm:$0xff]  ;;  %vm322_vm6 = vcmp.ge.f32.partialorder %v290_v48, 0.0 }
  0x72   : > { %428 = vst.msk [vmem:[#allocation5 + $0xb1] sm:$0xff] %vm414_vm4, %v394_v34  ;;  %v5265_v45 = vld [vmem:[#allocation5 + $0xe1] sm:$0xff]  ;;  %v354_v50 = vmul.f32 0.1, %v290_v48  ;;  %v4590_v56 = vld [vmem:[%s8469_s1 + $0x18] sm:$0xf] }
  0x73   : > { %4407 = vmatmul.msk.f32.gmra.mxu2 %vm414_vm4, %v5239_v26  ;;  %436 = vst.msk [vmem:[#allocation5 + $0x111] sm:$0xff] %vm414_vm4, %v402_v37  ;;  %v385_v41 = vsel %vm321_vm2, %v289_v35, %v353_v39  ;;  %v5267_v46 = vld [vmem:[#allocation5 + $0x141] sm:$0xff]  ;;  %v5272_v49 = vld [vmem:[#allocation5 + $0x31] sm:$0xff]  ;;  %v4624_v57 = vld [vmem:[%s8469_s1 + $0x1c] sm:$0xf] }
  0x74   : > { %4415 = vmatmul.msk.f32.gmra.mxu3 %vm414_vm4, %v5243_v30  ;;  %4392 = vmatmul.msk.f32.gmra.mxu0 %vm414_vm4, %v5248_v33  ;;  %419 = vst.msk [vmem:[#allocation5 + $0x49] sm:$0xff] %vm414_vm4, %v385_v41  ;;  %v386_v51 = vsel %vm322_vm6, %v290_v48, %v354_v50  ;;  %v4556_v58 = vld [vmem:[%s8469_s1 + $0x14] sm:$0xf]  ;;  %v5309_v60 = vld [vmem:[#allocation5 + $0x99] sm:$0xff]  ;;  %v939_v11 = vld [vmem:[#allocation5 + $0x2] sm:$0xff] }
  0x75   : > { %444 = vst.msk [vmem:[#allocation5 + $0x171] sm:$0xff] %vm414_vm4, %v410_v43  ;;  %4591 = vmatpush.msk.msra.mxu2 %vm610_vm3, %v4590_v56  ;;  %4625 = vmatpush.msk.msra.mxu3 %vm610_vm3, %v4624_v57  ;;  %v5311_v61 = vld [vmem:[#allocation5 + $0xf9] sm:$0xff]  ;;  %v5329_v2 = vld [vmem:[#allocation5 + $0xa9] sm:$0xff] }
  0x76   : > { %420 = vst.msk [vmem:[#allocation5 + $0x51] sm:$0xff] %vm414_vm4, %v386_v51  ;;  %4557 = vmatpush.msk.msra.mxu1 %vm610_vm3, %v4556_v58  ;;  %v5313_v63 = vld [vmem:[#allocation5 + $0x159] sm:$0xff]  ;;  %v5331_v4 = vld [vmem:[#allocation5 + $0x109] sm:$0xff] }
  0x77   : > { %v5289_v55 = vld [vmem:[#allocation5 + $0x39] sm:$0xff]  ;;  %v448_v14 = vld [vmem:[#allocation5 + $0x8] sm:$0xff]  ;;  %v5371_v17 = vld [vmem:[#allocation5 + $0x30] sm:$0xff] }
  0x78   : > { %v4658_v1 = vld [vmem:[%s8469_s1 + $0x20] sm:$0xf]  ;;  %v5333_v5 = vld [vmem:[#allocation5 + $0x169] sm:$0xff]  ;;  %v5391_v20 = vld [vmem:[#allocation5 + $0x32] sm:$0xff] }
  0x79   : > { %4400 = vmatmul.msk.f32.gmra.mxu1 %vm414_vm4, %v5262_v44  ;;  %4659 = vmatpush.msk.msra.mxu0 %vm610_vm3, %v4658_v1  ;;  %v5345_v7 = vld [vmem:[#allocation5 + $0xb1] sm:$0xff]  ;;  %v447_v10 = vld [vmem:[#allocation5] sm:$0xff] }
  0x7a   : > { %v5347_v8 = vld [vmem:[#allocation5 + $0x111] sm:$0xff]  ;;  %v1218_v16 = vld [vmem:[#allocation5 + $0x20] sm:$0xff] }
  0x7b   : > { %4408 = vmatmul.msk.f32.gmra.mxu2 %vm414_vm4, %v5265_v45  ;;  %v5317_v0 = vld [vmem:[#allocation5 + $0x49] sm:$0xff]  ;;  %v1217_v13 = vld [vmem:[#allocation5 + $0x18] sm:$0xff]  ;;  %v5417_v27 = vld [vmem:[#allocation5 + $0x60] sm:$0xff] }
  0x7c   : > { %4416 = vmatmul.msk.f32.gmra.mxu3 %vm414_vm4, %v5267_v46  ;;  %4393 = vmatmul.msk.f32.gmra.mxu0 %vm414_vm4, %v5272_v49  ;;  %v5349_v9 = vld [vmem:[#allocation5 + $0x171] sm:$0xff]  ;;  %v5380_v18 = vld [vmem:[#allocation5 + $0x22] sm:$0xff]  ;;  %v5403_v23 = vld [vmem:[#allocation5 + $0x3a] sm:$0xff] }
  0x7d   : > { %v5337_v6 = vld [vmem:[#allocation5 + $0x51] sm:$0xff]  ;;  %v5393_v21 = vld [vmem:[#allocation5 + $0x48] sm:$0xff]  ;;  %v5465_v37 = vld [vmem:[#allocation5 + $0x80] sm:$0xff] }
  0x7e   : > { %v940_v15 = vld [vmem:[#allocation5 + $0xa] sm:$0xff]  ;;  %v5382_v19 = vld [vmem:[#allocation5 + $0x38] sm:$0xff]  ;;  %8582 = vst [vmem:[#allocation16_spill] sm:$0xff] %v5465_v37  ;;  %v5503_v57 = vld [vmem:[#allocation5 + $0x82] sm:$0xff] }
  0x7f   : > { %v5405_v24 = vld [vmem:[#allocation5 + $0x50] sm:$0xff]  ;;  %8587 = vst [vmem:[#allocation21_spill] sm:$0xff] %v5503_v57  ;;  %v5505_v58 = vld [vmem:[#allocation5 + $0x98] sm:$0xff] }
  0x80   : > { %v5415_v25 = vld [vmem:[#allocation5 + $0x4a] sm:$0xff]  ;;  %v5427_v28 = vld [vmem:[#allocation5 + $0x52] sm:$0xff]  ;;  %8588 = vst [vmem:[#allocation22_spill] sm:$0xff] %v5505_v58 }
  0x81   : > { %4401 = vmatmul.msk.f32.gmra.mxu1 %vm414_vm4, %v5281_v52  ;;  %v5463_v36 = vld [vmem:[#allocation5 + $0x6a] sm:$0xff] }
  0x82   : > { %8581 = vst [vmem:[#allocation15_spill] sm:$0xff] %v5463_v36  ;;  %v5485_v48 = vld [vmem:[#allocation5 + $0x90] sm:$0xff] }
  0x83   : > { %4409 = vmatmul.msk.f32.gmra.mxu2 %vm414_vm4, %v5283_v53  ;;  %8585 = vst [vmem:[#allocation19_spill] sm:$0xff] %v5485_v48 }
  0x84   : > { %4417 = vmatmul.msk.f32.gmra.mxu3 %vm414_vm4, %v5285_v54  ;;  %4394 = vmatmul.msk.f32.gmra.mxu0 %vm414_vm4, %v5289_v55 }
  0x89   : > { %4402 = vmatmul.msk.f32.gmra.mxu1 %vm414_vm4, %v5309_v60 }
  0x8b   : > { %4410 = vmatmul.msk.f32.gmra.mxu2 %vm414_vm4, %v5311_v61 }
  0x8c   : > { %4418 = vmatmul.msk.f32.gmra.mxu3 %vm414_vm4, %v5313_v63  ;;  %4395 = vmatmul.msk.f32.gmra.mxu0 %vm414_vm4, %v5317_v0 }
  0x91   : > { %4403 = vmatmul.msk.f32.gmra.mxu1 %vm414_vm4, %v5329_v2 }
  0x93   : > { %4411 = vmatmul.msk.f32.gmra.mxu2 %vm414_vm4, %v5331_v4 }
  0x94   : > { %4419 = vmatmul.msk.f32.gmra.mxu3 %vm414_vm4, %v5333_v5  ;;  %4396 = vmatmul.msk.f32.gmra.mxu0 %vm414_vm4, %v5337_v6 }
  0x99   : > { %4404 = vmatmul.msk.f32.gmra.mxu1 %vm414_vm4, %v5345_v7 }
  0x9b   : > { %4412 = vmatmul.msk.f32.gmra.mxu2 %vm414_vm4, %v5347_v8 }
  0x9c   : > { %4420 = vmatmul.msk.f32.gmra.mxu3 %vm414_vm4, %v5349_v9  ;;  %4524 = vmatmul.msk.f32.vlgmr.msrb.gmra.mxu0 %vm414_vm4, %v5224_v12  ;;  %v5369_v12 = vld [vmem:[#allocation5 + $0x1a] sm:$0xff] }
  0xa1   : > { %4422 = vmatmul.msk.f32.vlgmr.msrb.gmra.mxu1 %vm414_vm4, %v447_v10 }
  0xa3   : > { %4456 = vmatmul.msk.f32.vlgmr.msrb.gmra.mxu2 %vm414_vm4, %v939_v11 }
  0xa4   : > { %4490 = vmatmul.msk.f32.vlgmr.msrb.gmra.mxu3 %vm414_vm4, %v1217_v13  ;;  %4525 = vmatmul.msk.f32.gmra.mxu0 %vm414_vm4, %v5248_v33  ;;  %v5447_v33 = vld [vmem:[#allocation5 + $0x78] sm:$0xff] }
  0xa5   : > { %8579 = vst [vmem:[#allocation13_spill] sm:$0xff] %v5447_v33 }
  0xa9   : > { %4423 = vmatmul.msk.f32.gmra.mxu1 %vm414_vm4, %v448_v14  ;;  %v5525_v14 = vld [vmem:[#allocation5 + $0xa8] sm:$0xff] }
  0xaa   : > { %8591 = vst [vmem:[#allocation25_spill] sm:$0xff] %v5525_v14 }
  0xab   : > { %4457 = vmatmul.msk.f32.gmra.mxu2 %vm414_vm4, %v940_v15 }
  0xac   : > { %4491 = vmatmul.msk.f32.gmra.mxu3 %vm414_vm4, %v1218_v16  ;;  %4526 = vmatmul.msk.f32.gmra.mxu0 %vm414_vm4, %v5272_v49 }
  0xb1   : > { %4424 = vmatmul.msk.f32.gmra.mxu1 %vm414_vm4, %v1217_v13  ;;  %v5523_v13 = vld [vmem:[#allocation5 + $0x92] sm:$0xff] }
  0xb2   : > { %8590 = vst [vmem:[#allocation24_spill] sm:$0xff] %v5523_v13 }
  0xb3   : > { %4458 = vmatmul.msk.f32.gmra.mxu2 %vm414_vm4, %v5369_v12 }
  0xb4   : > { %4492 = vmatmul.msk.f32.gmra.mxu3 %vm414_vm4, %v5371_v17  ;;  %4527 = vmatmul.msk.f32.gmra.mxu0 %vm414_vm4, %v5289_v55 }
  0xb9   : > { %4425 = vmatmul.msk.f32.gmra.mxu1 %vm414_vm4, %v1218_v16 }
  0xbb   : > { %4459 = vmatmul.msk.f32.gmra.mxu2 %vm414_vm4, %v5380_v18 }
  0xbc   : > { %4493 = vmatmul.msk.f32.gmra.mxu3 %vm414_vm4, %v5382_v19  ;;  %4528 = vmatmul.msk.f32.gmra.mxu0 %vm414_vm4, %v5317_v0 }
  0xc1   : > { %4426 = vmatmul.msk.f32.gmra.mxu1 %vm414_vm4, %v5371_v17 }
  0xc3   : > { %4460 = vmatmul.msk.f32.gmra.mxu2 %vm414_vm4, %v5391_v20 }
  0xc4   : > { %4494 = vmatmul.msk.f32.gmra.mxu3 %vm414_vm4, %v5393_v21  ;;  %4529 = vmatmul.msk.f32.gmra.mxu0 %vm414_vm4, %v5337_v6 }
  0xc9   : > { %4427 = vmatmul.msk.f32.gmra.mxu1 %vm414_vm4, %v5382_v19 }
  0xcb   : > { %4461 = vmatmul.msk.f32.gmra.mxu2 %vm414_vm4, %v5403_v23 }
  0xcc   : > { %4495 = vmatmul.msk.f32.gmra.mxu3 %vm414_vm4, %v5405_v24  ;;  %4530 = vmatmul.msk.f32.gmra.mxu0 %vm414_vm4, %v5177_v38  ;;  %v5431_v38 = vld [vmem:[#allocation5 + $0x68] sm:$0xff] }
  0xcd   : > { %8578 = vst [vmem:[#allocation12_spill] sm:$0xff] %v5431_v38 }
  0xd1   : > { %4428 = vmatmul.msk.f32.gmra.mxu1 %vm414_vm4, %v5393_v21 }
  0xd3   : > { %4462 = vmatmul.msk.f32.gmra.mxu2 %vm414_vm4, %v5415_v25 }
  0xd4   : > { %4496 = vmatmul.msk.f32.gmra.mxu3 %vm414_vm4, %v5417_v27  ;;  %4531 = vmatmul.msk.f32.gmra.mxu0 %vm414_vm4, %v5203_v59  ;;  %v5443_v59 = vld [vmem:[#allocation5 + $0x62] sm:$0xff] }
  0xd7   : > { %v5429_v29 = vpop.f32.mrf.mxu0 }
  0xd9   : > { %4429 = vmatmul.msk.f32.gmra.mxu1 %vm414_vm4, %v5405_v24 }
  0xdb   : > { %4463 = vmatmul.msk.f32.gmra.mxu2 %vm414_vm4, %v5427_v28 }
  0xdc   : > { %4497 = vmatmul.msk.f32.gmra.mxu3 %vm414_vm4, %v5431_v38  ;;  %4532 = vmatmul.msk.f32.gmra.mxu0 %vm414_vm4, %v5235_v22 }
  0xde   : > { %v5441_v31 = vpop.f32.mrf.mxu1 }
  0xdf   : > { %v5445_v32 = vpop.f32.mrf.mxu0 }
  0xe1   : > { %4430 = vmatmul.msk.f32.gmra.mxu1 %vm414_vm4, %v5417_v27 }
  0xe3   : > { %4464 = vmatmul.msk.f32.gmra.mxu2 %vm414_vm4, %v5443_v59 }
  0xe4   : > { %4498 = vmatmul.msk.f32.gmra.mxu3 %vm414_vm4, %v5447_v33  ;;  %4533 = vmatmul.msk.f32.gmra.mxu0 %vm414_vm4, %v5262_v44  ;;  %v5483_v44 = vld [vmem:[#allocation5 + $0x7a] sm:$0xff] }
  0xe5   : > { %8584 = vst [vmem:[#allocation18_spill] sm:$0xff] %v5483_v44 }
  0xe6   : > { %v5457_v22 = vpop.f32.mrf.mxu2  ;;  %v5459_v34 = vpop.f32.mrf.mxu1 }
  0xe7   : > { %v5461_v35 = vpop.f32.mrf.mxu3 }
  0xe8   : > { %8580 = vst [vmem:[#allocation14_spill] sm:$0xff] %v5461_v35 }
  0xe9   : > { %4431 = vmatmul.msk.f32.gmra.mxu1 %vm414_vm4, %v5431_v38  ;;  %v5469_v39 = vpop.f32.mrf.mxu0  ;;  %v5612_v38 = vld [vmem:[#allocation5 + $0xca] sm:$0xff] }
  0xeb   : > { %4465 = vmatmul.msk.f32.gmra.mxu2 %vm414_vm4, %v5463_v36 }
  0xec   : > { %4499 = vmatmul.msk.f32.gmra.mxu3 %vm414_vm4, %v5465_v37  ;;  %4534 = vmatmul.msk.f32.gmra.mxu0 %vm414_vm4, %v5281_v52 }
  0xee   : > { %v5477_v40 = vpop.f32.mrf.mxu2  ;;  %v5479_v41 = vpop.f32.mrf.mxu1 }
  0xef   : > { %v5481_v43 = vpop.f32.mrf.mxu3 }
  0xf0   : > { %8583 = vst [vmem:[#allocation17_spill] sm:$0xff] %v5481_v43  ;;  %v5545_v43 = vld [vmem:[#allocation5 + $0xb0] sm:$0xff] }
  0xf1   : > { %4432 = vmatmul.msk.f32.gmra.mxu1 %vm414_vm4, %v5447_v33  ;;  %v5489_v50 = vpop.f32.mrf.mxu0  ;;  %8595 = vst [vmem:[#allocation29_spill] sm:$0xff] %v5545_v43  ;;  %v5599_v33 = vld [vmem:[#allocation5 + $0xc2] sm:$0xff] }
  0xf2   : > { %8605 = vst [vmem:[#allocation39_spill] sm:$0xff] %v5599_v33 }
  0xf3   : > { %4466 = vmatmul.msk.f32.gmra.mxu2 %vm414_vm4, %v5483_v44  ;;  %v5601_v44 = vld [vmem:[#allocation5 + $0xd8] sm:$0xff] }
  0xf4   : > { %4500 = vmatmul.msk.f32.gmra.mxu3 %vm414_vm4, %v5485_v48  ;;  %4535 = vmatmul.msk.f32.gmra.mxu0 %vm414_vm4, %v5309_v60 }
  0xf6   : > { %v5497_v51 = vpop.f32.mrf.mxu2  ;;  %v5499_v52 = vpop.f32.mrf.mxu1 }
  0xf7   : > { %v5501_v56 = vpop.f32.mrf.mxu3 }
  0xf8   : > { %8586 = vst [vmem:[#allocation20_spill] sm:$0xff] %v5501_v56  ;;  %v5543_v56 = vld [vmem:[#allocation5 + $0x9a] sm:$0xff] }
  0xf9   : > { %4433 = vmatmul.msk.f32.gmra.mxu1 %vm414_vm4, %v5465_v37  ;;  %v5509_v1 = vpop.f32.mrf.mxu0  ;;  %8594 = vst [vmem:[#allocation28_spill] sm:$0xff] %v5543_v56 }
  0xfb   : > { %4467 = vmatmul.msk.f32.gmra.mxu2 %vm414_vm4, %v5503_v57  ;;  %v5583_v57 = vld [vmem:[#allocation5 + $0xb2] sm:$0xff] }
  0xfc   : > { %4501 = vmatmul.msk.f32.gmra.mxu3 %vm414_vm4, %v5505_v58  ;;  %4536 = vmatmul.msk.f32.gmra.mxu0 %vm414_vm4, %v5329_v2  ;;  %8602 = vst [vmem:[#allocation36_spill] sm:$0xff] %v5583_v57 }
  0xfe   : > { %v5517_v60 = vpop.f32.mrf.mxu2  ;;  %v5519_v10 = vpop.f32.mrf.mxu1 }
  0xff   : > { %v5521_v11 = vpop.f32.mrf.mxu3 }
 0x100   : > { %8589 = vst [vmem:[#allocation23_spill] sm:$0xff] %v5521_v11 }
 0x101   : > { %4434 = vmatmul.msk.f32.gmra.mxu1 %vm414_vm4, %v5485_v48  ;;  %v5529_v15 = vpop.f32.mrf.mxu0 }
 0x103   : > { %4468 = vmatmul.msk.f32.gmra.mxu2 %vm414_vm4, %v5523_v13  ;;  %v5563_v13 = vld [vmem:[#allocation5 + $0xaa] sm:$0xff] }
 0x104   : > { %4502 = vmatmul.msk.f32.gmra.mxu3 %vm414_vm4, %v5525_v14  ;;  %4537 = vmatmul.msk.f32.gmra.mxu0 %vm414_vm4, %v5345_v7  ;;  %8598 = vst [vmem:[#allocation32_spill] sm:$0xff] %v5563_v13 }
 0x106   : > { %v5537_v2 = vpop.f32.mrf.mxu2  ;;  %v5539_v16 = vpop.f32.mrf.mxu1 }
 0x107   : > { %8592 = vst [vmem:[#allocation26_spill] sm:$0xff] %v5537_v2  ;;  %v5541_v11 = vpop.f32.mrf.mxu3 }
 0x108   : > { %8593 = vst [vmem:[#allocation27_spill] sm:$0xff] %v5541_v11 }
 0x109   : > { %4435 = vmatmul.msk.f32.gmra.mxu1 %vm414_vm4, %v5505_v58  ;;  %v5549_v35 = vpop.f32.mrf.mxu0  ;;  %v5565_v58 = vld [vmem:[#allocation5 + $0xc0] sm:$0xff] }
 0x10a   : > { %8599 = vst [vmem:[#allocation33_spill] sm:$0xff] %v5565_v58 }
 0x10b   : > { %4469 = vmatmul.msk.f32.gmra.mxu2 %vm414_vm4, %v5543_v56 }
 0x10c   : > { %4503 = vmatmul.msk.f32.gmra.mxu3 %vm414_vm4, %v5545_v43  ;;  %4538 = vmatmul.msk.f32.gmra.mxu0 %vm414_vm4, %v5184_v42 }
 0x10e   : > { %v5557_v7 = vpop.f32.mrf.mxu2  ;;  %v5559_v11 = vpop.f32.mrf.mxu1 }
 0x10f   : > { %8596 = vst [vmem:[#allocation30_spill] sm:$0xff] %v5557_v7  ;;  %v5561_v48 = vpop.f32.mrf.mxu3 }
 0x110   : > { %8597 = vst [vmem:[#allocation31_spill] sm:$0xff] %v5561_v48 }
 0x111   : > { %4436 = vmatmul.msk.f32.gmra.mxu1 %vm414_vm4, %v5525_v14  ;;  %v5569_v56 = vpop.f32.mrf.mxu0  ;;  %v5585_v14 = vld [vmem:[#allocation5 + $0xc8] sm:$0xff] }
 0x113   : > { %4470 = vmatmul.msk.f32.gmra.mxu2 %vm414_vm4, %v5563_v13 }
 0x114   : > { %4504 = vmatmul.msk.f32.gmra.mxu3 %vm414_vm4, %v5565_v58  ;;  %4539 = vmatmul.msk.f32.gmra.mxu0 %vm414_vm4, %v5206_v62 }
 0x116   : > { %v5577_v42 = vpop.f32.mrf.mxu2  ;;  %v5579_v48 = vpop.f32.mrf.mxu1 }
 0x117   : > { %8600 = vst [vmem:[#allocation34_spill] sm:$0xff] %v5577_v42  ;;  %v5581_v37 = vpop.f32.mrf.mxu3 }
 0x118   : > { %8601 = vst [vmem:[#allocation35_spill] sm:$0xff] %v5581_v37 }
 0x119   : > { %4437 = vmatmul.msk.f32.gmra.mxu1 %vm414_vm4, %v5545_v43  ;;  %v1645_v13 = vpop.f32.mrf.mxu0 }
 0x11b   : > { %4471 = vmatmul.msk.f32.gmra.mxu2 %vm414_vm4, %v5583_v57 }
 0x11c   : > { %4505 = vmatmul.msk.f32.gmra.mxu3 %vm414_vm4, %v5585_v14  ;;  %4540 = vmatmul.msk.f32.gmra.mxu0 %vm414_vm4, %v5239_v26 }
 0x11e   : > { %v5595_v62 = vpop.f32.mrf.mxu2  ;;  %v843_v42 = vpop.f32.mrf.mxu1 }
 0x11f   : > { %8603 = vst [vmem:[#allocation37_spill] sm:$0xff] %v5595_v62  ;;  %v5597_v37 = vpop.f32.mrf.mxu3  ;;  %v844_v26 = vadd.f32 %v843_v42, %v5429_v29  ;;  %v5627_v42 = vld [vmem:[#allocation5 + $0xda] sm:$0xff] }
 0x120   : > { %8604 = vst [vmem:[#allocation38_spill] sm:$0xff] %v5597_v37 }
 0x121   : > { %4438 = vmatmul.msk.f32.gmra.mxu1 %vm414_vm4, %v5565_v58  ;;  %v1648_v43 = vpop.f32.mrf.mxu0  ;;  %v5614_v58 = vld [vmem:[#allocation5 + $0xe0] sm:$0xff] }
 0x123   : > { %4472 = vmatmul.msk.f32.gmra.mxu2 %vm414_vm4, %v5599_v33 }
 0x124   : > { %4506 = vmatmul.msk.f32.gmra.mxu3 %vm414_vm4, %v5601_v44  ;;  %4541 = vmatmul.msk.f32.gmra.mxu0 %vm414_vm4, %v5265_v45 }
 0x126   : > { %v1089_v37 = vpop.f32.mrf.mxu2  ;;  %v846_v62 = vpop.f32.mrf.mxu1 }
 0x127   : > { %v1185_v57 = vadd.f32 %v1089_v37, %v844_v26  ;;  %v1367_v7 = vpop.f32.mrf.mxu3  ;;  %v847_v45 = vadd.f32 %v846_v62, %v5445_v32 }
 0x129   : > { %v1463_v36 = vadd.f32 %v1367_v7, %v1185_v57  ;;  %4439 = vmatmul.msk.f32.gmra.mxu1 %vm414_vm4, %v5585_v14  ;;  %v1651_v33 = vpop.f32.mrf.mxu0 }
 0x12b   : > { %v5618_v2 = vadd.f32 %v1645_v13, %v1463_v36  ;;  %4473 = vmatmul.msk.f32.gmra.mxu2 %vm414_vm4, %v5612_v38  ;;  %v5629_v36 = vld [vmem:[#allocation5 + $0xf0] sm:$0xff] }
 0x12c   : > { %4507 = vmatmul.msk.f32.gmra.mxu3 %vm414_vm4, %v5614_v58  ;;  %4542 = vmatmul.msk.f32.gmra.mxu0 %vm414_vm4, %v5283_v53 }
 0x12d   : > { %8606 = vst [vmem:[#allocation40_spill] sm:$0xff] %v5618_v2 }
 0x12e   : > { %v1092_v29 = vpop.f32.mrf.mxu2  ;;  %v849_v57 = vpop.f32.mrf.mxu1 }
 0x12f   : > { %v1186_v37 = vadd.f32 %v1092_v29, %v847_v45  ;;  %v1370_v7 = vpop.f32.mrf.mxu3  ;;  %v850_v53 = vadd.f32 %v849_v57, %v5469_v39 }
 0x131   : > { %v1464_v26 = vadd.f32 %v1370_v7, %v1186_v37  ;;  %4440 = vmatmul.msk.f32.gmra.mxu1 %vm414_vm4, %v5601_v44  ;;  %v1654_v13 = vpop.f32.mrf.mxu0  ;;  %v5642_v37 = vld [vmem:[#allocation5 + $0xe2] sm:$0xff] }
 0x133   : > { %v5633_v2 = vadd.f32 %v1648_v43, %v1464_v26  ;;  %4474 = vmatmul.msk.f32.gmra.mxu2 %vm414_vm4, %v5627_v42  ;;  %v5644_v43 = vld [vmem:[#allocation5 + $0xf8] sm:$0xff] }
 0x134   : > { %4508 = vmatmul.msk.f32.gmra.mxu3 %vm414_vm4, %v5629_v36  ;;  %4543 = vmatmul.msk.f32.gmra.mxu0 %vm414_vm4, %v5311_v61 }
 0x135   : > { %8607 = vst [vmem:[#allocation41_spill] sm:$0xff] %v5633_v2 }
 0x136   : > { %v1095_v32 = vpop.f32.mrf.mxu2  ;;  %v852_v45 = vpop.f32.mrf.mxu1 }
 0x137   : > { %v1187_v62 = vadd.f32 %v1095_v32, %v850_v53  ;;  %v1373_v29 = vpop.f32.mrf.mxu3  ;;  %v853_v61 = vadd.f32 %v852_v45, %v5489_v50 }
 0x139   : > { %v1465_v7 = vadd.f32 %v1373_v29, %v1187_v62  ;;  %4441 = vmatmul.msk.f32.gmra.mxu1 %vm414_vm4, %v5614_v58  ;;  %v1657_v26 = vpop.f32.mrf.mxu0  ;;  %v5657_v62 = vld [vmem:[#allocation5 + $0xf2] sm:$0xff] }
 0x13b   : > { %v5648_v2 = vadd.f32 %v1651_v33, %v1465_v7  ;;  %4475 = vmatmul.msk.f32.gmra.mxu2 %vm414_vm4, %v5642_v37  ;;  %v5659_v33 = vld [vmem:[#allocation5 + $0x108] sm:$0xff] }
 0x13c   : > { %4509 = vmatmul.msk.f32.gmra.mxu3 %vm414_vm4, %v5644_v43  ;;  %4544 = vmatmul.msk.f32.gmra.mxu0 %vm414_vm4, %v5331_v4 }
 0x13d   : > { %8608 = vst [vmem:[#allocation42_spill] sm:$0xff] %v5648_v2 }
 0x13e   : > { %v1098_v39 = vpop.f32.mrf.mxu2  ;;  %v855_v53 = vpop.f32.mrf.mxu1 }
 0x13f   : > { %v1188_v57 = vadd.f32 %v1098_v39, %v853_v61  ;;  %v1376_v32 = vpop.f32.mrf.mxu3  ;;  %v856_v4 = vadd.f32 %v855_v53, %v5509_v1 }
 0x141   : > { %v1466_v29 = vadd.f32 %v1376_v32, %v1188_v57  ;;  %4442 = vmatmul.msk.f32.gmra.mxu1 %vm414_vm4, %v5629_v36  ;;  %v1660_v7 = vpop.f32.mrf.mxu0  ;;  %v5672_v57 = vld [vmem:[#allocation5 + $0xfa] sm:$0xff] }
 0x143   : > { %v5663_v2 = vadd.f32 %v1654_v13, %v1466_v29  ;;  %4476 = vmatmul.msk.f32.gmra.mxu2 %vm414_vm4, %v5657_v62  ;;  %v5674_v13 = vld [vmem:[#allocation5 + $0x110] sm:$0xff] }
 0x144   : > { %4510 = vmatmul.msk.f32.gmra.mxu3 %vm414_vm4, %v5659_v33  ;;  %4545 = vmatmul.msk.f32.gmra.mxu0 %vm414_vm4, %v5347_v8 }
 0x145   : > { %8609 = vst [vmem:[#allocation43_spill] sm:$0xff] %v5663_v2 }
 0x146   : > { %v1101_v50 = vpop.f32.mrf.mxu2  ;;  %v858_v61 = vpop.f32.mrf.mxu1 }
 0x147   : > { %v1189_v45 = vadd.f32 %v1101_v50, %v856_v4  ;;  %v1379_v39 = vpop.f32.mrf.mxu3  ;;  %v859_v8 = vadd.f32 %v858_v61, %v5529_v15 }
 0x149   : > { %v1467_v32 = vadd.f32 %v1379_v39, %v1189_v45  ;;  %4443 = vmatmul.msk.f32.gmra.mxu1 %vm414_vm4, %v5644_v43  ;;  %v1663_v29 = vpop.f32.mrf.mxu0  ;;  %v5687_v45 = vld [vmem:[#allocation5 + $0x10a] sm:$0xff] }
 0x14b   : > { %v5678_v2 = vadd.f32 %v1657_v26, %v1467_v32  ;;  %4477 = vmatmul.msk.f32.gmra.mxu2 %vm414_vm4, %v5672_v57  ;;  %v5689_v26 = vld [vmem:[#allocation5 + $0x120] sm:$0xff] }
 0x14c   : > { %4511 = vmatmul.msk.f32.gmra.mxu3 %vm414_vm4, %v5674_v13  ;;  %4546 = vmatmul.msk.f32.gmra.mxu0 %vm414_vm4, %v5190_v47  ;;  %8611 = vst [vmem:[#allocation45_spill] sm:$0xff] %v5689_v26 }
 0x14d   : > { %8610 = vst [vmem:[#allocation44_spill] sm:$0xff] %v5678_v2 }
 0x14e   : > { %v1104_v1 = vpop.f32.mrf.mxu2  ;;  %v861_v4 = vpop.f32.mrf.mxu1 }
 0x14f   : > { %v1190_v53 = vadd.f32 %v1104_v1, %v859_v8  ;;  %v1382_v50 = vpop.f32.mrf.mxu3  ;;  %v862_v47 = vadd.f32 %v861_v4, %v5549_v35 }
 0x151   : > { %v1468_v39 = vadd.f32 %v1382_v50, %v1190_v53  ;;  %4444 = vmatmul.msk.f32.gmra.mxu1 %vm414_vm4, %v5659_v33  ;;  %v1666_v32 = vpop.f32.mrf.mxu0  ;;  %v5702_v53 = vld [vmem:[#allocation5 + $0x112] sm:$0xff] }
 0x153   : > { %v5693_v2 = vadd.f32 %v1660_v7, %v1468_v39  ;;  %4478 = vmatmul.msk.f32.gmra.mxu2 %vm414_vm4, %v5687_v45  ;;  %v5704_v7 = vld [vmem:[#allocation5 + $0x128] sm:$0xff] }
 0x154   : > { %4512 = vmatmul.msk.f32.gmra.mxu3 %vm414_vm4, %v5689_v26  ;;  %4547 = vmatmul.msk.f32.gmra.mxu0 %vm414_vm4, %v5211_v3  ;;  %8613 = vst [vmem:[#allocation47_spill] sm:$0xff] %v5704_v7 }
 0x155   : > { %8612 = vst [vmem:[#allocation46_spill] sm:$0xff] %v5693_v2 }
 0x156   : > { %v1107_v15 = vpop.f32.mrf.mxu2  ;;  %v864_v8 = vpop.f32.mrf.mxu1 }
 0x157   : > { %v1191_v61 = vadd.f32 %v1107_v15, %v862_v47  ;;  %v1385_v1 = vpop.f32.mrf.mxu3  ;;  %v865_v3 = vadd.f32 %v864_v8, %v5569_v56 }
 0x159   : > { %v1469_v50 = vadd.f32 %v1385_v1, %v1191_v61  ;;  %4445 = vmatmul.msk.f32.gmra.mxu1 %vm414_vm4, %v5674_v13  ;;  %v1669_v39 = vpop.f32.mrf.mxu0  ;;  %v5717_v61 = vld [vmem:[#allocation5 + $0x122] sm:$0xff] }
 0x15b   : > { %v5708_v2 = vadd.f32 %v1663_v29, %v1469_v50  ;;  %4479 = vmatmul.msk.f32.gmra.mxu2 %vm414_vm4, %v5702_v53  ;;  %v5719_v29 = vld [vmem:[#allocation5 + $0x138] sm:$0xff] }
 0x15c   : > { %4513 = vmatmul.msk.f32.gmra.mxu3 %vm414_vm4, %v5704_v7  ;;  %4548 = vmatmul.msk.f32.gmra.mxu0 %vm414_vm4, %v5243_v30 }
 0x15d   : > { %8614 = vst [vmem:[#allocation48_spill] sm:$0xff] %v5708_v2 }
 0x15e   : > { %v1110_v35 = vpop.f32.mrf.mxu2  ;;  %v867_v47 = vpop.f32.mrf.mxu1 }
 0x15f   : > { %v1192_v4 = vadd.f32 %v1110_v35, %v865_v3  ;;  %v1388_v15 = vpop.f32.mrf.mxu3  ;;  %v868_v30 = vadd.f32 %v867_v47, %v5441_v31 }
 0x161   : > { %v1470_v1 = vadd.f32 %v1388_v15, %v1192_v4  ;;  %4446 = vmatmul.msk.f32.gmra.mxu1 %vm414_vm4, %v5689_v26  ;;  %v1672_v50 = vpop.f32.mrf.mxu0  ;;  %v5732_v4 = vld [vmem:[#allocation5 + $0x12a] sm:$0xff] }
 0x163   : > { %v5723_v2 = vadd.f32 %v1666_v32, %v1470_v1  ;;  %4480 = vmatmul.msk.f32.gmra.mxu2 %vm414_vm4, %v5717_v61  ;;  %v5734_v32 = vld [vmem:[#allocation5 + $0x140] sm:$0xff]  ;;  %v315_v1 = vld [vmem:[%s5074_s11 + $0xf0] sm:$0xff] }
 0x164   : > { %4514 = vmatmul.msk.f32.gmra.mxu3 %vm414_vm4, %v5719_v29  ;;  %4549 = vmatmul.msk.f32.gmra.mxu0 %vm414_vm4, %v5267_v46  ;;  %v379_v26 = vmul.f32 0.1, %v315_v1  ;;  %vm347_vm3 = vcmp.ge.f32.partialorder %v315_v1, 0.0 }
 0x165   : > { %8615 = vst [vmem:[#allocation49_spill] sm:$0xff] %v5723_v2 }
 0x166   : > { %v1113_v56 = vpop.f32.mrf.mxu2  ;;  %v870_v3 = vpop.f32.mrf.mxu1  ;;  %v411_v46 = vsel %vm347_vm3, %v315_v1, %v379_v26 }
 0x167   : > { %v1193_v8 = vadd.f32 %v1113_v56, %v868_v30  ;;  %v1391_v35 = vpop.f32.mrf.mxu3  ;;  %v871_v47 = vadd.f32 %v870_v3, %v5459_v34  ;;  %445 = vst.msk [vmem:[#allocation5 + $0x181] sm:$0xff] %vm414_vm4, %v411_v46 }
 0x169   : > { %v1471_v15 = vadd.f32 %v1391_v35, %v1193_v8  ;;  %4447 = vmatmul.msk.f32.gmra.mxu1 %vm414_vm4, %v5704_v7  ;;  %v1675_v2 = vpop.f32.mrf.mxu0  ;;  %v5749_v35 = vld [vmem:[#allocation5 + $0x13a] sm:$0xff] }
 0x16a   : > { %v316_v7 = vld [vmem:[%s5074_s11 + $0xf8] sm:$0xff] }
 0x16b   : > { %v5739_v31 = vadd.f32 %v1669_v39, %v1471_v15  ;;  %4481 = vmatmul.msk.f32.gmra.mxu2 %vm414_vm4, %v5732_v4  ;;  %v380_v34 = vmul.f32 0.1, %v316_v7  ;;  %vm348_vm7 = vcmp.ge.f32.partialorder %v316_v7, 0.0 }
 0x16c   : > { %4515 = vmatmul.msk.f32.gmra.mxu3 %vm414_vm4, %v5734_v32  ;;  %4550 = vmatmul.msk.f32.gmra.mxu0 %vm414_vm4, %v5285_v54 }
 0x16d   : > { %8616 = vst [vmem:[#allocation50_spill] sm:$0xff] %v5739_v31  ;;  %v5751_v31 = vld [vmem:[#allocation5 + $0x150] sm:$0xff]  ;;  %v412_v54 = vsel %vm348_vm7, %v316_v7, %v380_v34 }
 0x16e   : > { %v1116_v30 = vpop.f32.mrf.mxu2  ;;  %v873_v8 = vpop.f32.mrf.mxu1  ;;  %446 = vst.msk [vmem:[#allocation5 + $0x189] sm:$0xff] %vm414_vm4, %v412_v54 }
 0x16f   : > { %v1194_v56 = vadd.f32 %v1116_v30, %v871_v47  ;;  %v1394_v39 = vpop.f32.mrf.mxu3  ;;  %v874_v1 = vadd.f32 %v873_v8, %v5479_v41 }
 0x171   : > { %v1472_v15 = vadd.f32 %v1394_v39, %v1194_v56  ;;  %4448 = vmatmul.msk.f32.gmra.mxu1 %vm414_vm4, %v5719_v29  ;;  %v1678_v26 = vpop.f32.mrf.mxu0  ;;  %v5766_v56 = vld [vmem:[#allocation5 + $0x142] sm:$0xff] }
 0x173   : > { %v5756_v3 = vadd.f32 %v1672_v50, %v1472_v15  ;;  %4482 = vmatmul.msk.f32.gmra.mxu2 %vm414_vm4, %v5749_v35  ;;  %v5768_v15 = vld [vmem:[#allocation5 + $0x158] sm:$0xff] }
 0x174   : > { %4516 = vmatmul.msk.f32.gmra.mxu3 %vm414_vm4, %v5751_v31  ;;  %4551 = vmatmul.msk.f32.gmra.mxu0 %vm414_vm4, %v5313_v63  ;;  %8617 = vst [vmem:[#allocation51_spill] sm:$0xff] %v5768_v15 }
 0x176   : > { %v1119_v46 = vpop.f32.mrf.mxu2  ;;  %v876_v30 = vpop.f32.mrf.mxu1 }
 0x177   : > { %v1195_v47 = vadd.f32 %v1119_v46, %v874_v1  ;;  %v1397_v50 = vpop.f32.mrf.mxu3  ;;  %v877_v63 = vadd.f32 %v876_v30, %v5499_v52  ;;  %v5781_v46 = vld [vmem:[#allocation5 + $0x152] sm:$0xff] }
 0x179   : > { %v1473_v39 = vadd.f32 %v1397_v50, %v1195_v47  ;;  %4449 = vmatmul.msk.f32.gmra.mxu1 %vm414_vm4, %v5734_v32  ;;  %v1681_v7 = vpop.f32.mrf.mxu0 }
 0x17b   : > { %v5772_v34 = vadd.f32 %v1675_v2, %v1473_v39  ;;  %4483 = vmatmul.msk.f32.gmra.mxu2 %vm414_vm4, %v5766_v56  ;;  %v5783_v2 = vld [vmem:[#allocation5 + $0x168] sm:$0xff] }
 0x17c   : > { %4517 = vmatmul.msk.f32.gmra.mxu3 %vm414_vm4, %v5768_v15  ;;  %4552 = vmatmul.msk.f32.gmra.mxu0 %vm414_vm4, %v5333_v5 }
 0x17d   : > { %8618 = vst [vmem:[#allocation52_spill] sm:$0xff] %v5772_v34 }
 0x17e   : > { %v1122_v41 = vpop.f32.mrf.mxu2  ;;  %v879_v54 = vpop.f32.mrf.mxu1 }
 0x17f   : > { %v1196_v8 = vadd.f32 %v1122_v41, %v877_v63  ;;  %v1400_v1 = vpop.f32.mrf.mxu3  ;;  %v880_v5 = vadd.f32 %v879_v54, %v5519_v10 }
 0x181   : > { %v1474_v47 = vadd.f32 %v1400_v1, %v1196_v8  ;;  %4450 = vmatmul.msk.f32.gmra.mxu1 %vm414_vm4, %v5751_v31  ;;  %v1684_v50 = vpop.f32.mrf.mxu0  ;;  %v5796_v8 = vld [vmem:[#allocation5 + $0x15a] sm:$0xff] }
 0x183   : > { %v5787_v39 = vadd.f32 %v1678_v26, %v1474_v47  ;;  %4484 = vmatmul.msk.f32.gmra.mxu2 %vm414_vm4, %v5781_v46  ;;  %v5798_v26 = vld [vmem:[#allocation5 + $0x170] sm:$0xff] }
 0x184   : > { %4518 = vmatmul.msk.f32.gmra.mxu3 %vm414_vm4, %v5783_v2  ;;  %4553 = vmatmul.msk.f32.gmra.mxu0 %vm414_vm4, %v5349_v9 }
 0x185   : > { %8619 = vst [vmem:[#allocation53_spill] sm:$0xff] %v5787_v39  ;;  %v5802_v39 = vld [vmem:[#allocation5 + $0x181] sm:$0xff] }
 0x186   : > { %v1125_v52 = vpop.f32.mrf.mxu2  ;;  %v882_v63 = vpop.f32.mrf.mxu1  ;;  %8620 = vst [vmem:[#allocation54_spill] sm:$0xff] %v5802_v39 }
 0x187   : > { %v1197_v30 = vadd.f32 %v1125_v52, %v880_v5  ;;  %v1403_v41 = vpop.f32.mrf.mxu3  ;;  %v883_v9 = vadd.f32 %v882_v63, %v5539_v16 }
 0x189   : > { %v1475_v1 = vadd.f32 %v1403_v41, %v1197_v30  ;;  %4451 = vmatmul.msk.f32.gmra.mxu1 %vm414_vm4, %v5768_v15  ;;  %v1687_v47 = vpop.f32.mrf.mxu0  ;;  %v5813_v30 = vld [vmem:[#allocation5 + $0x16a] sm:$0xff] }
 0x18b   : > { %v5804_v34 = vadd.f32 %v1681_v7, %v1475_v1  ;;  %4485 = vmatmul.msk.f32.gmra.mxu2 %vm414_vm4, %v5796_v8  ;;  %v5815_v7 = vld [vmem:[#allocation5 + $0x180] sm:$0xff] }
 0x18c   : > { %4519 = vmatmul.msk.f32.gmra.mxu3 %vm414_vm4, %v5798_v26  ;;  %4554 = vmatmul.msk.f32.gmra.mxu0 %vm414_vm4, %v5802_v39 }
 0x18d   : > { %8621 = vst [vmem:[#allocation55_spill] sm:$0xff] %v5804_v34  ;;  %v5819_v34 = vld [vmem:[#allocation5 + $0x189] sm:$0xff] }
 0x18e   : > { %v1128_v10 = vpop.f32.mrf.mxu2  ;;  %v885_v5 = vpop.f32.mrf.mxu1 }
 0x18f   : > { %v1198_v54 = vadd.f32 %v1128_v10, %v883_v9  ;;  %v1406_v52 = vpop.f32.mrf.mxu3  ;;  %v886_v16 = vadd.f32 %v885_v5, %v5559_v11 }
 0x191   : > { %v1476_v41 = vadd.f32 %v1406_v52, %v1198_v54  ;;  %4452 = vmatmul.msk.f32.gmra.mxu1 %vm414_vm4, %v5783_v2  ;;  %v1690_v1 = vpop.f32.mrf.mxu0  ;;  %v5830_v52 = vld [vmem:[#allocation5 + $0x172] sm:$0xff] }
 0x193   : > { %v5821_v15 = vadd.f32 %v1684_v50, %v1476_v41  ;;  %4486 = vmatmul.msk.f32.gmra.mxu2 %vm414_vm4, %v5813_v30  ;;  %v5832_v50 = vld [vmem:[#allocation5 + $0x188] sm:$0xff] }
 0x194   : > { %4520 = vmatmul.msk.f32.gmra.mxu3 %vm414_vm4, %v5815_v7  ;;  %4555 = vmatmul.msk.f32.gmra.mxu0 %vm414_vm4, %v5819_v34 }
 0x195   : > { %8622 = vst [vmem:[#allocation56_spill] sm:$0xff] %v5821_v15 }
 0x196   : > { %v1131_v63 = vpop.f32.mrf.mxu2  ;;  %v888_v10 = vpop.f32.mrf.mxu1 }
 0x197   : > { %v1199_v9 = vadd.f32 %v1131_v63, %v886_v16  ;;  %v1409_v54 = vpop.f32.mrf.mxu3  ;;  %v889_v11 = vadd.f32 %v888_v10, %v5579_v48 }
 0x199   : > { %v1477_v39 = vadd.f32 %v1409_v54, %v1199_v9  ;;  %4453 = vmatmul.msk.f32.gmra.mxu1 %vm414_vm4, %v5798_v26  ;;  %v1693_v41 = vpop.f32.mrf.mxu0 }
 0x19b   : > { %v5836_v15 = vadd.f32 %v1687_v47, %v1477_v39  ;;  %4487 = vmatmul.msk.f32.gmra.mxu2 %vm414_vm4, %v5830_v52 }
 0x19c   : > { %4521 = vmatmul.msk.f32.gmra.mxu3 %vm414_vm4, %v5832_v50  ;;  %4660 = vmatmul.msk.f32.vlgmr.msra.gmra.mxu0 %vm414_vm4, %v5391_v20 }
 0x19e   : > { %v1134_v5 = vpop.f32.mrf.mxu2  ;;  %v891_v63 = vpop.f32.mrf.mxu1 }
 0x19f   : > { %v1200_v16 = vadd.f32 %v1134_v5, %v889_v11  ;;  %v1412_v9 = vpop.f32.mrf.mxu3  ;;  %v892_v48 = vadd.f32 %v891_v63, %v5457_v22 }
 0x1a1   : > { %v1478_v54 = vadd.f32 %v1412_v9, %v1200_v16  ;;  %4558 = vmatmul.msk.f32.vlgmr.msra.gmra.mxu1 %vm414_vm4, %v5369_v12  ;;  %v1696_v39 = vpop.f32.mrf.mxu0 }
 0x1a3   : > { %v5847_v47 = vadd.f32 %v1690_v1, %v1478_v54  ;;  %4592 = vmatmul.msk.f32.vlgmr.msra.gmra.mxu2 %vm414_vm4, %v5371_v17 }
 0x1a4   : > { %4626 = vmatmul.msk.f32.vlgmr.msra.gmra.mxu3 %vm414_vm4, %v5272_v49  ;;  %4661 = vmatmul.msk.f32.gmra.mxu0 %vm414_vm4, %v5403_v23 }
 0x1a6   : > { %v1137_v10 = vpop.f32.mrf.mxu2  ;;  %v894_v5 = vpop.f32.mrf.mxu1 }
 0x1a7   : > { %v1201_v11 = vadd.f32 %v1137_v10, %v892_v48  ;;  %v1415_v16 = vpop.f32.mrf.mxu3  ;;  %v895_v49 = vadd.f32 %v894_v5, %v5477_v40 }
 0x1a9   : > { %v1479_v9 = vadd.f32 %v1415_v16, %v1201_v11  ;;  %4559 = vmatmul.msk.f32.gmra.mxu1 %vm414_vm4, %v5380_v18  ;;  %v1699_v12 = vpop.f32.mrf.mxu0 }
 0x1ab   : > { %v5858_v1 = vadd.f32 %v1693_v41, %v1479_v9  ;;  %4593 = vmatmul.msk.f32.gmra.mxu2 %vm414_vm4, %v5382_v19 }
 0x1ac   : > { %4627 = vmatmul.msk.f32.gmra.mxu3 %vm414_vm4, %v5289_v55  ;;  %4662 = vmatmul.msk.f32.gmra.mxu0 %vm414_vm4, %v5415_v25 }
 0x1ae   : > { %v1140_v17 = vpop.f32.mrf.mxu2  ;;  %v897_v63 = vpop.f32.mrf.mxu1 }
 0x1af   : > { %v1202_v22 = vadd.f32 %v1140_v17, %v895_v49  ;;  %v1418_v54 = vpop.f32.mrf.mxu3  ;;  %v898_v55 = vadd.f32 %v897_v63, %v5497_v51 }
 0x1b1   : > { %v1480_v48 = vadd.f32 %v1418_v54, %v1202_v22  ;;  %4560 = vmatmul.msk.f32.gmra.mxu1 %vm414_vm4, %v5391_v20  ;;  %v1702_v18 = vpop.f32.mrf.mxu0 }
 0x1b3   : > { %v5869_v41 = vadd.f32 %v1696_v39, %v1480_v48  ;;  %4594 = vmatmul.msk.f32.gmra.mxu2 %vm414_vm4, %v5393_v21 }
 0x1b4   : > { %4628 = vmatmul.msk.f32.gmra.mxu3 %vm414_vm4, %v5317_v0  ;;  %4663 = vmatmul.msk.f32.gmra.mxu0 %vm414_vm4, %v5427_v28 }
 0x1b6   : > { %v1143_v19 = vpop.f32.mrf.mxu2  ;;  %v900_v10 = vpop.f32.mrf.mxu1 }
 0x1b7   : > { %v1203_v40 = vadd.f32 %v1143_v19, %v898_v55  ;;  %v1421_v11 = vpop.f32.mrf.mxu3  ;;  %v901_v0 = vadd.f32 %v900_v10, %v5517_v60  ;;  %v8624_v60 = vld [vmem:[#allocation15_spill] sm:$0xff] }
 0x1b8   : > { %v2335_v19 = vld [vmem:[#allocation5 + $0x69] sm:$0xff] }
 0x1b9   : > { %v1481_v5 = vadd.f32 %v1421_v11, %v1203_v40  ;;  %4561 = vmatmul.msk.f32.gmra.mxu1 %vm414_vm4, %v5403_v23  ;;  %v1705_v20 = vpop.f32.mrf.mxu0  ;;  %v2334_v23 = vld [vmem:[#allocation5 + $0x61] sm:$0xff] }
 0x1ba   : > { %v8626_v40 = vld [vmem:[#allocation30_spill] sm:$0xff] }
 0x1bb   : > { %v5880_v39 = vadd.f32 %v1699_v12, %v1481_v5  ;;  %4595 = vmatmul.msk.f32.gmra.mxu2 %vm414_vm4, %v5405_v24  ;;  %v8627_v11 = vld [vmem:[#allocation18_spill] sm:$0xff] }
 0x1bc   : > { %4629 = vmatmul.msk.f32.gmra.mxu3 %vm414_vm4, %v5337_v6  ;;  %4664 = vmatmul.msk.f32.gmra.mxu0 %vm414_vm4, %v5443_v59  ;;  %v8623_v6 = vld [vmem:[#allocation26_spill] sm:$0xff] }
 0x1be   : > { %v1146_v21 = vpop.f32.mrf.mxu2  ;;  %v903_v16 = vpop.f32.mrf.mxu1 }
 0x1bf   : > { %v1204_v51 = vadd.f32 %v1146_v21, %v901_v0  ;;  %v1424_v9 = vpop.f32.mrf.mxu3  ;;  %v904_v24 = vadd.f32 %v903_v16, %v8623_v6 }
 0x1c1   : > { %v1482_v49 = vadd.f32 %v1424_v9, %v1204_v51  ;;  %4562 = vmatmul.msk.f32.gmra.mxu1 %vm414_vm4, %v5415_v25  ;;  %v1708_v12 = vpop.f32.mrf.mxu0  ;;  %v2336_v9 = vld [vmem:[#allocation5 + $0x79] sm:$0xff] }
 0x1c3   : > { %v5891_v17 = vadd.f32 %v1702_v18, %v1482_v49  ;;  %4596 = vmatmul.msk.f32.gmra.mxu2 %vm414_vm4, %v5417_v27  ;;  %v8625_v27 = vld [vmem:[#allocation12_spill] sm:$0xff]  ;;  %v8628_v49 = vld [vmem:[#allocation13_spill] sm:$0xff] }
 0x1c4   : > { %4630 = vmatmul.msk.f32.gmra.mxu3 %vm414_vm4, %v2334_v23  ;;  %4665 = vmatmul.msk.f32.gmra.mxu0 %vm414_vm4, %v8624_v60  ;;  %v8629_v23 = vld [vmem:[#allocation34_spill] sm:$0xff] }
 0x1c6   : > { %v1149_v22 = vpop.f32.mrf.mxu2  ;;  %v906_v54 = vpop.f32.mrf.mxu1 }
 0x1c7   : > { %v1205_v63 = vadd.f32 %v1149_v22, %v904_v24  ;;  %v1427_v48 = vpop.f32.mrf.mxu3  ;;  %v907_v10 = vadd.f32 %v906_v54, %v8626_v40  ;;  %v8630_v24 = vld [vmem:[#allocation21_spill] sm:$0xff] }
 0x1c8   : > { %v8632_v40 = vld [vmem:[#allocation37_spill] sm:$0xff] }
 0x1c9   : > { %v1483_v55 = vadd.f32 %v1427_v48, %v1205_v63  ;;  %4563 = vmatmul.msk.f32.gmra.mxu1 %vm414_vm4, %v5427_v28  ;;  %v1711_v25 = vpop.f32.mrf.mxu0 }
 0x1cb   : > { %v5901_v18 = vadd.f32 %v1705_v20, %v1483_v55  ;;  %4597 = vmatmul.msk.f32.gmra.mxu2 %vm414_vm4, %v8625_v27  ;;  %v8631_v27 = vld [vmem:[#allocation16_spill] sm:$0xff] }
 0x1cc   : > { %4631 = vmatmul.msk.f32.gmra.mxu3 %vm414_vm4, %v2335_v19  ;;  %4666 = vmatmul.msk.f32.gmra.mxu0 %vm414_vm4, %v8627_v11  ;;  %v2337_v19 = vld [vmem:[#allocation5 + $0x81] sm:$0xff] }
 0x1ce   : > { %v1152_v5 = vpop.f32.mrf.mxu2  ;;  %v909_v21 = vpop.f32.mrf.mxu1 }
 0x1cf   : > { %v1206_v0 = vadd.f32 %v1152_v5, %v907_v10  ;;  %v1430_v51 = vpop.f32.mrf.mxu3  ;;  %v910_v6 = vadd.f32 %v909_v21, %v8629_v23  ;;  %v8633_v5 = vld [vmem:[#allocation24_spill] sm:$0xff]  ;;  %v8634_v23 = vld [vmem:[#allocation19_spill] sm:$0xff] }
 0x1d1   : > { %v1484_v16 = vadd.f32 %v1430_v51, %v1206_v0  ;;  %4564 = vmatmul.msk.f32.gmra.mxu1 %vm414_vm4, %v5443_v59  ;;  %v1714_v28 = vpop.f32.mrf.mxu0 }
 0x1d3   : > { %v5911_v20 = vadd.f32 %v1708_v12, %v1484_v16  ;;  %4598 = vmatmul.msk.f32.gmra.mxu2 %vm414_vm4, %v8628_v49  ;;  %v2338_v49 = vld [vmem:[#allocation5 + $0x91] sm:$0xff] }
 0x1d4   : > { %4632 = vmatmul.msk.f32.gmra.mxu3 %vm414_vm4, %v2336_v9  ;;  %4667 = vmatmul.msk.f32.gmra.mxu0 %vm414_vm4, %v8630_v24 }
 0x1d6   : > { %v1155_v22 = vpop.f32.mrf.mxu2  ;;  %v912_v54 = vpop.f32.mrf.mxu1 }
 0x1d7   : > { %v1207_v63 = vadd.f32 %v1155_v22, %v910_v6  ;;  %v1433_v48 = vpop.f32.mrf.mxu3  ;;  %v913_v10 = vadd.f32 %v912_v54, %v8632_v40  ;;  %v8635_v6 = vld [vmem:[#allocation14_spill] sm:$0xff]  ;;  %v2339_v40 = vld [vmem:[#allocation5 + $0x99] sm:$0xff] }
 0x1d9   : > { %v1485_v55 = vadd.f32 %v1433_v48, %v1207_v63  ;;  %4565 = vmatmul.msk.f32.gmra.mxu1 %vm414_vm4, %v8624_v60  ;;  %v1717_v59 = vpop.f32.mrf.mxu0  ;;  %v8636_v63 = vld [vmem:[#allocation28_spill] sm:$0xff] }
 0x1db   : > { %v5921_v12 = vadd.f32 %v1711_v25, %v1485_v55  ;;  %4599 = vmatmul.msk.f32.gmra.mxu2 %vm414_vm4, %v8631_v27 }
 0x1dc   : > { %4633 = vmatmul.msk.f32.gmra.mxu3 %vm414_vm4, %v2337_v19  ;;  %4668 = vmatmul.msk.f32.gmra.mxu0 %vm414_vm4, %v8633_v5 }
 0x1de   : > { %v1158_v0 = vpop.f32.mrf.mxu2  ;;  %v915_v51 = vpop.f32.mrf.mxu1 }
 0x1df   : > { %v1208_v21 = vadd.f32 %v1158_v0, %v913_v10  ;;  %v1436_v16 = vpop.f32.mrf.mxu3  ;;  %v916_v22 = vadd.f32 %v915_v51, %v8635_v6  ;;  %v8637_v10 = vld [vmem:[#allocation22_spill] sm:$0xff]  ;;  %v8638_v0 = vld [vmem:[#allocation17_spill] sm:$0xff]  ;;  %v8639_v51 = vld [vmem:[#allocation32_spill] sm:$0xff] }
 0x1e1   : > { %v1486_v9 = vadd.f32 %v1436_v16, %v1208_v21  ;;  %4566 = vmatmul.msk.f32.gmra.mxu1 %vm414_vm4, %v8627_v11  ;;  %v1720_v60 = vpop.f32.mrf.mxu0 }
 0x1e3   : > { %v5931_v25 = vadd.f32 %v1714_v28, %v1486_v9  ;;  %4600 = vmatmul.msk.f32.gmra.mxu2 %vm414_vm4, %v8634_v23 }
 0x1e4   : > { %4634 = vmatmul.msk.f32.gmra.mxu3 %vm414_vm4, %v2338_v49  ;;  %4669 = vmatmul.msk.f32.gmra.mxu0 %vm414_vm4, %v8636_v63 }
 0x1e6   : > { %v1161_v54 = vpop.f32.mrf.mxu2  ;;  %v918_v55 = vpop.f32.mrf.mxu1 }
 0x1e7   : > { %v1209_v48 = vadd.f32 %v1161_v54, %v916_v22  ;;  %v1439_v19 = vpop.f32.mrf.mxu3  ;;  %v919_v21 = vadd.f32 %v918_v55, %v8638_v0  ;;  %v2340_v22 = vld [vmem:[#allocation5 + $0xa9] sm:$0xff]  ;;  %v8640_v54 = vld [vmem:[#allocation25_spill] sm:$0xff] }
 0x1e9   : > { %v1487_v27 = vadd.f32 %v1439_v19, %v1209_v48  ;;  %4567 = vmatmul.msk.f32.gmra.mxu1 %vm414_vm4, %v8630_v24  ;;  %v1723_v11 = vpop.f32.mrf.mxu0  ;;  %v8641_v48 = vld [vmem:[#allocation20_spill] sm:$0xff] }
 0x1ea   : > { %v8642_v19 = vld [vmem:[#allocation36_spill] sm:$0xff] }
 0x1eb   : > { %v5941_v28 = vadd.f32 %v1717_v59, %v1487_v27  ;;  %4601 = vmatmul.msk.f32.gmra.mxu2 %vm414_vm4, %v8637_v10 }
 0x1ec   : > { %4635 = vmatmul.msk.f32.gmra.mxu3 %vm414_vm4, %v2339_v40  ;;  %4670 = vmatmul.msk.f32.gmra.mxu0 %vm414_vm4, %v8639_v51 }
 0x1ee   : > { %v1164_v16 = vpop.f32.mrf.mxu2  ;;  %v921_v49 = vpop.f32.mrf.mxu1 }
 0x1ef   : > { %v1210_v9 = vadd.f32 %v1164_v16, %v919_v21  ;;  %v1442_v23 = vpop.f32.mrf.mxu3  ;;  %v922_v55 = vadd.f32 %v921_v49, %v8641_v48  ;;  %v2341_v16 = vld [vmem:[#allocation5 + $0xb1] sm:$0xff] }
 0x1f0   : > { %v8644_v49 = vld [vmem:[#allocation23_spill] sm:$0xff] }
 0x1f1   : > { %v1488_v6 = vadd.f32 %v1442_v23, %v1210_v9  ;;  %4568 = vmatmul.msk.f32.gmra.mxu1 %vm414_vm4, %v8633_v5  ;;  %v1726_v24 = vpop.f32.mrf.mxu0  ;;  %v8643_v9 = vld [vmem:[#allocation29_spill] sm:$0xff] }
 0x1f3   : > { %v5951_v59 = vadd.f32 %v1720_v60, %v1488_v6  ;;  %4602 = vmatmul.msk.f32.gmra.mxu2 %vm414_vm4, %v8640_v54  ;;  %v8645_v6 = vld [vmem:[#allocation39_spill] sm:$0xff] }
 0x1f4   : > { %4636 = vmatmul.msk.f32.gmra.mxu3 %vm414_vm4, %v2340_v22  ;;  %4671 = vmatmul.msk.f32.gmra.mxu0 %vm414_vm4, %v8642_v19 }
 0x1f6   : > { %v1167_v27 = vpop.f32.mrf.mxu2  ;;  %v924_v10 = vpop.f32.mrf.mxu1 }
 0x1f7   : > { %v1211_v40 = vadd.f32 %v1167_v27, %v922_v55  ;;  %v1445_v0 = vpop.f32.mrf.mxu3  ;;  %v925_v23 = vadd.f32 %v924_v10, %v8644_v49  ;;  %v8647_v10 = vld [vmem:[#allocation27_spill] sm:$0xff] }
 0x1f9   : > { %v1489_v21 = vadd.f32 %v1445_v0, %v1211_v40  ;;  %4569 = vmatmul.msk.f32.gmra.mxu1 %vm414_vm4, %v8636_v63  ;;  %v1729_v5 = vpop.f32.mrf.mxu0  ;;  %v2342_v40 = vld [vmem:[#allocation5 + $0xc1] sm:$0xff] }
 0x1fa   : > { %v8646_v0 = vld [vmem:[#allocation33_spill] sm:$0xff] }
 0x1fb   : > { %v5961_v60 = vadd.f32 %v1723_v11, %v1489_v21  ;;  %4603 = vmatmul.msk.f32.gmra.mxu2 %vm414_vm4, %v8643_v9 }
 0x1fc   : > { %4637 = vmatmul.msk.f32.gmra.mxu3 %vm414_vm4, %v2341_v16  ;;  %4672 = vmatmul.msk.f32.gmra.mxu0 %vm414_vm4, %v8645_v6 }
 0x1fe   : > { %v1170_v22 = vpop.f32.mrf.mxu2  ;;  %v927_v48 = vpop.f32.mrf.mxu1 }
 0x1ff   : > { %v1212_v54 = vadd.f32 %v1170_v22, %v925_v23  ;;  %v1448_v55 = vpop.f32.mrf.mxu3  ;;  %v928_v21 = vadd.f32 %v927_v48, %v8647_v10  ;;  %v8648_v48 = vld [vmem:[#allocation31_spill] sm:$0xff] }
 0x201   : > { %v1490_v27 = vadd.f32 %v1448_v55, %v1212_v54  ;;  %4570 = vmatmul.msk.f32.gmra.mxu1 %vm414_vm4, %v8639_v51  ;;  %v1732_v63 = vpop.f32.mrf.mxu0  ;;  %v2343_v54 = vld [vmem:[#allocation5 + $0xc9] sm:$0xff] }
 0x203   : > { %v5971_v11 = vadd.f32 %v1726_v24, %v1490_v27  ;;  %4604 = vmatmul.msk.f32.gmra.mxu2 %vm414_vm4, %v8646_v0 }
 0x204   : > { %4638 = vmatmul.msk.f32.gmra.mxu3 %vm414_vm4, %v2342_v40  ;;  %4673 = vmatmul.msk.f32.gmra.mxu0 %vm414_vm4, %v5612_v38 }
 0x206   : > { %v1173_v16 = vpop.f32.mrf.mxu2  ;;  %v930_v49 = vpop.f32.mrf.mxu1 }
 0x207   : > { %v1213_v9 = vadd.f32 %v1173_v16, %v928_v21  ;;  %v1451_v23 = vpop.f32.mrf.mxu3  ;;  %v931_v55 = vadd.f32 %v930_v49, %v8648_v48  ;;  %v2344_v16 = vld [vmem:[#allocation5 + $0xd9] sm:$0xff] }
 0x209   : > { %v1491_v22 = vadd.f32 %v1451_v23, %v1213_v9  ;;  %4571 = vmatmul.msk.f32.gmra.mxu1 %vm414_vm4, %v8642_v19  ;;  %v1735_v51 = vpop.f32.mrf.mxu0 }
 0x20b   : > { %v5981_v24 = vadd.f32 %v1729_v5, %v1491_v22  ;;  %4605 = vmatmul.msk.f32.gmra.mxu2 %vm414_vm4, %v5585_v14  ;;  %v8649_v14 = vld [vmem:[#allocation35_spill] sm:$0xff] }
 0x20c   : > { %4639 = vmatmul.msk.f32.gmra.mxu3 %vm414_vm4, %v2343_v54  ;;  %4674 = vmatmul.msk.f32.gmra.mxu0 %vm414_vm4, %v5627_v42 }
 0x20e   : > { %v1176_v27 = vpop.f32.mrf.mxu2  ;;  %v933_v0 = vpop.f32.mrf.mxu1 }
 0x20f   : > { %v1214_v40 = vadd.f32 %v1176_v27, %v931_v55  ;;  %v1454_v10 = vpop.f32.mrf.mxu3  ;;  %v934_v9 = vadd.f32 %v933_v0, %v8649_v14  ;;  %v2345_v55 = vld [vmem:[#allocation5 + $0xe1] sm:$0xff]  ;;  %v2346_v14 = vld [vmem:[#allocation5 + $0xf1] sm:$0xff] }
 0x211   : > { %v1492_v21 = vadd.f32 %v1454_v10, %v1214_v40  ;;  %4572 = vmatmul.msk.f32.gmra.mxu1 %vm414_vm4, %v8645_v6  ;;  %v1738_v19 = vpop.f32.mrf.mxu0 }
 0x213   : > { %v5991_v5 = vadd.f32 %v1732_v63, %v1492_v21  ;;  %4606 = vmatmul.msk.f32.gmra.mxu2 %vm414_vm4, %v5601_v44  ;;  %v8650_v44 = vld [vmem:[#allocation38_spill] sm:$0xff] }
 0x214   : > { %4640 = vmatmul.msk.f32.gmra.mxu3 %vm414_vm4, %v2344_v16  ;;  %4675 = vmatmul.msk.f32.gmra.mxu0 %vm414_vm4, %v5642_v37 }
 0x216   : > { %v1179_v49 = vpop.f32.mrf.mxu2  ;;  %v936_v22 = vpop.f32.mrf.mxu1 }
 0x217   : > { %v1215_v23 = vadd.f32 %v1179_v49, %v934_v9  ;;  %v1457_v54 = vpop.f32.mrf.mxu3  ;;  %v937_v27 = vadd.f32 %v936_v22, %v8650_v44 }
 0x219   : > { %v1493_v48 = vadd.f32 %v1457_v54, %v1215_v23  ;;  %4573 = vmatmul.msk.f32.gmra.mxu1 %vm414_vm4, %v5612_v38  ;;  %v2758_v6 = vpop.f32.mrf.mxu0 }
 0x21b   : > { %v6001_v63 = vadd.f32 %v1735_v51, %v1493_v48  ;;  %4607 = vmatmul.msk.f32.gmra.mxu2 %vm414_vm4, %v5614_v58  ;;  %v8651_v58 = vld [vmem:[#allocation40_spill] sm:$0xff] }
 0x21c   : > { %4641 = vmatmul.msk.f32.gmra.mxu3 %vm414_vm4, %v2345_v55  ;;  %4676 = vmatmul.msk.f32.gmra.mxu0 %vm414_vm4, %v5657_v62  ;;  %v2347_v55 = vld [vmem:[#allocation5 + $0xf9] sm:$0xff] }
 0x21e   : > { %v1182_v40 = vpop.f32.mrf.mxu2  ;;  %v1923_v21 = vpop.f32.mrf.mxu1 }
 0x21f   : > { %v1216_v0 = vadd.f32 %v1182_v40, %v937_v27  ;;  %v1460_v10 = vpop.f32.mrf.mxu3  ;;  %v2019_v9 = vadd.f32 %v1923_v21, %v8651_v58 }
 0x221   : > { %v1494_v16 = vadd.f32 %v1460_v10, %v1216_v0  ;;  %4574 = vmatmul.msk.f32.gmra.mxu1 %vm414_vm4, %v5627_v42  ;;  %v2761_v38 = vpop.f32.mrf.mxu0 }
 0x223   : > { %v6011_v51 = vadd.f32 %v1738_v19, %v1494_v16  ;;  %4608 = vmatmul.msk.f32.gmra.mxu2 %vm414_vm4, %v5629_v36  ;;  %v8652_v36 = vld [vmem:[#allocation41_spill] sm:$0xff]  ;;  %v2348_v16 = vld [vmem:[#allocation5 + $0x109] sm:$0xff] }
 0x224   : > { %4642 = vmatmul.msk.f32.gmra.mxu3 %vm414_vm4, %v2346_v14  ;;  %4677 = vmatmul.msk.f32.gmra.mxu0 %vm414_vm4, %v5672_v57 }
 0x226   : > { %v2202_v49 = vpop.f32.mrf.mxu2  ;;  %v1926_v22 = vpop.f32.mrf.mxu1 }
 0x227   : > { %v2298_v23 = vadd.f32 %v2202_v49, %v2019_v9  ;;  %v2480_v54 = vpop.f32.mrf.mxu3  ;;  %v2020_v44 = vadd.f32 %v1926_v22, %v8652_v36 }
 0x229   : > { %v2576_v48 = vadd.f32 %v2480_v54, %v2298_v23  ;;  %4575 = vmatmul.msk.f32.gmra.mxu1 %vm414_vm4, %v5642_v37  ;;  %v2764_v42 = vpop.f32.mrf.mxu0  ;;  %v2349_v54 = vld [vmem:[#allocation5 + $0x111] sm:$0xff] }
 0x22b   : > { %v6021_v19 = vadd.f32 %v2758_v6, %v2576_v48  ;;  %4609 = vmatmul.msk.f32.gmra.mxu2 %vm414_vm4, %v5644_v43  ;;  %v8653_v43 = vld [vmem:[#allocation42_spill] sm:$0xff] }
 0x22c   : > { %4643 = vmatmul.msk.f32.gmra.mxu3 %vm414_vm4, %v2347_v55  ;;  %4678 = vmatmul.msk.f32.gmra.mxu0 %vm414_vm4, %v5687_v45 }
 0x22e   : > { %v2205_v27 = vpop.f32.mrf.mxu2  ;;  %v1929_v0 = vpop.f32.mrf.mxu1 }
 0x22f   : > { %v2299_v40 = vadd.f32 %v2205_v27, %v2020_v44  ;;  %v2483_v10 = vpop.f32.mrf.mxu3  ;;  %v2021_v14 = vadd.f32 %v1929_v0, %v8653_v43  ;;  %v2350_v0 = vld [vmem:[#allocation5 + $0x121] sm:$0xff] }
 0x231   : > { %v2577_v21 = vadd.f32 %v2483_v10, %v2299_v40  ;;  %4576 = vmatmul.msk.f32.gmra.mxu1 %vm414_vm4, %v5657_v62  ;;  %v2767_v37 = vpop.f32.mrf.mxu0  ;;  %v8656_v10 = vld [vmem:[#allocation44_spill] sm:$0xff] }
 0x233   : > { %v6031_v6 = vadd.f32 %v2761_v38, %v2577_v21  ;;  %4610 = vmatmul.msk.f32.gmra.mxu2 %vm414_vm4, %v5659_v33  ;;  %v8654_v33 = vld [vmem:[#allocation43_spill] sm:$0xff] }
 0x234   : > { %4644 = vmatmul.msk.f32.gmra.mxu3 %vm414_vm4, %v2348_v16  ;;  %4679 = vmatmul.msk.f32.gmra.mxu0 %vm414_vm4, %v5702_v53 }
 0x236   : > { %v2208_v58 = vpop.f32.mrf.mxu2  ;;  %v1932_v49 = vpop.f32.mrf.mxu1 }
 0x237   : > { %v2300_v9 = vadd.f32 %v2208_v58, %v2021_v14  ;;  %v2486_v23 = vpop.f32.mrf.mxu3  ;;  %v2022_v48 = vadd.f32 %v1932_v49, %v8654_v33  ;;  %v2351_v49 = vld [vmem:[#allocation5 + $0x129] sm:$0xff] }
 0x239   : > { %v2578_v22 = vadd.f32 %v2486_v23, %v2300_v9  ;;  %4577 = vmatmul.msk.f32.gmra.mxu1 %vm414_vm4, %v5672_v57  ;;  %v2770_v62 = vpop.f32.mrf.mxu0  ;;  %v8657_v23 = vld [vmem:[#allocation47_spill] sm:$0xff] }
 0x23b   : > { %v6041_v38 = vadd.f32 %v2764_v42, %v2578_v22  ;;  %4611 = vmatmul.msk.f32.gmra.mxu2 %vm414_vm4, %v5674_v13  ;;  %v8655_v13 = vld [vmem:[#allocation45_spill] sm:$0xff]  ;;  %v8658_v22 = vld [vmem:[#allocation46_spill] sm:$0xff] }
 0x23c   : > { %4645 = vmatmul.msk.f32.gmra.mxu3 %vm414_vm4, %v2349_v54  ;;  %4680 = vmatmul.msk.f32.gmra.mxu0 %vm414_vm4, %v5717_v61 }
 0x23e   : > { %v2211_v55 = vpop.f32.mrf.mxu2  ;;  %v1935_v44 = vpop.f32.mrf.mxu1 }
 0x23f   : > { %v2301_v36 = vadd.f32 %v2211_v55, %v2022_v48  ;;  %v2489_v27 = vpop.f32.mrf.mxu3  ;;  %v2023_v21 = vadd.f32 %v1935_v44, %v8656_v10 }
 0x241   : > { %v2579_v40 = vadd.f32 %v2489_v27, %v2301_v36  ;;  %4578 = vmatmul.msk.f32.gmra.mxu1 %vm414_vm4, %v5687_v45  ;;  %v2773_v57 = vpop.f32.mrf.mxu0  ;;  %v2352_v27 = vld [vmem:[#allocation5 + $0x139] sm:$0xff] }
 0x243   : > { %v6051_v42 = vadd.f32 %v2767_v37, %v2579_v40  ;;  %4612 = vmatmul.msk.f32.gmra.mxu2 %vm414_vm4, %v8655_v13  ;;  %v8659_v40 = vld [vmem:[#allocation48_spill] sm:$0xff] }
 0x244   : > { %4646 = vmatmul.msk.f32.gmra.mxu3 %vm414_vm4, %v2350_v0  ;;  %4681 = vmatmul.msk.f32.gmra.mxu0 %vm414_vm4, %v5732_v4 }
 0x246   : > { %v2214_v16 = vpop.f32.mrf.mxu2  ;;  %v1938_v14 = vpop.f32.mrf.mxu1 }
 0x247   : > { %v2302_v43 = vadd.f32 %v2214_v16, %v2023_v21  ;;  %v2492_v58 = vpop.f32.mrf.mxu3  ;;  %v2024_v54 = vadd.f32 %v1938_v14, %v8658_v22  ;;  %v2353_v14 = vld [vmem:[#allocation5 + $0x141] sm:$0xff] }
 0x249   : > { %v2580_v9 = vadd.f32 %v2492_v58, %v2302_v43  ;;  %4579 = vmatmul.msk.f32.gmra.mxu1 %vm414_vm4, %v5702_v53  ;;  %v2776_v45 = vpop.f32.mrf.mxu0 }
 0x24b   : > { %v6061_v37 = vadd.f32 %v2770_v62, %v2580_v9  ;;  %4613 = vmatmul.msk.f32.gmra.mxu2 %vm414_vm4, %v8657_v23 }
 0x24c   : > { %4647 = vmatmul.msk.f32.gmra.mxu3 %vm414_vm4, %v2351_v49  ;;  %4682 = vmatmul.msk.f32.gmra.mxu0 %vm414_vm4, %v5749_v35 }
 0x24e   : > { %v2217_v33 = vpop.f32.mrf.mxu2  ;;  %v1941_v55 = vpop.f32.mrf.mxu1 }
 0x24f   : > { %v2303_v48 = vadd.f32 %v2217_v33, %v2024_v54  ;;  %v2495_v36 = vpop.f32.mrf.mxu3  ;;  %v2025_v0 = vadd.f32 %v1941_v55, %v8659_v40  ;;  %v8661_v54 = vld [vmem:[#allocation50_spill] sm:$0xff] }
 0x251   : > { %v2581_v44 = vadd.f32 %v2495_v36, %v2303_v48  ;;  %4580 = vmatmul.msk.f32.gmra.mxu1 %vm414_vm4, %v5717_v61  ;;  %v2779_v53 = vpop.f32.mrf.mxu0  ;;  %v2354_v48 = vld [vmem:[#allocation5 + $0x151] sm:$0xff] }
 0x253   : > { %v6071_v62 = vadd.f32 %v2773_v57, %v2581_v44  ;;  %4614 = vmatmul.msk.f32.gmra.mxu2 %vm414_vm4, %v5719_v29  ;;  %v8660_v29 = vld [vmem:[#allocation49_spill] sm:$0xff] }
 0x254   : > { %4648 = vmatmul.msk.f32.gmra.mxu3 %vm414_vm4, %v2352_v27  ;;  %4683 = vmatmul.msk.f32.gmra.mxu0 %vm414_vm4, %v5766_v56 }
 0x256   : > { %v2220_v13 = vpop.f32.mrf.mxu2  ;;  %v1944_v21 = vpop.f32.mrf.mxu1 }
 0x257   : > { %v2304_v10 = vadd.f32 %v2220_v13, %v2025_v0  ;;  %v2498_v16 = vpop.f32.mrf.mxu3  ;;  %v2026_v58 = vadd.f32 %v1944_v21, %v8660_v29  ;;  %v2355_v13 = vld [vmem:[#allocation5 + $0x159] sm:$0xff] }
 0x259   : > { %v2582_v43 = vadd.f32 %v2498_v16, %v2304_v10  ;;  %4581 = vmatmul.msk.f32.gmra.mxu1 %vm414_vm4, %v5732_v4  ;;  %v2782_v61 = vpop.f32.mrf.mxu0 }
 0x25b   : > { %v6081_v57 = vadd.f32 %v2776_v45, %v2582_v43  ;;  %4615 = vmatmul.msk.f32.gmra.mxu2 %vm414_vm4, %v5734_v32  ;;  %v8663_v43 = vld [vmem:[#allocation52_spill] sm:$0xff] }
 0x25c   : > { %4649 = vmatmul.msk.f32.gmra.mxu3 %vm414_vm4, %v2353_v14  ;;  %4684 = vmatmul.msk.f32.gmra.mxu0 %vm414_vm4, %v5781_v46 }
 0x25e   : > { %v2223_v9 = vpop.f32.mrf.mxu2  ;;  %v1947_v23 = vpop.f32.mrf.mxu1 }
 0x25f   : > { %v2305_v49 = vadd.f32 %v2223_v9, %v2026_v58  ;;  %v2501_v22 = vpop.f32.mrf.mxu3  ;;  %v2027_v33 = vadd.f32 %v1947_v23, %v8661_v54  ;;  %v2356_v58 = vld [vmem:[#allocation5 + $0x169] sm:$0xff]  ;;  %v8665_v54 = vld [vmem:[#allocation53_spill] sm:$0xff] }
 0x261   : > { %v2583_v4 = vadd.f32 %v2501_v22, %v2305_v49  ;;  %4582 = vmatmul.msk.f32.gmra.mxu1 %vm414_vm4, %v5749_v35  ;;  %v2785_v45 = vpop.f32.mrf.mxu0 }
 0x263   : > { %v6092_v32 = vadd.f32 %v2779_v53, %v2583_v4  ;;  %4616 = vmatmul.msk.f32.gmra.mxu2 %vm414_vm4, %v5751_v31  ;;  %v8662_v31 = vld [vmem:[#allocation51_spill] sm:$0xff] }
 0x264   : > { %4650 = vmatmul.msk.f32.gmra.mxu3 %vm414_vm4, %v2354_v48  ;;  %4685 = vmatmul.msk.f32.gmra.mxu0 %vm414_vm4, %v5796_v8  ;;  %v2357_v48 = vld [vmem:[#allocation5 + $0x171] sm:$0xff] }
 0x266   : > { %v2226_v55 = vpop.f32.mrf.mxu2  ;;  %v1950_v44 = vpop.f32.mrf.mxu1 }
 0x267   : > { %v2306_v36 = vadd.f32 %v2226_v55, %v2027_v33  ;;  %v2504_v27 = vpop.f32.mrf.mxu3  ;;  %v2028_v40 = vadd.f32 %v1950_v44, %v5756_v3 }
 0x269   : > { %v2584_v0 = vadd.f32 %v2504_v27, %v2306_v36  ;;  %4583 = vmatmul.msk.f32.gmra.mxu1 %vm414_vm4, %v5766_v56  ;;  %v2788_v35 = vpop.f32.mrf.mxu0 }
 0x26b   : > { %v6102_v53 = vadd.f32 %v2782_v61, %v2584_v0  ;;  %4617 = vmatmul.msk.f32.gmra.mxu2 %vm414_vm4, %v8662_v31 }
 0x26c   : > { %4651 = vmatmul.msk.f32.gmra.mxu3 %vm414_vm4, %v2355_v13  ;;  %4686 = vmatmul.msk.f32.gmra.mxu0 %vm414_vm4, %v5813_v30 }
 0x26e   : > { %v2229_v10 = vpop.f32.mrf.mxu2  ;;  %v1953_v16 = vpop.f32.mrf.mxu1 }
 0x26f   : > { %v2307_v21 = vadd.f32 %v2229_v10, %v2028_v40  ;;  %v2507_v3 = vpop.f32.mrf.mxu3  ;;  %v2029_v14 = vadd.f32 %v1953_v16, %v8663_v43  ;;  %v8667_v40 = vld [vmem:[#allocation55_spill] sm:$0xff]  ;;  %v8669_v43 = vld [vmem:[#allocation56_spill] sm:$0xff] }
 0x271   : > { %v2585_v29 = vadd.f32 %v2507_v3, %v2307_v21  ;;  %4584 = vmatmul.msk.f32.gmra.mxu1 %vm414_vm4, %v5781_v46  ;;  %v2791_v56 = vpop.f32.mrf.mxu0 }
 0x273   : > { %v6112_v61 = vadd.f32 %v2785_v45, %v2585_v29  ;;  %4618 = vmatmul.msk.f32.gmra.mxu2 %vm414_vm4, %v5783_v2  ;;  %v2636_v45 = vld [vmem:[#allocation5 + $0x182] sm:$0xff] }
 0x274   : > { %4652 = vmatmul.msk.f32.gmra.mxu3 %vm414_vm4, %v2356_v58  ;;  %4687 = vmatmul.msk.f32.gmra.mxu0 %vm414_vm4, %v5830_v52  ;;  %v2638_v58 = vld [vmem:[#allocation5 + $0x19a] sm:$0xff] }
 0x275   : > { %8664 = vst [vmem:[#allocation26_spill] sm:$0xff] %v6112_v61 }
 0x276   : > { %v2232_v9 = vpop.f32.mrf.mxu2  ;;  %v1956_v23 = vpop.f32.mrf.mxu1 }
 0x277   : > { %v2308_v49 = vadd.f32 %v2232_v9, %v2029_v14  ;;  %v2510_v22 = vpop.f32.mrf.mxu3  ;;  %v2030_v33 = vadd.f32 %v1956_v23, %v8665_v54  ;;  %v2082_v54 = vld [vmem:[#allocation5 + $0x198] sm:$0xff] }
 0x279   : > { %v2586_v4 = vadd.f32 %v2510_v22, %v2308_v49  ;;  %4585 = vmatmul.msk.f32.gmra.mxu1 %vm414_vm4, %v5796_v8  ;;  %v2794_v46 = vpop.f32.mrf.mxu0 }
 0x27b   : > { %v6122_v55 = vadd.f32 %v2788_v35, %v2586_v4  ;;  %4619 = vmatmul.msk.f32.gmra.mxu2 %vm414_vm4, %v5798_v26  ;;  %v2637_v35 = vld [vmem:[#allocation5 + $0x18a] sm:$0xff]  ;;  %v8668_v26 = vld [vmem:[#allocation54_spill] sm:$0xff] }
 0x27c   : > { %4653 = vmatmul.msk.f32.gmra.mxu3 %vm414_vm4, %v2357_v48  ;;  %4688 = vmatmul.msk.f32.gmra.mxu0 %vm414_vm4, %v2636_v45  ;;  %v2639_v48 = vld [vmem:[#allocation5 + $0x1a2] sm:$0xff] }
 0x27d   : > { %8666 = vst [vmem:[#allocation15_spill] sm:$0xff] %v6122_v55 }
 0x27e   : > { %v2235_v2 = vpop.f32.mrf.mxu2  ;;  %v1959_v44 = vpop.f32.mrf.mxu1 }
 0x27f   : > { %v2309_v36 = vadd.f32 %v2235_v2, %v2030_v33  ;;  %v2513_v27 = vpop.f32.mrf.mxu3  ;;  %v2031_v0 = vadd.f32 %v1959_v44, %v8667_v40  ;;  %v2360_v33 = vld [vmem:[#allocation5 + $0x199] sm:$0xff]  ;;  %v2361_v40 = vld [vmem:[#allocation5 + $0x1a1] sm:$0xff] }
 0x280   : > { %v2083_v44 = vld [vmem:[#allocation5 + $0x1a0] sm:$0xff] }
 0x281   : > { %v2587_v13 = vadd.f32 %v2513_v27, %v2309_v36  ;;  %4586 = vmatmul.msk.f32.gmra.mxu1 %vm414_vm4, %v5813_v30  ;;  %v2797_v8 = vpop.f32.mrf.mxu0 }
 0x283   : > { %v6131_v31 = vadd.f32 %v2791_v56, %v2587_v13  ;;  %4620 = vmatmul.msk.f32.gmra.mxu2 %vm414_vm4, %v5815_v7 }
 0x284   : > { %4654 = vmatmul.msk.f32.gmra.mxu3 %vm414_vm4, %v8668_v26  ;;  %4689 = vmatmul.msk.f32.gmra.mxu0 %vm414_vm4, %v2637_v35 }
 0x286   : > { %v2238_v10 = vpop.f32.mrf.mxu2  ;;  %v1962_v16 = vpop.f32.mrf.mxu1 }
 0x287   : > { %v2310_v21 = vadd.f32 %v2238_v10, %v2031_v0  ;;  %v2516_v3 = vpop.f32.mrf.mxu3  ;;  %v2032_v14 = vadd.f32 %v1962_v16, %v8669_v43 }
 0x289   : > { %v2588_v29 = vadd.f32 %v2516_v3, %v2310_v21  ;;  %4587 = vmatmul.msk.f32.gmra.mxu1 %vm414_vm4, %v5830_v52  ;;  %v2800_v30 = vpop.f32.mrf.mxu0 }
 0x28b   : > { %v6141_v56 = vadd.f32 %v2794_v46, %v2588_v29  ;;  %4621 = vmatmul.msk.f32.gmra.mxu2 %vm414_vm4, %v5832_v50 }
 0x28c   : > { %4655 = vmatmul.msk.f32.gmra.mxu3 %vm414_vm4, %v5819_v34  ;;  %4690 = vmatmul.msk.f32.gmra.mxu0 %vm414_vm4, %v2638_v58 }
 0x28e   : > { %v2241_v7 = vpop.f32.mrf.mxu2  ;;  %v1965_v49 = vpop.f32.mrf.mxu1 }
 0x28f   : > { %v2311_v9 = vadd.f32 %v2241_v7, %v2032_v14  ;;  %v2519_v23 = vpop.f32.mrf.mxu3  ;;  %v2033_v22 = vadd.f32 %v1965_v49, %v5836_v15 }
 0x291   : > { %v2589_v52 = vadd.f32 %v2519_v23, %v2311_v9  ;;  %4588 = vmatmul.msk.f32.gmra.mxu1 %vm414_vm4, %v2636_v45  ;;  %v2803_v4 = vpop.f32.mrf.mxu0 }
 0x293   : > { %v6150_v46 = vadd.f32 %v2797_v8, %v2589_v52  ;;  %4622 = vmatmul.msk.f32.gmra.mxu2 %vm414_vm4, %v2082_v54 }
 0x294   : > { %4656 = vmatmul.msk.f32.gmra.mxu3 %vm414_vm4, %v2360_v33  ;;  %4691 = vmatmul.msk.f32.gmra.mxu0 %vm414_vm4, %v2639_v48 }
 0x295   : > { %8670 = vst [vmem:[#allocation12_spill] sm:$0xff] %v6150_v46 }
 0x296   : > { %v2244_v34 = vpop.f32.mrf.mxu2  ;;  %v1968_v2 = vpop.f32.mrf.mxu1 }
 0x297   : > { %v2312_v50 = vadd.f32 %v2244_v34, %v2033_v22  ;;  %v2522_v36 = vpop.f32.mrf.mxu3  ;;  %v2034_v15 = vadd.f32 %v1968_v2, %v5847_v47 }
 0x299   : > { %v2590_v27 = vadd.f32 %v2522_v36, %v2312_v50  ;;  %4589 = vmatmul.msk.f32.gmra.mxu1 %vm414_vm4, %v2637_v35  ;;  %v2806_v45 = vpop.f32.mrf.mxu0 }
 0x29b   : > { %v6157_v0 = vadd.f32 %v2800_v30, %v2590_v27  ;;  %4623 = vmatmul.msk.f32.gmra.mxu2 %vm414_vm4, %v2083_v44 }
 0x29c   : > { %4657 = vmatmul.msk.f32.gmra.mxu3 %vm414_vm4, %v2361_v40 }
 0x29d   : > { %8671 = vst [vmem:[#allocation30_spill] sm:$0xff] %v6157_v0 }
 0x29e   : > { %v2247_v13 = vpop.f32.mrf.mxu2  ;;  %v1971_v26 = vpop.f32.mrf.mxu1 }
 0x29f   : > { %v2313_v8 = vadd.f32 %v2247_v13, %v2034_v15  ;;  %v2525_v10 = vpop.f32.mrf.mxu3  ;;  %v2035_v21 = vadd.f32 %v1971_v26, %v5858_v1 }
 0x2a1   : > { %v2591_v16 = vadd.f32 %v2525_v10, %v2313_v8  ;;  %v2809_v47 = vpop.f32.mrf.mxu0 }
 0x2a3   : > { %v6162_v3 = vadd.f32 %v2803_v4, %v2591_v16 }
 0x2a5   : > { %8672 = vst [vmem:[#allocation18_spill] sm:$0xff] %v6162_v3 }
 0x2a6   : > { %v2250_v43 = vpop.f32.mrf.mxu2  ;;  %v1974_v35 = vpop.f32.mrf.mxu1 }
 0x2a7   : > { %v2314_v14 = vadd.f32 %v2250_v43, %v2035_v21  ;;  %v2528_v29 = vpop.f32.mrf.mxu3  ;;  %v2036_v30 = vadd.f32 %v1974_v35, %v5869_v41 }
 0x2a9   : > { %v2592_v58 = vadd.f32 %v2528_v29, %v2314_v14  ;;  %v2812_v7 = vpop.f32.mrf.mxu0 }
 0x2ab   : > { %v6165_v9 = vadd.f32 %v2806_v45, %v2592_v58 }
 0x2ad   : > { %8673 = vst [vmem:[#allocation13_spill] sm:$0xff] %v6165_v9 }
 0x2ae   : > { %v2253_v49 = vpop.f32.mrf.mxu2  ;;  %v1977_v22 = vpop.f32.mrf.mxu1 }
 0x2af   : > { %v2315_v23 = vadd.f32 %v2253_v49, %v2036_v30  ;;  %v2531_v54 = vpop.f32.mrf.mxu3  ;;  %v2037_v1 = vadd.f32 %v1977_v22, %v5880_v39 }
 0x2b1   : > { %v2593_v52 = vadd.f32 %v2531_v54, %v2315_v23  ;;  %v2815_v33 = vpop.f32.mrf.mxu0 }
 0x2b3   : > { %v6168_v4 = vadd.f32 %v2809_v47, %v2593_v52 }
 0x2b5   : > { %8674 = vst [vmem:[#allocation34_spill] sm:$0xff] %v6168_v4 }
 0x2b6   : > { %v2256_v48 = vpop.f32.mrf.mxu2  ;;  %v1980_v50 = vpop.f32.mrf.mxu1 }
 0x2b7   : > { %v2316_v34 = vadd.f32 %v2256_v48, %v2037_v1  ;;  %v2534_v2 = vpop.f32.mrf.mxu3  ;;  %v2038_v41 = vadd.f32 %v1980_v50, %v5891_v17 }
 0x2b9   : > { %v2594_v36 = vadd.f32 %v2534_v2, %v2316_v34  ;;  %v2818_v15 = vpop.f32.mrf.mxu0 }
 0x2bb   : > { %v6171_v44 = vadd.f32 %v2812_v7, %v2594_v36 }
 0x2bd   : > { %8675 = vst [vmem:[#allocation21_spill] sm:$0xff] %v6171_v44 }
 0x2be   : > { %v2259_v27 = vpop.f32.mrf.mxu2  ;;  %v1983_v45 = vpop.f32.mrf.mxu1 }
 0x2bf   : > { %v2317_v40 = vadd.f32 %v2259_v27, %v2038_v41  ;;  %v2537_v13 = vpop.f32.mrf.mxu3  ;;  %v2039_v39 = vadd.f32 %v1983_v45, %v5901_v18 }
 0x2c1   : > { %v2595_v8 = vadd.f32 %v2537_v13, %v2317_v40  ;;  %v2821_v26 = vpop.f32.mrf.mxu0 }
 0x2c3   : > { %v6174_v10 = vadd.f32 %v2815_v33, %v2595_v8 }
 0x2c5   : > { %8676 = vst [vmem:[#allocation16_spill] sm:$0xff] %v6174_v10 }
 0x2c6   : > { %v2262_v21 = vpop.f32.mrf.mxu2  ;;  %v1986_v47 = vpop.f32.mrf.mxu1 }
 0x2c7   : > { %v2318_v16 = vadd.f32 %v2262_v21, %v2039_v39  ;;  %v2540_v43 = vpop.f32.mrf.mxu3  ;;  %v2040_v17 = vadd.f32 %v1986_v47, %v5911_v20 }
 0x2c9   : > { %v2596_v14 = vadd.f32 %v2540_v43, %v2318_v16  ;;  %v2824_v35 = vpop.f32.mrf.mxu0 }
 0x2cb   : > { %v6177_v29 = vadd.f32 %v2818_v15, %v2596_v14 }
 0x2cd   : > { %8677 = vst [vmem:[#allocation37_spill] sm:$0xff] %v6177_v29 }
 0x2ce   : > { %v2265_v30 = vpop.f32.mrf.mxu2  ;;  %v1989_v7 = vpop.f32.mrf.mxu1 }
 0x2cf   : > { %v2319_v58 = vadd.f32 %v2265_v30, %v2040_v17  ;;  %v2543_v49 = vpop.f32.mrf.mxu3  ;;  %v2041_v18 = vadd.f32 %v1989_v7, %v5921_v12 }
 0x2d1   : > { %v2597_v23 = vadd.f32 %v2543_v49, %v2319_v58  ;;  %v2827_v22 = vpop.f32.mrf.mxu0 }
 0x2d3   : > { %v6180_v54 = vadd.f32 %v2821_v26, %v2597_v23 }
 0x2d5   : > { %8678 = vst [vmem:[#allocation24_spill] sm:$0xff] %v6180_v54 }
 0x2d6   : > { %v2268_v1 = vpop.f32.mrf.mxu2  ;;  %v1992_v33 = vpop.f32.mrf.mxu1 }
 0x2d7   : > { %v2320_v52 = vadd.f32 %v2268_v1, %v2041_v18  ;;  %v2546_v48 = vpop.f32.mrf.mxu3  ;;  %v2042_v20 = vadd.f32 %v1992_v33, %v5931_v25 }
 0x2d9   : > { %v2598_v34 = vadd.f32 %v2546_v48, %v2320_v52  ;;  %v2830_v50 = vpop.f32.mrf.mxu0 }
 0x2db   : > { %v6183_v2 = vadd.f32 %v2824_v35, %v2598_v34 }
 0x2dd   : > { %8679 = vst [vmem:[#allocation19_spill] sm:$0xff] %v6183_v2 }
 0x2de   : > { %v2271_v41 = vpop.f32.mrf.mxu2  ;;  %v1995_v15 = vpop.f32.mrf.mxu1 }
 0x2df   : > { %v2321_v36 = vadd.f32 %v2271_v41, %v2042_v20  ;;  %v2549_v27 = vpop.f32.mrf.mxu3  ;;  %v2043_v13 = vadd.f32 %v1995_v15, %v5941_v28 }
 0x2e1   : > { %v2599_v40 = vadd.f32 %v2549_v27, %v2321_v36  ;;  %v2833_v45 = vpop.f32.mrf.mxu0 }
 0x2e3   : > { %v6185_v12 = vadd.f32 %v2827_v22, %v2599_v40 }
 0x2e5   : > { %8680 = vst [vmem:[#allocation14_spill] sm:$0xff] %v6185_v12 }
 0x2e6   : > { %v2274_v39 = vpop.f32.mrf.mxu2  ;;  %v1998_v26 = vpop.f32.mrf.mxu1 }
 0x2e7   : > { %v2322_v8 = vadd.f32 %v2274_v39, %v2043_v13  ;;  %v2552_v21 = vpop.f32.mrf.mxu3  ;;  %v2044_v47 = vadd.f32 %v1998_v26, %v5951_v59 }
 0x2e9   : > { %v2600_v16 = vadd.f32 %v2552_v21, %v2322_v8  ;;  %v2836_v17 = vpop.f32.mrf.mxu0 }
 0x2eb   : > { %v6188_v25 = vadd.f32 %v2830_v50, %v2600_v16 }
 0x2ed   : > { %8681 = vst [vmem:[#allocation28_spill] sm:$0xff] %v6188_v25 }
 0x2ee   : > { %v2277_v43 = vpop.f32.mrf.mxu2  ;;  %v2001_v35 = vpop.f32.mrf.mxu1 }
 0x2ef   : > { %v2323_v14 = vadd.f32 %v2277_v43, %v2044_v47  ;;  %v2555_v30 = vpop.f32.mrf.mxu3  ;;  %v2045_v49 = vadd.f32 %v2001_v35, %v5961_v60 }
 0x2f1   : > { %v2601_v58 = vadd.f32 %v2555_v30, %v2323_v14  ;;  %v2839_v1 = vpop.f32.mrf.mxu0 }
 0x2f3   : > { %v6191_v7 = vadd.f32 %v2833_v45, %v2601_v58 }
 0x2f5   : > { %8682 = vst [vmem:[#allocation22_spill] sm:$0xff] %v6191_v7 }
 0x2f6   : > { %v2280_v28 = vpop.f32.mrf.mxu2  ;;  %v2004_v23 = vpop.f32.mrf.mxu1 }
 0x2f7   : > { %v2324_v18 = vadd.f32 %v2280_v28, %v2045_v49  ;;  %v2558_v22 = vpop.f32.mrf.mxu3  ;;  %v2046_v59 = vadd.f32 %v2004_v23, %v5971_v11 }
 0x2f9   : > { %v2602_v52 = vadd.f32 %v2558_v22, %v2324_v18  ;;  %v2842_v36 = vpop.f32.mrf.mxu0 }
 0x2fb   : > { %v6194_v33 = vadd.f32 %v2836_v17, %v2602_v52 }
 0x2fd   : > { %8683 = vst [vmem:[#allocation17_spill] sm:$0xff] %v6194_v33 }
 0x2fe   : > { %v2283_v48 = vpop.f32.mrf.mxu2  ;;  %v2007_v34 = vpop.f32.mrf.mxu1 }
 0x2ff   : > { %v2325_v20 = vadd.f32 %v2283_v48, %v2046_v59  ;;  %v2561_v50 = vpop.f32.mrf.mxu3  ;;  %v2047_v60 = vadd.f32 %v2007_v34, %v5981_v24 }
 0x301   : > { %v2603_v41 = vadd.f32 %v2561_v50, %v2325_v20  ;;  %v2845_v26 = vpop.f32.mrf.mxu0 }
 0x303   : > { %v6197_v15 = vadd.f32 %v2839_v1, %v2603_v41 }
 0x305   : > { %8684 = vst [vmem:[#allocation32_spill] sm:$0xff] %v6197_v15 }
 0x306   : > { %v2286_v27 = vpop.f32.mrf.mxu2  ;;  %v2010_v45 = vpop.f32.mrf.mxu1 }
 0x307   : > { %v2326_v40 = vadd.f32 %v2286_v27, %v2047_v60  ;;  %v2564_v13 = vpop.f32.mrf.mxu3  ;;  %v2048_v11 = vadd.f32 %v2010_v45, %v5991_v5 }
 0x309   : > { %v2604_v39 = vadd.f32 %v2564_v13, %v2326_v40  ;;  %v2848_v30 = vpop.f32.mrf.mxu0 }
 0x30b   : > { %v6200_v8 = vadd.f32 %v2842_v36, %v2604_v39 }
 0x30d   : > { %8685 = vst [vmem:[#allocation25_spill] sm:$0xff] %v6200_v8 }
 0x30e   : > { %v2289_v21 = vpop.f32.mrf.mxu2  ;;  %v2013_v43 = vpop.f32.mrf.mxu1 }
 0x30f   : > { %v2327_v16 = vadd.f32 %v2289_v21, %v2048_v11  ;;  %v2567_v47 = vpop.f32.mrf.mxu3  ;;  %v2049_v35 = vadd.f32 %v2013_v43, %v6001_v63 }
 0x311   : > { %v2605_v17 = vadd.f32 %v2567_v47, %v2327_v16  ;;  %v2851_v59 = vpop.f32.mrf.mxu0 }
 0x313   : > { %v6203_v14 = vadd.f32 %v2845_v26, %v2605_v17 }
 0x315   : > { %8686 = vst [vmem:[#allocation20_spill] sm:$0xff] %v6203_v14 }
 0x316   : > { %v2292_v24 = vpop.f32.mrf.mxu2  ;;  %v2016_v18 = vpop.f32.mrf.mxu1 }
 0x317   : > { %v2328_v58 = vadd.f32 %v2292_v24, %v2049_v35  ;;  %v2570_v49 = vpop.f32.mrf.mxu3  ;;  %v2050_v22 = vadd.f32 %v2016_v18, %v6011_v51 }
 0x319   : > { %v2606_v28 = vadd.f32 %v2570_v49, %v2328_v58 }
 0x31b   : > { %v6206_v23 = vadd.f32 %v2848_v30, %v2606_v28 }
 0x31d   : > { %8687 = vst [vmem:[#allocation36_spill] sm:$0xff] %v6206_v23 }
 0x31e   : > { %v2295_v5 = vpop.f32.mrf.mxu2 }
 0x31f   : > { %v2329_v1 = vadd.f32 %v2295_v5, %v2050_v22  ;;  %v2573_v52 = vpop.f32.mrf.mxu3 }
 0x321   : > { %v2607_v48 = vadd.f32 %v2573_v52, %v2329_v1  ;;  %2888 = sbr.rel (%p4386_p11) target bundleno = 885 (0x375), region = 44 }
 0x323   : > { %v6209_v20 = vadd.f32 %v2851_v59, %v2607_v48 }
 0x325   : > { %8688 = vst [vmem:[#allocation29_spill] sm:$0xff] %v6209_v20 }
 0x326   : > { %vm2889_vm4 = vcmask 64512   ;;  %vm2960_vm8 = vcmask 57344  }
 0x327   : > { %v2890_v63 = vsel %vm2889_vm4, %v6021_v19, 0.0  ;;  %v2891_v34 = vsel %vm2889_vm4, %v6031_v6, 0.0  ;;  %v2893_v51 = vsel %vm2889_vm4, %v6041_v38, 0.0  ;;  %v2895_v41 = vsel %vm2889_vm4, %v6051_v42, 0.0 }
 0x328   : > { %v2892_v50 = vadd.f32 %v2891_v34, %v2890_v63  ;;  %v2897_v60 = vsel %vm2889_vm4, %v6061_v37, 0.0  ;;  %v2899_v40 = vsel %vm2889_vm4, %v6071_v62, 0.0  ;;  %v2901_v13 = vsel %vm2889_vm4, %v6081_v57, 0.0 }
 0x329   : > { %v2903_v26 = vsel %vm2889_vm4, %v6092_v32, 0.0  ;;  %v2905_v21 = vsel %vm2889_vm4, %v6102_v53, 0.0  ;;  %v2907_v47 = vsel %vm2889_vm4, %v6112_v61, 0.0  ;;  %v2909_v17 = vsel %vm2889_vm4, %v6122_v55, 0.0 }
 0x32a   : > { %v2894_v36 = vadd.f32 %v2893_v51, %v2892_v50  ;;  %v2911_v24 = vsel %vm2889_vm4, %v6131_v31, 0.0  ;;  %v2913_v58 = vsel %vm2889_vm4, %v6141_v56, 0.0  ;;  %v2915_v28 = vsel %vm2889_vm4, %v6150_v46, 0.0 }
 0x32b   : > { %v2917_v22 = vsel %vm2889_vm4, %v6157_v0, 0.0  ;;  %v2919_v1 = vsel %vm2889_vm4, %v6162_v3, 0.0  ;;  %v2921_v59 = vsel %vm2889_vm4, %v6165_v9, 0.0  ;;  %v2923_v63 = vsel %vm2889_vm4, %v6168_v4, 0.0 }
 0x32c   : > { %v2896_v27 = vadd.f32 %v2895_v41, %v2894_v36  ;;  %v2925_v51 = vsel %vm2889_vm4, %v6171_v44, 0.0  ;;  %v2927_v41 = vsel %vm2889_vm4, %v6174_v10, 0.0 }
 0x32e   : > { %v2898_v45 = vadd.f32 %v2897_v60, %v2896_v27  ;;  %v2929_v60 = vsel %vm2889_vm4, %v6177_v29, 0.0 }
 0x330   : > { %v2900_v39 = vadd.f32 %v2899_v40, %v2898_v45  ;;  %v2931_v40 = vsel %vm2889_vm4, %v6180_v54, 0.0 }
 0x332   : > { %v2902_v11 = vadd.f32 %v2901_v13, %v2900_v39  ;;  %v2933_v13 = vsel %vm2889_vm4, %v6183_v2, 0.0 }
 0x334   : > { %v2904_v16 = vadd.f32 %v2903_v26, %v2902_v11  ;;  %v2935_v26 = vsel %vm2889_vm4, %v6185_v12, 0.0 }
 0x336   : > { %v2906_v43 = vadd.f32 %v2905_v21, %v2904_v16  ;;  %v2937_v21 = vsel %vm2889_vm4, %v6188_v25, 0.0 }
 0x338   : > { %v2908_v35 = vadd.f32 %v2907_v47, %v2906_v43  ;;  %v2939_v47 = vsel %vm2889_vm4, %v6191_v7, 0.0 }
 0x33a   : > { %v2910_v30 = vadd.f32 %v2909_v17, %v2908_v35  ;;  %v2941_v17 = vsel %vm2889_vm4, %v6194_v33, 0.0 }
 0x33c   : > { %v2912_v49 = vadd.f32 %v2911_v24, %v2910_v30  ;;  %v2943_v24 = vsel %vm2889_vm4, %v6197_v15, 0.0 }
 0x33e   : > { %v2914_v18 = vadd.f32 %v2913_v58, %v2912_v49  ;;  %v2945_v58 = vsel %vm2889_vm4, %v6200_v8, 0.0 }
 0x340   : > { %v2916_v5 = vadd.f32 %v2915_v28, %v2914_v18  ;;  %v2947_v28 = vsel %vm2889_vm4, %v6203_v14, 0.0 }
 0x342   : > { %v2918_v52 = vadd.f32 %v2917_v22, %v2916_v5  ;;  %v2949_v22 = vsel %vm2889_vm4, %v6206_v23, 0.0 }
 0x344   : > { %v2920_v48 = vadd.f32 %v2919_v1, %v2918_v52  ;;  %v2951_v1 = vsel %vm2889_vm4, %v6209_v20, 0.0 }
 0x346   : > { %v2922_v34 = vadd.f32 %v2921_v59, %v2920_v48 }
 0x348   : > { %v2924_v50 = vadd.f32 %v2923_v63, %v2922_v34 }
 0x34a   : > { %v2926_v36 = vadd.f32 %v2925_v51, %v2924_v50 }
 0x34c   : > { %v2928_v27 = vadd.f32 %v2927_v41, %v2926_v36 }
 0x34e   : > { %v2930_v45 = vadd.f32 %v2929_v60, %v2928_v27 }
 0x350   : > { %v2932_v39 = vadd.f32 %v2931_v40, %v2930_v45 }
 0x352   : > { %v2934_v11 = vadd.f32 %v2933_v13, %v2932_v39 }
 0x354   : > { %v2936_v16 = vadd.f32 %v2935_v26, %v2934_v11 }
 0x356   : > { %v2938_v43 = vadd.f32 %v2937_v21, %v2936_v16 }
 0x358   : > { %v2940_v35 = vadd.f32 %v2939_v47, %v2938_v43 }
 0x35a   : > { %v2942_v30 = vadd.f32 %v2941_v17, %v2940_v35 }
 0x35c   : > { %v2944_v49 = vadd.f32 %v2943_v24, %v2942_v30 }
 0x35e   : > { %v2946_v18 = vadd.f32 %v2945_v58, %v2944_v49 }
 0x360   : > { %v2948_v5 = vadd.f32 %v2947_v28, %v2946_v18 }
 0x362   : > { %v2950_v52 = vadd.f32 %v2949_v22, %v2948_v5 }
 0x364   : > { %v2952_v59 = vadd.f32 %v2951_v1, %v2950_v52 }
 0x366   : > { %v2953_v48 = vrot.slane %v2952_v59, 4 }
 0x368   : > { %v2954_v63 = vadd.f32 %v2953_v48, %v2952_v59 }
 0x36a   : > { %v2955_v34 = vrot.slane %v2954_v63, 2 }
 0x36c   : > { %v2956_v51 = vadd.f32 %v2955_v34, %v2954_v63 }
 0x36e   : > { %v2957_v50 = vrot.slane %v2956_v51, 1 }
 0x370   : > { %v2958_v41 = vadd.f32 %v2957_v50, %v2956_v51 }
 0x372   : > { %v2959_v36 = vmul.f32 0.00390625, %v2958_v41 }
 0x374   : > { %2961 = vst.msk [vmem:[#allocation4] sm:$0x1] %vm2960_vm8, %v2959_v36 }
 0x375 PF: > { %vm2999_vm9 = vcmask 64512   ;;  %vm3070_vm10 = vcmask 57344   ;;  %vm4168_vm11 = vcmask 1041409   ;;  %vm4170_vm12 = vcmask 1042434   ;;  %p4821_p12 = scmp.ne.s32.totalorder %s5037_s22, 1 }
 0x376   : > { %vm4172_vm13 = vcmask 1043459   ;;  %vm4174_vm14 = vcmask 1044484   ;;  %vm4176_vm15 = vcmask 1045509   ;;  %vm4178_vm0 = vcmask 1046534  }
 0x377   : > { %vm4180_vm1 = vcmask 1047559  }
 0x37b   : > { %v4883_v60 = vld [vmem:[#allocation4] ss:$0 sm:$0xff] }
 0x37c   : > { %v2966_v27 = vsub.f32 %v6021_v19, %v4883_v60  ;;  %v2967_v40 = vsub.f32 %v6031_v6, %v4883_v60  ;;  %v2968_v45 = vsub.f32 %v6041_v38, %v4883_v60  ;;  %v2969_v13 = vsub.f32 %v6051_v42, %v4883_v60 }
 0x37d   : > { %v2970_v21 = vsub.f32 %v6061_v37, %v4883_v60  ;;  %v2971_v47 = vsub.f32 %v6071_v62, %v4883_v60  ;;  %v2972_v43 = vsub.f32 %v6081_v57, %v4883_v60  ;;  %v6288_v17 = vsub.f32 %v6092_v32, %v4883_v60 }
 0x37e   : > { %v3000_v39 = vsel %vm2999_vm9, %v2966_v27, 0.0  ;;  %v3001_v26 = vsel %vm2999_vm9, %v2967_v40, 0.0  ;;  %v3003_v11 = vsel %vm2999_vm9, %v2968_v45, 0.0  ;;  %v3005_v35 = vsel %vm2999_vm9, %v2969_v13, 0.0 }
 0x37f   : > { %v3002_v16 = vadd.f32 %v3001_v26, %v3000_v39  ;;  %v6292_v24 = vsub.f32 %v6102_v53, %v4883_v60  ;;  %v6295_v30 = vsub.f32 %v6112_v61, %v4883_v60  ;;  %v6298_v58 = vsub.f32 %v6122_v55, %v4883_v60 }
 0x380   : > { %v6301_v28 = vsub.f32 %v6131_v31, %v4883_v60  ;;  %v6304_v18 = vsub.f32 %v6141_v56, %v4883_v60  ;;  %v6307_v22 = vsub.f32 %v6150_v46, %v4883_v60  ;;  %v3007_v5 = vsel %vm2999_vm9, %v2970_v21, 0.0 }
 0x381   : > { %v3004_v49 = vadd.f32 %v3003_v11, %v3002_v16  ;;  %v6311_v1 = vsub.f32 %v6157_v0, %v4883_v60  ;;  %v6314_v52 = vsub.f32 %v6162_v3, %v4883_v60  ;;  %v6317_v59 = vsub.f32 %v6165_v9, %v4883_v60 }
 0x382   : > { %v6320_v63 = vsub.f32 %v6168_v4, %v4883_v60  ;;  %v6323_v34 = vsub.f32 %v6171_v44, %v4883_v60  ;;  %v6326_v51 = vsub.f32 %v6174_v10, %v4883_v60  ;;  %v3009_v50 = vsel %vm2999_vm9, %v2971_v47, 0.0 }
 0x383   : > { %v3006_v48 = vadd.f32 %v3005_v35, %v3004_v49  ;;  %v6330_v41 = vsub.f32 %v6177_v29, %v4883_v60  ;;  %v6333_v36 = vsub.f32 %v6180_v54, %v4883_v60  ;;  %v6336_v39 = vsub.f32 %v6183_v2, %v4883_v60 }
 0x384   : > { %v6339_v11 = vsub.f32 %v6185_v12, %v4883_v60  ;;  %v6342_v16 = vsub.f32 %v6188_v25, %v4883_v60  ;;  %v3011_v35 = vsel %vm2999_vm9, %v2972_v43, 0.0  ;;  %v3073_v49 = vmul.f32 %v2966_v27, %v2966_v27 }
 0x385   : > { %v3008_v26 = vadd.f32 %v3007_v5, %v3006_v48  ;;  %v6346_v10 = vsub.f32 %v6191_v7, %v4883_v60  ;;  %v3074_v44 = vmul.f32 %v2967_v40, %v2967_v40  ;;  %v3075_v54 = vmul.f32 %v2968_v45, %v2968_v45 }
 0x386   : > { %v6349_v4 = vsub.f32 %v6194_v33, %v4883_v60  ;;  %v6352_v5 = vsub.f32 %v6197_v15, %v4883_v60  ;;  %v6355_v48 = vsub.f32 %v6200_v8, %v4883_v60  ;;  %v3013_v25 = vsel %vm2999_vm9, %v6288_v17, 0.0 }
 0x387   : > { %v3010_v29 = vadd.f32 %v3009_v50, %v3008_v26  ;;  %v6360_v27 = vsub.f32 %v6203_v14, %v4883_v60  ;;  %v6363_v7 = vsub.f32 %v6206_v23, %v4883_v60  ;;  %v3076_v45 = vmul.f32 %v2969_v13, %v2969_v13 }
 0x388   : > { %v6366_v50 = vsub.f32 %v6209_v20, %v4883_v60  ;;  %v3015_v26 = vsel %vm2999_vm9, %v6292_v24, 0.0  ;;  %v3017_v8 = vsel %vm2999_vm9, %v6295_v30, 0.0  ;;  %v3105_v15 = vsel %vm2999_vm9, %v3073_v49, 0.0 }
 0x389   : > { %v3012_v40 = vadd.f32 %v3011_v35, %v3010_v29  ;;  %v3077_v12 = vmul.f32 %v2970_v21, %v2970_v21  ;;  %v3106_v14 = vsel %vm2999_vm9, %v3074_v44, 0.0  ;;  %v3108_v23 = vsel %vm2999_vm9, %v3075_v54, 0.0 }
 0x38a   : > { %v3019_v29 = vsel %vm2999_vm9, %v6298_v58, 0.0  ;;  %v3021_v60 = vsel %vm2999_vm9, %v6301_v28, 0.0  ;;  %v3023_v13 = vsel %vm2999_vm9, %v6304_v18, 0.0  ;;  %v3107_v35 = vadd.f32 %v3106_v14, %v3105_v15 }
 0x38b   : > { %v3014_v33 = vadd.f32 %v3013_v25, %v3012_v40  ;;  %v3025_v49 = vsel %vm2999_vm9, %v6307_v22, 0.0  ;;  %v3078_v25 = vmul.f32 %v2971_v47, %v2971_v47  ;;  %v3110_v21 = vsel %vm2999_vm9, %v3076_v45, 0.0 }
 0x38c   : > { %v3027_v44 = vsel %vm2999_vm9, %v6311_v1, 0.0  ;;  %v3029_v54 = vsel %vm2999_vm9, %v6314_v52, 0.0  ;;  %v3031_v40 = vsel %vm2999_vm9, %v6317_v59, 0.0  ;;  %v3109_v2 = vadd.f32 %v3108_v23, %v3107_v35 }
 0x38d   : > { %v3016_v20 = vadd.f32 %v3015_v26, %v3014_v33  ;;  %v6392_v33 = vsel %vm2999_vm9, %v6320_v63, 0.0  ;;  %v3079_v15 = vmul.f32 %v2972_v43, %v2972_v43  ;;  %v3112_v14 = vsel %vm2999_vm9, %v3077_v12, 0.0 }
 0x38e   : > { %v6397_v47 = vsel %vm2999_vm9, %v6323_v34, 0.0  ;;  %v6401_v45 = vsel %vm2999_vm9, %v6326_v51, 0.0  ;;  %v6405_v26 = vsel %vm2999_vm9, %v6330_v41, 0.0  ;;  %v3080_v12 = vmul.f32 %v6288_v17, %v6288_v17 }
 0x38f   : > { %v3018_v9 = vadd.f32 %v3017_v8, %v3016_v20  ;;  %v3111_v8 = vadd.f32 %v3110_v21, %v3109_v2  ;;  %v6409_v20 = vsel %vm2999_vm9, %v6333_v36, 0.0  ;;  %v3114_v43 = vsel %vm2999_vm9, %v3078_v25, 0.0 }
 0x390   : > { %v6416_v35 = vsel %vm2999_vm9, %v6336_v39, 0.0  ;;  %v3081_v3 = vmul.f32 %v6292_v24, %v6292_v24  ;;  %v3082_v2 = vmul.f32 %v6295_v30, %v6295_v30  ;;  %v3083_v21 = vmul.f32 %v6298_v58, %v6298_v58 }
 0x391   : > { %v3020_v23 = vadd.f32 %v3019_v29, %v3018_v9  ;;  %v3113_v9 = vadd.f32 %v3112_v14, %v3111_v8  ;;  %v3084_v17 = vmul.f32 %v6301_v28, %v6301_v28  ;;  %v3116_v25 = vsel %vm2999_vm9, %v3079_v15, 0.0 }
 0x392   : > { %v3085_v0 = vmul.f32 %v6304_v18, %v6304_v18  ;;  %v3086_v46 = vmul.f32 %v6307_v22, %v6307_v22  ;;  %v3087_v24 = vmul.f32 %v6311_v1, %v6311_v1  ;;  %v3088_v58 = vmul.f32 %v6314_v52, %v6314_v52 }
 0x393   : > { %v3022_v29 = vadd.f32 %v3021_v60, %v3020_v23  ;;  %v3115_v30 = vadd.f32 %v3114_v43, %v3113_v9  ;;  %v6435_v60 = vsel %vm2999_vm9, %v6339_v11, 0.0  ;;  %v3118_v28 = vsel %vm2999_vm9, %v3080_v12, 0.0 }
 0x394   : > { %v3089_v18 = vmul.f32 %v6317_v59, %v6317_v59  ;;  %v3090_v22 = vmul.f32 %v6320_v63, %v6320_v63  ;;  %v3091_v1 = vmul.f32 %v6323_v34, %v6323_v34  ;;  %v3092_v8 = vmul.f32 %v6326_v51, %v6326_v51 }
 0x395   : > { %v3024_v14 = vadd.f32 %v3023_v13, %v3022_v29  ;;  %v3117_v15 = vadd.f32 %v3116_v25, %v3115_v30  ;;  %v3093_v23 = vmul.f32 %v6330_v41, %v6330_v41  ;;  %v3120_v52 = vsel %vm2999_vm9, %v3081_v3, 0.0 }
 0x396   : > { %v6453_v12 = vsel %vm2999_vm9, %v6342_v16, 0.0  ;;  %v6457_v59 = vsel %vm2999_vm9, %v6346_v10, 0.0  ;;  %v3094_v63 = vmul.f32 %v6333_v36, %v6333_v36  ;;  %v6463_v51 = vsel %vm2999_vm9, %v6349_v4, 0.0 }
 0x397   : > { %v3026_v13 = vadd.f32 %v3025_v49, %v3024_v14  ;;  %v3119_v34 = vadd.f32 %v3118_v28, %v3117_v15  ;;  %v3095_v3 = vmul.f32 %v6336_v39, %v6336_v39  ;;  %v3122_v41 = vsel %vm2999_vm9, %v3082_v2, 0.0 }
 0x398   : > { %v3096_v43 = vmul.f32 %v6339_v11, %v6339_v11  ;;  %v3124_v29 = vsel %vm2999_vm9, %v3083_v21, 0.0  ;;  %v3126_v25 = vsel %vm2999_vm9, %v3084_v17, 0.0  ;;  %v3128_v30 = vsel %vm2999_vm9, %v3085_v0, 0.0 }
 0x399   : > { %v3028_v49 = vadd.f32 %v3027_v44, %v3026_v13  ;;  %v3121_v9 = vadd.f32 %v3120_v52, %v3119_v34  ;;  %v6474_v44 = vsel %vm2999_vm9, %v6352_v5, 0.0  ;;  %v3130_v14 = vsel %vm2999_vm9, %v3086_v46, 0.0 }
 0x39a   : > { %v3097_v39 = vmul.f32 %v6342_v16, %v6342_v16  ;;  %v3132_v11 = vsel %vm2999_vm9, %v3087_v24, 0.0  ;;  %v3134_v28 = vsel %vm2999_vm9, %v3088_v58, 0.0  ;;  %v3136_v17 = vsel %vm2999_vm9, %v3089_v18, 0.0 }
 0x39b   : > { %v3030_v36 = vadd.f32 %v3029_v54, %v3028_v49  ;;  %v3123_v2 = vadd.f32 %v3122_v41, %v3121_v9  ;;  %v6484_v54 = vsel %vm2999_vm9, %v6355_v48, 0.0  ;;  %v3138_v15 = vsel %vm2999_vm9, %v3090_v22, 0.0 }
 0x39c   : > { %v3098_v46 = vmul.f32 %v6346_v10, %v6346_v10  ;;  %v3140_v16 = vsel %vm2999_vm9, %v3091_v1, 0.0  ;;  %v6492_v13 = vsel %vm2999_vm9, %v3092_v8, 0.0  ;;  %v6500_v58 = vsel %vm2999_vm9, %v3093_v23, 0.0 }
 0x39d   : > { %v3032_v21 = vadd.f32 %v3031_v40, %v3030_v36  ;;  %v3125_v0 = vadd.f32 %v3124_v29, %v3123_v2  ;;  %v6497_v40 = vsel %vm2999_vm9, %v6360_v27, 0.0  ;;  %v6503_v18 = vsel %vm2999_vm9, %v3094_v63, 0.0 }
 0x39e   : > { %v3099_v10 = vmul.f32 %v6349_v4, %v6349_v4  ;;  %v3100_v22 = vmul.f32 %v6352_v5, %v6352_v5  ;;  %v3101_v1 = vmul.f32 %v6355_v48, %v6355_v48  ;;  %v3102_v52 = vmul.f32 %v6360_v27, %v6360_v27 }
 0x39f   : > { %v3034_v24 = vadd.f32 %v6392_v33, %v3032_v21  ;;  %v3127_v33 = vadd.f32 %v3126_v25, %v3125_v0  ;;  %v3103_v23 = vmul.f32 %v6363_v7, %v6363_v7  ;;  %v6517_v63 = vsel %vm2999_vm9, %v3095_v3, 0.0 }
 0x3a0   : > { %v6521_v4 = vsel %vm2999_vm9, %v6363_v7, 0.0  ;;  %v6525_v5 = vsel %vm2999_vm9, %v6366_v50, 0.0  ;;  %v3104_v34 = vmul.f32 %v6366_v50, %v6366_v50  ;;  %v6534_v49 = vsel %vm2999_vm9, %v3097_v39, 0.0 }
 0x3a1   : > { %v3036_v8 = vadd.f32 %v6397_v47, %v3034_v24  ;;  %v3129_v48 = vadd.f32 %v3128_v30, %v3127_v33  ;;  %v6528_v47 = vsel %vm2999_vm9, %v3096_v43, 0.0  ;;  %v6537_v3 = vsel %vm2999_vm9, %v3098_v46, 0.0  ;;  %v8689_v33 = vld [vmem:[#allocation12_spill] sm:$0xff] }
 0x3a2   : > { %v6540_v41 = vsel %vm2999_vm9, %v3099_v10, 0.0  ;;  %v6543_v9 = vsel %vm2999_vm9, %v3100_v22, 0.0  ;;  %v6546_v43 = vsel %vm2999_vm9, %v3101_v1, 0.0  ;;  %v6550_v50 = vsel %vm2999_vm9, %v3102_v52, 0.0 }
 0x3a3   : > { %v3038_v27 = vadd.f32 %v6401_v45, %v3036_v8  ;;  %v3131_v7 = vadd.f32 %v3130_v14, %v3129_v48  ;;  %v6553_v29 = vsel %vm2999_vm9, %v3103_v23, 0.0  ;;  %v8540_v25 = vrot.slane %v6021_v19, 2 }
 0x3a4   : > { %v8541_v30 = vrot.slane %v6021_v19, 4  ;;  %v8550_v14 = vrot.slane %v6041_v38, 2  ;;  %v8546_v39 = vrot.slane %v6041_v38, 4  ;;  %v6561_v21 = vsel %vm2999_vm9, %v3104_v34, 0.0 }
 0x3a5   : > { %v3040_v45 = vadd.f32 %v6405_v26, %v3038_v27  ;;  %v3133_v36 = vadd.f32 %v3132_v11, %v3131_v7  ;;  %v8552_v26 = vrot.slane %v6021_v19, 6  ;;  %v8551_v46 = vrot.slane %v6061_v37, 2 }
 0x3a6   : > { %v8545_v24 = vrot.slane %v6041_v38, 6  ;;  %v8554_v11 = vrot.slane %v6061_v37, 4  ;;  %v8553_v10 = vrot.slane %v6061_v37, 6  ;;  %v8542_v1 = vrot.slane %v6031_v6, 2 }
 0x3a7   : > { %v3042_v2 = vadd.f32 %v6409_v20, %v3040_v45  ;;  %v3135_v0 = vadd.f32 %v3134_v28, %v3133_v36  ;;  %v8547_v20 = vrot.slane %v6051_v42, 2  ;;  %v8543_v52 = vrot.slane %v6031_v6, 4  ;;  %v8702_v36 = vld [vmem:[#allocation17_spill] sm:$0xff] }
 0x3a8   : > { %v8548_v23 = vrot.slane %v6051_v42, 4  ;;  %v8544_v27 = vrot.slane %v6031_v6, 6  ;;  %v8549_v34 = vrot.slane %v6051_v42, 6  ;;  %v8707_v28 = vld [vmem:[#allocation29_spill] sm:$0xff] }
 0x3a9   : > { %v3044_v22 = vadd.f32 %v6416_v35, %v3042_v2  ;;  %v3137_v8 = vadd.f32 %v3136_v17, %v3135_v0 }
 0x3ab   : > { %v3046_v48 = vadd.f32 %v6435_v60, %v3044_v22  ;;  %v3139_v7 = vadd.f32 %v3138_v15, %v3137_v8  ;;  %v8690_v15 = vld [vmem:[#allocation30_spill] sm:$0xff] }
 0x3ad   : > { %v3048_v2 = vadd.f32 %v6453_v12, %v3046_v48  ;;  %v3141_v22 = vadd.f32 %v3140_v16, %v3139_v7  ;;  %v8691_v12 = vld [vmem:[#allocation18_spill] sm:$0xff]  ;;  %v8692_v7 = vld [vmem:[#allocation13_spill] sm:$0xff] }
 0x3af   : > { %v3050_v8 = vadd.f32 %v6457_v59, %v3048_v2  ;;  %v3143_v48 = vadd.f32 %v6492_v13, %v3141_v22  ;;  %v8693_v2 = vld [vmem:[#allocation34_spill] sm:$0xff]  ;;  %v8694_v22 = vld [vmem:[#allocation21_spill] sm:$0xff] }
 0x3b1   : > { %v3052_v35 = vadd.f32 %v6463_v51, %v3050_v8  ;;  %v3145_v17 = vadd.f32 %v6500_v58, %v3143_v48  ;;  %v8695_v8 = vld [vmem:[#allocation16_spill] sm:$0xff]  ;;  %v8696_v48 = vld [vmem:[#allocation37_spill] sm:$0xff] }
 0x3b3   : > { %v3054_v16 = vadd.f32 %v6474_v44, %v3052_v35  ;;  %v3147_v59 = vadd.f32 %v6503_v18, %v3145_v17  ;;  %v8697_v35 = vld [vmem:[#allocation24_spill] sm:$0xff]  ;;  %v8698_v17 = vld [vmem:[#allocation19_spill] sm:$0xff] }
 0x3b5   : > { %v3056_v13 = vadd.f32 %v6484_v54, %v3054_v16  ;;  %v3149_v51 = vadd.f32 %v6517_v63, %v3147_v59 }
 0x3b7   : > { %v3058_v58 = vadd.f32 %v6497_v40, %v3056_v13  ;;  %v3151_v44 = vadd.f32 %v6528_v47, %v3149_v51  ;;  %v8699_v47 = vld [vmem:[#allocation14_spill] sm:$0xff] }
 0x3b8   : > { %v8701_v13 = vld [vmem:[#allocation22_spill] sm:$0xff] }
 0x3b9   : > { %v3060_v18 = vadd.f32 %v6521_v4, %v3058_v58  ;;  %v3153_v54 = vadd.f32 %v6534_v49, %v3151_v44  ;;  %v8700_v4 = vld [vmem:[#allocation28_spill] sm:$0xff]  ;;  %v8704_v49 = vld [vmem:[#allocation25_spill] sm:$0xff] }
 0x3ba   : > { %v8703_v58 = vld [vmem:[#allocation32_spill] sm:$0xff] }
 0x3bb   : > { %v3062_v63 = vadd.f32 %v6525_v5, %v3060_v18  ;;  %v3155_v40 = vadd.f32 %v6537_v3, %v3153_v54  ;;  %v8705_v5 = vld [vmem:[#allocation20_spill] sm:$0xff]  ;;  %v6688_v3 = vrot.slane %v8552_v26, 9 }
 0x3bd   : > { %v3063_v16 = vrot.slane %v3062_v63, 4  ;;  %v3157_v18 = vadd.f32 %v6540_v41, %v3155_v40 }
 0x3bf   : > { %v3064_v54 = vadd.f32 %v3063_v16, %v3062_v63  ;;  %v3159_v51 = vadd.f32 %v6543_v9, %v3157_v18  ;;  %v8706_v16 = vld [vmem:[#allocation36_spill] sm:$0xff] }
 0x3c1   : > { %v3065_v59 = vrot.slane %v3064_v54, 2  ;;  %v3161_v44 = vadd.f32 %v6546_v43, %v3159_v51 }
 0x3c3   : > { %v3066_v18 = vadd.f32 %v3065_v59, %v3064_v54  ;;  %v3163_v60 = vadd.f32 %v6550_v50, %v3161_v44  ;;  %v2998_v54 = vld [vmem:[#allocation2] sm:$0x1]  ;;  %v6680_v50 = vrot.slane %v8540_v25, 9  ;;  %v6684_v44 = vrot.slane %v8541_v30, 9 }
 0x3c4   : > { %v6698_v25 = vrot.slane %v8543_v52, 9  ;;  %v6702_v30 = vrot.slane %v8544_v27, 9  ;;  %v6707_v59 = vrot.slane %v8550_v14, 9  ;;  %v6720_v27 = vrot.slane %v8547_v20, 9 }
 0x3c5   : > { %v3067_v51 = vrot.slane %v3066_v18, 1  ;;  %v3165_v40 = vadd.f32 %v6553_v29, %v3163_v60  ;;  %v6693_v29 = vrot.slane %v8542_v1, 9  ;;  %v6711_v1 = vrot.slane %v8546_v39, 9 }
 0x3c6   : > { %v6734_v39 = vrot.slane %v8551_v46, 9  ;;  %v6738_v20 = vrot.slane %v8554_v11, 9  ;;  %v8710_v46 = vrot.slane %v6071_v62, 6 }
 0x3c7   : > { %v3068_v43 = vadd.f32 %v3067_v51, %v3066_v18  ;;  %v3167_v60 = vadd.f32 %v6561_v21, %v3165_v40  ;;  %v6715_v21 = vrot.slane %v8545_v24, 9  ;;  %v8709_v24 = vrot.slane %v6071_v62, 4 }
 0x3c8   : > { %v6755_v26 = vrot.slane %v8710_v46, 9  ;;  %v8717_v46 = vrot.slane %v6092_v32, 2 }
 0x3c9   : > { %v3069_v51 = vadd.f32 %v3068_v43, %v2998_v54  ;;  %v3168_v40 = vrot.slane %v3167_v60, 4  ;;  %v6724_v43 = vrot.slane %v8548_v23, 9  ;;  %v6729_v54 = vrot.slane %v8549_v34, 9 }
 0x3ca   : > { %v6742_v23 = vrot.slane %v8553_v10, 9  ;;  %v8708_v34 = vrot.slane %v6071_v62, 2  ;;  %v6751_v18 = vrot.slane %v8709_v24, 9  ;;  %v6773_v63 = vrot.slane %v8717_v46, 9 }
 0x3cb   : > { %3071 = vst.msk [vmem:[#allocation2] sm:$0x1] %vm3070_vm10, %v3069_v51  ;;  %v3169_v52 = vadd.f32 %v3168_v40, %v3167_v60  ;;  %v8711_v40 = vrot.slane %v6081_v57, 2  ;;  %v8713_v51 = vrot.slane %v6081_v57, 4  ;;  %v8719_v60 = vrot.slane %v6092_v32, 4 }
 0x3cc   : > { %v6747_v14 = vrot.slane %v8708_v34, 9  ;;  %v8715_v34 = vrot.slane %v6081_v57, 6  ;;  %8718 = vst [vmem:[#allocation27_spill] sm:$0xff] %v6773_v63  ;;  %v8724_v24 = vrot.slane %v6102_v53, 4  ;;  %v8726_v46 = vrot.slane %v6102_v53, 6 }
 0x3cd   : > { %v6760_v10 = vrot.slane %v8711_v40, 9  ;;  %v3170_v11 = vrot.slane %v3169_v52, 2  ;;  %v6764_v0 = vrot.slane %v8713_v51, 9  ;;  %v6777_v45 = vrot.slane %v8719_v60, 9 }
 0x3ce   : > { %v6768_v9 = vrot.slane %v8715_v34, 9  ;;  %v8720_v40 = vrot.slane %v6092_v32, 6  ;;  %v8722_v34 = vrot.slane %v6102_v53, 2  ;;  %v6794_v63 = vrot.slane %v8726_v46, 9 }
 0x3cf   : > { %8712 = vst [vmem:[#allocation23_spill] sm:$0xff] %v6760_v10  ;;  %v6790_v10 = vrot.slane %v8724_v24, 9  ;;  %v8734_v46 = vrot.slane %v6122_v55, 2  ;;  %v8736_v60 = vrot.slane %v6122_v55, 4 }
 0x3d0   : > { %8714 = vst [vmem:[#allocation39_spill] sm:$0xff] %v6764_v0  ;;  %v6781_v41 = vrot.slane %v8720_v40, 9  ;;  %v3171_v0 = vadd.f32 %v3170_v11, %v3169_v52  ;;  %v8728_v40 = vrot.slane %v6112_v61, 2  ;;  %v8730_v11 = vrot.slane %v6112_v61, 4 }
 0x3d1   : > { %8716 = vst [vmem:[#allocation33_spill] sm:$0xff] %v6768_v9  ;;  %v6786_v9 = vrot.slane %v8722_v34, 9  ;;  %v8732_v34 = vrot.slane %v6112_v61, 6 }
 0x3d2   : > { %8721 = vst [vmem:[#allocation31_spill] sm:$0xff] %v6781_v41  ;;  %v6799_v41 = vrot.slane %v8728_v40, 9  ;;  %v6803_v52 = vrot.slane %v8730_v11, 9  ;;  %v3172_v24 = vrot.slane %v3171_v0, 1  ;;  %v3072_v40 = vld [vmem:[#allocation3] sm:$0x1] }
 0x3d3   : > { %8723 = vst [vmem:[#allocation35_spill] sm:$0xff] %v6786_v9  ;;  %v6807_v51 = vrot.slane %v8732_v34, 9  ;;  %v6816_v9 = vrot.slane %v8736_v60, 9  ;;  %v8740_v34 = vrot.slane %v6131_v31, 2 }
 0x3d4   : > { %8725 = vst [vmem:[#allocation38_spill] sm:$0xff] %v6790_v10  ;;  %v8742_v10 = vrot.slane %v6131_v31, 4 }
 0x3d5   : > { %8727 = vst [vmem:[#allocation40_spill] sm:$0xff] %v6794_v63  ;;  %v6812_v63 = vrot.slane %v8734_v46, 9  ;;  %v3173_v46 = vadd.f32 %v3172_v24, %v3171_v0  ;;  %v8751_v0 = vrot.slane %v8689_v33, 2 }
 0x3d6   : > { %8729 = vst [vmem:[#allocation41_spill] sm:$0xff] %v6799_v41  ;;  %v8738_v41 = vrot.slane %v6122_v55, 6  ;;  %v6829_v61 = vrot.slane %v8742_v10, 9  ;;  %v8756_v10 = vrot.slane %v8690_v15, 4 }
 0x3d7   : > { %8731 = vst [vmem:[#allocation42_spill] sm:$0xff] %v6803_v52  ;;  %v8747_v52 = vrot.slane %v6141_v56, 4  ;;  %v3174_v24 = vadd.f32 %v3173_v46, %v3072_v40  ;;  %v8758_v40 = vrot.slane %v8690_v15, 6 }
 0x3d8   : > { %8733 = vst [vmem:[#allocation43_spill] sm:$0xff] %v6807_v51  ;;  %v6820_v11 = vrot.slane %v8738_v41, 9  ;;  %v6825_v51 = vrot.slane %v8740_v34, 9  ;;  %v8745_v41 = vrot.slane %v6141_v56, 2  ;;  %v8749_v34 = vrot.slane %v6141_v56, 6 }
 0x3d9   : > { %8735 = vst [vmem:[#allocation45_spill] sm:$0xff] %v6812_v63  ;;  %v8743_v63 = vrot.slane %v6131_v31, 6  ;;  %v6842_v55 = vrot.slane %v8747_v52, 9  ;;  %v6872_v46 = vrot.slane %v8758_v40, 9  ;;  %v8762_v52 = vrot.slane %v8691_v12, 4 }
 0x3da   : > { %8737 = vst [vmem:[#allocation44_spill] sm:$0xff] %v6816_v9  ;;  %v8752_v9 = vrot.slane %v8689_v33, 4  ;;  %v8766_v40 = vrot.slane %v8692_v7, 2 }
 0x3db   : > { %8739 = vst [vmem:[#allocation47_spill] sm:$0xff] %v6820_v11  ;;  %v6833_v60 = vrot.slane %v8743_v63, 9  ;;  %v6838_v11 = vrot.slane %v8745_v41, 9  ;;  %v6851_v63 = vrot.slane %v8751_v0, 9  ;;  %v8753_v41 = vrot.slane %v8689_v33, 6 }
 0x3dc   : > { %8741 = vst [vmem:[#allocation46_spill] sm:$0xff] %v6825_v51  ;;  %v6846_v51 = vrot.slane %v8749_v34, 9  ;;  %v8754_v34 = vrot.slane %v8690_v15, 2  ;;  %v8760_v0 = vrot.slane %v8691_v12, 2 }
 0x3dd   : > { %8744 = vst [vmem:[#allocation48_spill] sm:$0xff] %v6833_v60  ;;  %v6855_v60 = vrot.slane %v8752_v9, 9 }
 0x3de   : > { %8746 = vst [vmem:[#allocation49_spill] sm:$0xff] %v6838_v11  ;;  %v6859_v11 = vrot.slane %v8753_v41, 9  ;;  %v6878_v41 = vrot.slane %v8760_v0, 9  ;;  %v8770_v0 = vrot.slane %v8692_v7, 6 }
 0x3df   : > { %8748 = vst [vmem:[#allocation50_spill] sm:$0xff] %v6842_v55  ;;  %v6868_v55 = vrot.slane %v8756_v10, 9 }
 0x3e0   : > { %8750 = vst [vmem:[#allocation51_spill] sm:$0xff] %v6846_v51  ;;  %v6864_v51 = vrot.slane %v8754_v34, 9  ;;  %v6882_v34 = vrot.slane %v8762_v52, 9  ;;  %v8780_v52 = vrot.slane %v8694_v22, 4 }
 0x3e1   : > { %8757 = vst [vmem:[#allocation53_spill] sm:$0xff] %v6868_v55  ;;  %v8774_v55 = vrot.slane %v8693_v2, 4 }
 0x3e2   : > { %8755 = vst [vmem:[#allocation52_spill] sm:$0xff] %v6864_v51  ;;  %v8764_v51 = vrot.slane %v8691_v12, 6 }
 0x3e3   : > { %8759 = vst [vmem:[#allocation55_spill] sm:$0xff] %v6872_v46  ;;  %v6891_v46 = vrot.slane %v8766_v40, 9  ;;  %v8776_v40 = vrot.slane %v8693_v2, 6 }
 0x3e4   : > { %3175 = vst.msk [vmem:[#allocation3] sm:$0x1] %vm3070_vm10, %v3174_v24  ;;  %v6886_v10 = vrot.slane %v8764_v51, 9  ;;  %v8768_v24 = vrot.slane %v8692_v7, 4 }
 0x3e5   : > { %8761 = vst [vmem:[#allocation54_spill] sm:$0xff] %v6878_v41  ;;  %v6899_v41 = vrot.slane %v8770_v0, 9 }
 0x3e6   : > { %8763 = vst [vmem:[#allocation56_spill] sm:$0xff] %v6882_v34  ;;  %v6895_v9 = vrot.slane %v8768_v24, 9  ;;  %v8772_v34 = vrot.slane %v8693_v2, 2  ;;  %v8786_v24 = vrot.slane %v8695_v8, 4 }
 0x3e7   : > { %8765 = vst [vmem:[#allocation12_spill] sm:$0xff] %v6886_v10  ;;  %v6908_v10 = vrot.slane %v8774_v55, 9  ;;  %v8792_v55 = vrot.slane %v8696_v48, 4 }
 0x3e8   : > { %8767 = vst [vmem:[#allocation30_spill] sm:$0xff] %v6891_v46  ;;  %v6904_v51 = vrot.slane %v8772_v34, 9  ;;  %v6912_v46 = vrot.slane %v8776_v40, 9  ;;  %v8782_v34 = vrot.slane %v8694_v22, 6 }
 0x3e9   : > { %8769 = vst [vmem:[#allocation18_spill] sm:$0xff] %v6895_v9  ;;  %v8778_v9 = vrot.slane %v8694_v22, 2 }
 0x3ea   : > { %8771 = vst [vmem:[#allocation13_spill] sm:$0xff] %v6899_v41  ;;  %v6921_v41 = vrot.slane %v8780_v52, 9  ;;  %v8798_v52 = vrot.slane %v8697_v35, 4 }
 0x3eb   : > { %8773 = vst [vmem:[#allocation34_spill] sm:$0xff] %v6904_v51  ;;  %v6917_v0 = vrot.slane %v8778_v9, 9  ;;  %v6925_v51 = vrot.slane %v8782_v34, 9  ;;  %v8788_v9 = vrot.slane %v8695_v8, 6 }
 0x3ec   : > { %8775 = vst [vmem:[#allocation21_spill] sm:$0xff] %v6908_v10  ;;  %v8784_v10 = vrot.slane %v8695_v8, 2 }
 0x3ed   : > { %8777 = vst [vmem:[#allocation16_spill] sm:$0xff] %v6912_v46  ;;  %v6934_v46 = vrot.slane %v8786_v24, 9  ;;  %v8804_v24 = vrot.slane %v8698_v17, 4 }
 0x3ee   : > { %8779 = vst [vmem:[#allocation37_spill] sm:$0xff] %v6917_v0  ;;  %v6930_v40 = vrot.slane %v8784_v10, 9  ;;  %v6938_v0 = vrot.slane %v8788_v9, 9  ;;  %v8794_v10 = vrot.slane %v8696_v48, 6 }
 0x3ef   : > { %8781 = vst [vmem:[#allocation24_spill] sm:$0xff] %v6921_v41  ;;  %v8790_v41 = vrot.slane %v8696_v48, 2 }
 0x3f0   : > { %8783 = vst [vmem:[#allocation19_spill] sm:$0xff] %v6925_v51  ;;  %v6947_v51 = vrot.slane %v8792_v55, 9  ;;  %v8810_v55 = vrot.slane %v8699_v47, 4 }
 0x3f1   : > { %8785 = vst [vmem:[#allocation14_spill] sm:$0xff] %v6930_v40  ;;  %v6943_v34 = vrot.slane %v8790_v41, 9  ;;  %v6951_v40 = vrot.slane %v8794_v10, 9  ;;  %v8800_v41 = vrot.slane %v8697_v35, 6 }
 0x3f2   : > { %8787 = vst [vmem:[#allocation28_spill] sm:$0xff] %v6934_v46  ;;  %v8796_v46 = vrot.slane %v8697_v35, 2 }
 0x3f3   : > { %8789 = vst [vmem:[#allocation22_spill] sm:$0xff] %v6938_v0  ;;  %v6960_v0 = vrot.slane %v8798_v52, 9  ;;  %v8816_v52 = vrot.slane %v8700_v4, 4 }
 0x3f4   : > { %8791 = vst [vmem:[#allocation17_spill] sm:$0xff] %v6943_v34  ;;  %v6956_v9 = vrot.slane %v8796_v46, 9  ;;  %v6964_v34 = vrot.slane %v8800_v41, 9  ;;  %v8806_v46 = vrot.slane %v8698_v17, 6 }
 0x3f5   : > { %8793 = vst [vmem:[#allocation32_spill] sm:$0xff] %v6947_v51  ;;  %v8802_v51 = vrot.slane %v8698_v17, 2 }
 0x3f6   : > { %8795 = vst [vmem:[#allocation25_spill] sm:$0xff] %v6951_v40  ;;  %v6973_v40 = vrot.slane %v8804_v24, 9  ;;  %v8822_v24 = vrot.slane %v8701_v13, 4 }
 0x3f7   : > { %8797 = vst [vmem:[#allocation20_spill] sm:$0xff] %v6956_v9  ;;  %v6969_v10 = vrot.slane %v8802_v51, 9  ;;  %v6977_v9 = vrot.slane %v8806_v46, 9  ;;  %v8812_v51 = vrot.slane %v8699_v47, 6 }
 0x3f8   : > { %8799 = vst [vmem:[#allocation36_spill] sm:$0xff] %v6960_v0  ;;  %v8808_v0 = vrot.slane %v8699_v47, 2 }
 0x3f9   : > { %8801 = vst [vmem:[#allocation29_spill] sm:$0xff] %v6964_v34  ;;  %v6986_v34 = vrot.slane %v8810_v55, 9  ;;  %v8828_v55 = vrot.slane %v8702_v36, 4 }
 0x3fa   : > { %8803 = vst [vmem:[#allocation57_spill] sm:$0xff] %v6969_v10  ;;  %v6982_v41 = vrot.slane %v8808_v0, 9  ;;  %v6990_v10 = vrot.slane %v8812_v51, 9  ;;  %v8818_v0 = vrot.slane %v8700_v4, 6 }
 0x3fb   : > { %8805 = vst [vmem:[#allocation58_spill] sm:$0xff] %v6973_v40  ;;  %v8814_v40 = vrot.slane %v8700_v4, 2 }
 0x3fc   : > { %8807 = vst [vmem:[#allocation59_spill] sm:$0xff] %v6977_v9  ;;  %v6999_v9 = vrot.slane %v8816_v52, 9  ;;  %v8834_v52 = vrot.slane %v8703_v58, 4 }
 0x3fd   : > { %8809 = vst [vmem:[#allocation60_spill] sm:$0xff] %v6982_v41  ;;  %v6995_v46 = vrot.slane %v8814_v40, 9  ;;  %v7003_v41 = vrot.slane %v8818_v0, 9  ;;  %v8824_v40 = vrot.slane %v8701_v13, 6 }
 0x3fe   : > { %8811 = vst [vmem:[#allocation61_spill] sm:$0xff] %v6986_v34  ;;  %v8820_v34 = vrot.slane %v8701_v13, 2 }
 0x3ff   : > { %8813 = vst [vmem:[#allocation62_spill] sm:$0xff] %v6990_v10  ;;  %v7012_v10 = vrot.slane %v8822_v24, 9  ;;  %v8840_v24 = vrot.slane %v8704_v49, 4 }
 0x400   : > { %8815 = vst [vmem:[#allocation63_spill] sm:$0xff] %v6995_v46  ;;  %v7008_v51 = vrot.slane %v8820_v34, 9  ;;  %v7016_v46 = vrot.slane %v8824_v40, 9  ;;  %v8830_v34 = vrot.slane %v8702_v36, 6 }
 0x401   : > { %8817 = vst [vmem:[#allocation64_spill] sm:$0xff] %v6999_v9  ;;  %v8826_v9 = vrot.slane %v8702_v36, 2 }
 0x402   : > { %8819 = vst [vmem:[#allocation65_spill] sm:$0xff] %v7003_v41  ;;  %v7025_v41 = vrot.slane %v8828_v55, 9  ;;  %v8846_v55 = vrot.slane %v8705_v5, 4 }
 0x403   : > { %8821 = vst [vmem:[#allocation66_spill] sm:$0xff] %v7008_v51  ;;  %v7021_v0 = vrot.slane %v8826_v9, 9  ;;  %v7029_v51 = vrot.slane %v8830_v34, 9  ;;  %v8836_v9 = vrot.slane %v8703_v58, 6 }
 0x404   : > { %8823 = vst [vmem:[#allocation67_spill] sm:$0xff] %v7012_v10  ;;  %v8832_v10 = vrot.slane %v8703_v58, 2 }
 0x405   : > { %8825 = vst [vmem:[#allocation68_spill] sm:$0xff] %v7016_v46  ;;  %v7038_v46 = vrot.slane %v8834_v52, 9  ;;  %v8852_v52 = vrot.slane %v8706_v16, 4 }
 0x406   : > { %8827 = vst [vmem:[#allocation69_spill] sm:$0xff] %v7021_v0  ;;  %v7034_v40 = vrot.slane %v8832_v10, 9  ;;  %v7042_v0 = vrot.slane %v8836_v9, 9  ;;  %v8842_v10 = vrot.slane %v8704_v49, 6 }
 0x407   : > { %8829 = vst [vmem:[#allocation70_spill] sm:$0xff] %v7025_v41  ;;  %v8838_v41 = vrot.slane %v8704_v49, 2 }
 0x408   : > { %8831 = vst [vmem:[#allocation71_spill] sm:$0xff] %v7029_v51  ;;  %v7051_v51 = vrot.slane %v8840_v24, 9  ;;  %v8857_v24 = vrot.slane %v8707_v28, 4 }
 0x409   : > { %8833 = vst [vmem:[#allocation72_spill] sm:$0xff] %v7034_v40  ;;  %v7047_v34 = vrot.slane %v8838_v41, 9  ;;  %v7055_v40 = vrot.slane %v8842_v10, 9  ;;  %v8848_v41 = vrot.slane %v8705_v5, 6 }
 0x40a   : > { %8835 = vst [vmem:[#allocation73_spill] sm:$0xff] %v7038_v46  ;;  %v8844_v46 = vrot.slane %v8705_v5, 2 }
 0x40b   : > { %8837 = vst [vmem:[#allocation74_spill] sm:$0xff] %v7042_v0  ;;  %v7064_v0 = vrot.slane %v8846_v55, 9 }
 0x40c   : > { %8839 = vst [vmem:[#allocation75_spill] sm:$0xff] %v7047_v34  ;;  %v7060_v9 = vrot.slane %v8844_v46, 9  ;;  %v7068_v34 = vrot.slane %v8848_v41, 9  ;;  %v8854_v46 = vrot.slane %v8706_v16, 6 }
 0x40d   : > { %8841 = vst [vmem:[#allocation76_spill] sm:$0xff] %v7051_v51  ;;  %v8850_v51 = vrot.slane %v8706_v16, 2 }
 0x40e   : > { %8843 = vst [vmem:[#allocation77_spill] sm:$0xff] %v7055_v40  ;;  %v7077_v40 = vrot.slane %v8852_v52, 9  ;;  %v8860_v52 = vrot.slane %v6021_v19, 9 }
 0x40f   : > { %8845 = vst [vmem:[#allocation78_spill] sm:$0xff] %v7060_v9  ;;  %v7073_v10 = vrot.slane %v8850_v51, 9  ;;  %v7081_v9 = vrot.slane %v8854_v46, 9  ;;  %v8858_v51 = vrot.slane %v8707_v28, 6  ;;  %v8862_v46 = vrot.slane %v6021_v19, 2 }
 0x410   : > { %8847 = vst [vmem:[#allocation79_spill] sm:$0xff] %v7064_v0  ;;  %v8855_v0 = vrot.slane %v8707_v28, 2 }
 0x411   : > { %8849 = vst [vmem:[#allocation80_spill] sm:$0xff] %v7068_v34  ;;  %v7090_v34 = vrot.slane %v8857_v24, 9  ;;  %v7104_v55 = vadd.f32 %v6680_v50, %v8862_v46  ;;  %v8864_v24 = vrot.slane %v6021_v19, 6  ;;  %v8867_v46 = vrot.slane %v6031_v6, 4 }
 0x412   : > { %8851 = vst [vmem:[#allocation81_spill] sm:$0xff] %v7073_v10  ;;  %v7086_v41 = vrot.slane %v8855_v0, 9  ;;  %v7094_v10 = vrot.slane %v8858_v51, 9  ;;  %v8863_v0 = vrot.slane %v6021_v19, 4 }
 0x413   : > { %8853 = vst [vmem:[#allocation82_spill] sm:$0xff] %v7077_v40  ;;  %v7099_v40 = vadd.f32 %v8860_v52, %v6021_v19  ;;  %v7114_v51 = vadd.f32 %v6688_v3, %v8864_v24  ;;  %v8868_v19 = vrot.slane %v6031_v6, 6  ;;  %v8870_v24 = vrot.slane %v6041_v38, 2 }
 0x414   : > { %8856 = vst [vmem:[#allocation83_spill] sm:$0xff] %v7086_v41  ;;  %v7109_v41 = vadd.f32 %v6684_v44, %v8863_v0  ;;  %v7129_v44 = vadd.f32 %v6698_v25, %v8867_v46  ;;  %v8869_v0 = vrot.slane %v6041_v38, 9  ;;  %v8873_v46 = vrot.slane %v6051_v42, 9 }
 0x415   : > { %8859 = vst [vmem:[#allocation84_spill] sm:$0xff] %v7094_v10  ;;  %v8865_v10 = vrot.slane %v6031_v6, 9  ;;  %v7134_v3 = vadd.f32 %v6702_v30, %v8868_v19 }
 0x416   : > { %8861 = vst [vmem:[#allocation85_spill] sm:$0xff] %v7099_v40  ;;  %v8866_v40 = vrot.slane %v6031_v6, 2  ;;  %v7159_v19 = vadd.f32 %v8873_v46, %v6051_v42  ;;  %v8878_v46 = vrot.slane %v6061_v37, 2 }
 0x417   : > { %v7119_v52 = vadd.f32 %v8865_v10, %v6031_v6  ;;  %v7139_v10 = vadd.f32 %v8869_v0, %v6041_v38  ;;  %v8872_v6 = vrot.slane %v6041_v38, 6  ;;  %v8874_v0 = vrot.slane %v6051_v42, 2 }
 0x418   : > { %v7124_v50 = vadd.f32 %v6693_v29, %v8866_v40  ;;  %v7144_v29 = vadd.f32 %v6707_v59, %v8870_v24  ;;  %v8871_v40 = vrot.slane %v6041_v38, 4  ;;  %v8875_v24 = vrot.slane %v6051_v42, 4 }
 0x419   : > { %v7154_v30 = vadd.f32 %v6715_v21, %v8872_v6  ;;  %v7164_v59 = vadd.f32 %v6720_v27, %v8874_v0  ;;  %v8876_v38 = vrot.slane %v6051_v42, 6  ;;  %v7184_v27 = vadd.f32 %v6734_v39, %v8878_v46 }
 0x41a   : > { %v7149_v25 = vadd.f32 %v6711_v1, %v8871_v40  ;;  %v7169_v1 = vadd.f32 %v6724_v43, %v8875_v24  ;;  %v8877_v40 = vrot.slane %v6061_v37, 9  ;;  %v8879_v0 = vrot.slane %v6061_v37, 4 }
 0x41b   : > { %v7174_v21 = vadd.f32 %v6729_v54, %v8876_v38  ;;  %v8880_v42 = vrot.slane %v6061_v37, 6  ;;  %v8881_v24 = vrot.slane %v6071_v62, 9  ;;  %v8885_v46 = vrot.slane %v6071_v62, 4 }
 0x41c   : > { %v7179_v6 = vadd.f32 %v8877_v40, %v6061_v37  ;;  %v7189_v43 = vadd.f32 %v6738_v20, %v8879_v0  ;;  %v8883_v40 = vrot.slane %v6071_v62, 2  ;;  %v8887_v37 = vrot.slane %v6071_v62, 6 }
 0x41d   : > { %v7194_v54 = vadd.f32 %v6742_v23, %v8880_v42  ;;  %v7199_v38 = vadd.f32 %v8881_v24, %v6071_v62  ;;  %v7209_v20 = vadd.f32 %v6751_v18, %v8885_v46  ;;  %v8889_v0 = vrot.slane %v6081_v57, 9  ;;  %v8895_v46 = vld [vmem:[#allocation33_spill] sm:$0xff] }
 0x41e   : > { %v7204_v39 = vadd.f32 %v6747_v14, %v8883_v40  ;;  %v7214_v23 = vadd.f32 %v6755_v26, %v8887_v37  ;;  %v8890_v24 = vrot.slane %v6081_v57, 2  ;;  %v8892_v40 = vrot.slane %v6081_v57, 4 }
 0x41f   : > { %8882 = vst [vmem:[#allocation86_spill] sm:$0xff] %v7199_v38  ;;  %v7219_v42 = vadd.f32 %v8889_v0, %v6081_v57  ;;  %v8891_v38 = vld [vmem:[#allocation23_spill] sm:$0xff]  ;;  %v8894_v62 = vrot.slane %v6081_v57, 6  ;;  %v8897_v37 = vrot.slane %v6092_v32, 9  ;;  %v8904_v57 = vrot.slane %v6092_v32, 6 }
 0x420   : > { %8884 = vst [vmem:[#allocation87_spill] sm:$0xff] %v7204_v39  ;;  %v7224_v14 = vadd.f32 %v8891_v38, %v8890_v24  ;;  %v8893_v39 = vld [vmem:[#allocation39_spill] sm:$0xff]  ;;  %v8902_v24 = vrot.slane %v6092_v32, 4 }
 0x421   : > { %8886 = vst [vmem:[#allocation88_spill] sm:$0xff] %v7209_v20  ;;  %v7229_v18 = vadd.f32 %v8893_v39, %v8892_v40  ;;  %v7234_v26 = vadd.f32 %v8895_v46, %v8894_v62  ;;  %v7239_v0 = vadd.f32 %v8897_v37, %v6092_v32  ;;  %v8900_v20 = vld [vmem:[#allocation27_spill] sm:$0xff]  ;;  %v8907_v46 = vrot.slane %v6102_v53, 9 }
 0x422   : > { %8888 = vst [vmem:[#allocation89_spill] sm:$0xff] %v7214_v23  ;;  %v8899_v23 = vrot.slane %v6092_v32, 2  ;;  %v7249_v39 = vadd.f32 %v6777_v45, %v8902_v24  ;;  %v8905_v40 = vld [vmem:[#allocation31_spill] sm:$0xff]  ;;  %v8915_v32 = vrot.slane %v6102_v53, 6  ;;  %v8916_v24 = vld [vmem:[#allocation40_spill] sm:$0xff] }
 0x423   : > { %8896 = vst [vmem:[#allocation23_spill] sm:$0xff] %v7234_v26  ;;  %v7254_v62 = vadd.f32 %v8905_v40, %v8904_v57  ;;  %v7259_v37 = vadd.f32 %v8907_v46, %v6102_v53  ;;  %v8910_v26 = vld [vmem:[#allocation35_spill] sm:$0xff]  ;;  %v8918_v40 = vld [vmem:[#allocation26_spill] sm:$0xff] }
 0x424   : > { %8898 = vst [vmem:[#allocation39_spill] sm:$0xff] %v7239_v0  ;;  %v7244_v38 = vadd.f32 %v8900_v20, %v8899_v23  ;;  %v8909_v0 = vrot.slane %v6102_v53, 2  ;;  %v8912_v23 = vrot.slane %v6102_v53, 4  ;;  %v7274_v57 = vadd.f32 %v8916_v24, %v8915_v32  ;;  %v8930_v24 = vld [vmem:[#allocation15_spill] sm:$0xff] }
 0x425   : > { %8903 = vst [vmem:[#allocation27_spill] sm:$0xff] %v7249_v39  ;;  %v8922_v39 = vld [vmem:[#allocation41_spill] sm:$0xff]  ;;  %v8927_v53 = vrot.slane %v8918_v40, 6 }
 0x426   : > { %8901 = vst [vmem:[#allocation33_spill] sm:$0xff] %v7244_v38  ;;  %v7264_v20 = vadd.f32 %v8910_v26, %v8909_v0  ;;  %v8913_v38 = vld [vmem:[#allocation38_spill] sm:$0xff]  ;;  %v8924_v0 = vrot.slane %v8918_v40, 4 }
 0x427   : > { %8906 = vst [vmem:[#allocation31_spill] sm:$0xff] %v7254_v62  ;;  %v7269_v45 = vadd.f32 %v8913_v38, %v8912_v23  ;;  %v8919_v62 = vrot.slane %v8918_v40, 9  ;;  %v8928_v23 = vld [vmem:[#allocation43_spill] sm:$0xff] }
 0x428   : > { %8908 = vst [vmem:[#allocation90_spill] sm:$0xff] %v7259_v37  ;;  %v8921_v37 = vrot.slane %v8918_v40, 2  ;;  %v7294_v32 = vadd.f32 %v8928_v23, %v8927_v53  ;;  %v8939_v23 = vrot.slane %v6131_v31, 9 }
 0x429   : > { %8911 = vst [vmem:[#allocation35_spill] sm:$0xff] %v7264_v20  ;;  %v7279_v46 = vadd.f32 %v8919_v62, %v8918_v40  ;;  %v8925_v20 = vld [vmem:[#allocation42_spill] sm:$0xff]  ;;  %v8936_v40 = vrot.slane %v8930_v24, 6 }
 0x42a   : > { %8914 = vst [vmem:[#allocation38_spill] sm:$0xff] %v7269_v45  ;;  %v7284_v26 = vadd.f32 %v8922_v39, %v8921_v37  ;;  %v7289_v38 = vadd.f32 %v8925_v20, %v8924_v0  ;;  %v8933_v45 = vld [vmem:[#allocation45_spill] sm:$0xff]  ;;  %v8934_v37 = vrot.slane %v8930_v24, 4  ;;  %v8937_v0 = vld [vmem:[#allocation47_spill] sm:$0xff] }
 0x42b   : > { %8917 = vst [vmem:[#allocation40_spill] sm:$0xff] %v7274_v57  ;;  %v8931_v57 = vrot.slane %v8930_v24, 9  ;;  %v7314_v53 = vadd.f32 %v8937_v0, %v8936_v40  ;;  %v8947_v0 = vrot.slane %v6141_v56, 9 }
 0x42c   : > { %8920 = vst [vmem:[#allocation26_spill] sm:$0xff] %v7279_v46  ;;  %v8932_v46 = vrot.slane %v8930_v24, 2 }
 0x42d   : > { %8923 = vst [vmem:[#allocation41_spill] sm:$0xff] %v7284_v26  ;;  %v7299_v62 = vadd.f32 %v8931_v57, %v8930_v24  ;;  %v8935_v26 = vld [vmem:[#allocation44_spill] sm:$0xff]  ;;  %v7319_v57 = vadd.f32 %v8939_v23, %v6131_v31  ;;  %v8945_v24 = vrot.slane %v6131_v31, 6  ;;  %v7339_v23 = vadd.f32 %v8947_v0, %v6141_v56 }
 0x42e   : > { %8926 = vst [vmem:[#allocation42_spill] sm:$0xff] %v7289_v38  ;;  %v7304_v39 = vadd.f32 %v8933_v45, %v8932_v46  ;;  %v7309_v20 = vadd.f32 %v8935_v26, %v8934_v37  ;;  %v8942_v38 = vld [vmem:[#allocation46_spill] sm:$0xff]  ;;  %v8944_v46 = vrot.slane %v6131_v31, 4  ;;  %v8946_v37 = vld [vmem:[#allocation48_spill] sm:$0xff] }
 0x42f   : > { %8929 = vst [vmem:[#allocation43_spill] sm:$0xff] %v7294_v32  ;;  %v8941_v32 = vrot.slane %v6131_v31, 2  ;;  %v7334_v40 = vadd.f32 %v8946_v37, %v8945_v24  ;;  %v8953_v31 = vrot.slane %v6141_v56, 6  ;;  %v8956_v37 = vrot.slane %v8689_v33, 9 }
 0x430   : > { %8938 = vst [vmem:[#allocation15_spill] sm:$0xff] %v7314_v53  ;;  %v7329_v26 = vadd.f32 %v6829_v61, %v8944_v46  ;;  %v8950_v53 = vld [vmem:[#allocation49_spill] sm:$0xff]  ;;  %v8954_v46 = vld [vmem:[#allocation51_spill] sm:$0xff] }
 0x431   : > { %8940 = vst [vmem:[#allocation45_spill] sm:$0xff] %v7319_v57  ;;  %v7324_v45 = vadd.f32 %v8942_v38, %v8941_v32  ;;  %v8949_v57 = vrot.slane %v6141_v56, 2  ;;  %v8951_v32 = vrot.slane %v6141_v56, 4  ;;  %v7354_v24 = vadd.f32 %v8954_v46, %v8953_v31 }
 0x432   : > { %8948 = vst [vmem:[#allocation47_spill] sm:$0xff] %v7339_v23  ;;  %v7359_v0 = vadd.f32 %v8956_v37, %v8689_v33  ;;  %v8958_v23 = vrot.slane %v8689_v33, 2  ;;  %v8962_v56 = vrot.slane %v8689_v33, 6  ;;  %v8964_v31 = vrot.slane %v8690_v15, 9 }
 0x433   : > { %8943 = vst [vmem:[#allocation44_spill] sm:$0xff] %v7324_v45  ;;  %v7344_v38 = vadd.f32 %v8950_v53, %v8949_v57  ;;  %v8952_v45 = vld [vmem:[#allocation50_spill] sm:$0xff]  ;;  %v8960_v57 = vrot.slane %v8689_v33, 4  ;;  %v8965_v37 = vrot.slane %v8690_v15, 2  ;;  %v8969_v33 = vrot.slane %v8690_v15, 6 }
 0x434   : > { %v7349_v61 = vadd.f32 %v8952_v45, %v8951_v32  ;;  %8955 = vst [vmem:[#allocation46_spill] sm:$0xff] %v7354_v24  ;;  %v7364_v53 = vadd.f32 %v6851_v63, %v8958_v23  ;;  %v7374_v32 = vadd.f32 %v6859_v11, %v8962_v56  ;;  %v7379_v46 = vadd.f32 %v8964_v31, %v8690_v15  ;;  %v8978_v24 = vld [vmem:[#allocation56_spill] sm:$0xff] }
 0x435   : > { %8957 = vst [vmem:[#allocation48_spill] sm:$0xff] %v7359_v0  ;;  %v7369_v45 = vadd.f32 %v6855_v60, %v8960_v57  ;;  %v8966_v0 = vld [vmem:[#allocation52_spill] sm:$0xff]  ;;  %v8967_v23 = vrot.slane %v8690_v15, 4  ;;  %v8970_v57 = vld [vmem:[#allocation55_spill] sm:$0xff]  ;;  %v8972_v56 = vrot.slane %v8691_v12, 9  ;;  %v8979_v15 = vrot.slane %v8691_v12, 6 }
 0x436   : > { %8959 = vst [vmem:[#allocation49_spill] sm:$0xff] %v7364_v53  ;;  %v7384_v63 = vadd.f32 %v8966_v0, %v8965_v37  ;;  %v8968_v53 = vld [vmem:[#allocation53_spill] sm:$0xff]  ;;  %v7394_v11 = vadd.f32 %v8970_v57, %v8969_v33  ;;  %v8977_v37 = vrot.slane %v8691_v12, 4  ;;  %v8982_v57 = vrot.slane %v8692_v7, 9 }
 0x437   : > { %8961 = vst [vmem:[#allocation50_spill] sm:$0xff] %v7369_v45  ;;  %v7389_v60 = vadd.f32 %v8968_v53, %v8967_v23  ;;  %v7399_v31 = vadd.f32 %v8972_v56, %v8691_v12  ;;  %v8975_v45 = vld [vmem:[#allocation54_spill] sm:$0xff]  ;;  %v8980_v23 = vld [vmem:[#allocation12_spill] sm:$0xff] }
 0x438   : > { %8963 = vst [vmem:[#allocation51_spill] sm:$0xff] %v7374_v32  ;;  %v8974_v32 = vrot.slane %v8691_v12, 2  ;;  %v7409_v53 = vadd.f32 %v8978_v24, %v8977_v37  ;;  %v7414_v33 = vadd.f32 %v8980_v23, %v8979_v15  ;;  %v7419_v56 = vadd.f32 %v8982_v57, %v8692_v7  ;;  %v8991_v37 = vld [vmem:[#allocation13_spill] sm:$0xff] }
 0x439   : > { %8971 = vst [vmem:[#allocation52_spill] sm:$0xff] %v7394_v11  ;;  %v8985_v11 = vld [vmem:[#allocation30_spill] sm:$0xff]  ;;  %v8990_v12 = vrot.slane %v8692_v7, 6  ;;  %v8993_v23 = vrot.slane %v8693_v2, 9 }
 0x43a   : > { %8973 = vst [vmem:[#allocation53_spill] sm:$0xff] %v7399_v31  ;;  %v7404_v0 = vadd.f32 %v8975_v45, %v8974_v32  ;;  %v8984_v31 = vrot.slane %v8692_v7, 2  ;;  %v8987_v32 = vrot.slane %v8692_v7, 4  ;;  %v9001_v7 = vrot.slane %v8693_v2, 6 }
 0x43b   : > { %8981 = vst [vmem:[#allocation54_spill] sm:$0xff] %v7414_v33  ;;  %v7434_v15 = vadd.f32 %v8991_v37, %v8990_v12  ;;  %v7439_v57 = vadd.f32 %v8993_v23, %v8693_v2  ;;  %v8996_v33 = vld [vmem:[#allocation34_spill] sm:$0xff]  ;;  %v9004_v37 = vrot.slane %v8694_v22, 9 }
 0x43c   : > { %8976 = vst [vmem:[#allocation55_spill] sm:$0xff] %v7404_v0  ;;  %v7424_v45 = vadd.f32 %v8985_v11, %v8984_v31  ;;  %v8988_v0 = vld [vmem:[#allocation18_spill] sm:$0xff]  ;;  %v8998_v31 = vrot.slane %v8693_v2, 4 }
 0x43d   : > { %8983 = vst [vmem:[#allocation56_spill] sm:$0xff] %v7419_v56  ;;  %v7429_v24 = vadd.f32 %v8988_v0, %v8987_v32  ;;  %v8995_v56 = vrot.slane %v8693_v2, 2  ;;  %v9002_v32 = vld [vmem:[#allocation16_spill] sm:$0xff]  ;;  %v7459_v23 = vadd.f32 %v9004_v37, %v8694_v22  ;;  %v9009_v2 = vrot.slane %v8694_v22, 6 }
 0x43e   : > { %8986 = vst [vmem:[#allocation12_spill] sm:$0xff] %v7424_v45  ;;  %v8999_v45 = vld [vmem:[#allocation21_spill] sm:$0xff]  ;;  %v7454_v12 = vadd.f32 %v9002_v32, %v9001_v7  ;;  %v9012_v32 = vrot.slane %v8695_v8, 9 }
 0x43f   : > { %8989 = vst [vmem:[#allocation30_spill] sm:$0xff] %v7429_v24  ;;  %v7444_v11 = vadd.f32 %v8996_v33, %v8995_v56  ;;  %v7449_v0 = vadd.f32 %v8999_v45, %v8998_v31  ;;  %v9007_v56 = vrot.slane %v8694_v22, 4  ;;  %v9010_v31 = vld [vmem:[#allocation19_spill] sm:$0xff]  ;;  %v9018_v24 = vld [vmem:[#allocation28_spill] sm:$0xff] }
 0x440   : > { %8992 = vst [vmem:[#allocation18_spill] sm:$0xff] %v7434_v15  ;;  %v9006_v15 = vld [vmem:[#allocation37_spill] sm:$0xff]  ;;  %v7474_v7 = vadd.f32 %v9010_v31, %v9009_v2  ;;  %v7479_v37 = vadd.f32 %v9012_v32, %v8695_v8  ;;  %v9022_v31 = vrot.slane %v8696_v48, 9 }
 0x441   : > { %8994 = vst [vmem:[#allocation13_spill] sm:$0xff] %v7439_v57  ;;  %v9005_v57 = vrot.slane %v8694_v22, 2  ;;  %v9019_v22 = vrot.slane %v8695_v8, 6 }
 0x442   : > { %8997 = vst [vmem:[#allocation34_spill] sm:$0xff] %v7444_v11  ;;  %v9008_v11 = vld [vmem:[#allocation24_spill] sm:$0xff]  ;;  %v7499_v32 = vadd.f32 %v9022_v31, %v8696_v48 }
 0x443   : > { %9000 = vst [vmem:[#allocation21_spill] sm:$0xff] %v7449_v0  ;;  %v7464_v33 = vadd.f32 %v9006_v15, %v9005_v57  ;;  %v7469_v45 = vadd.f32 %v9008_v11, %v9007_v56  ;;  %v9015_v0 = vld [vmem:[#allocation14_spill] sm:$0xff]  ;;  %v9017_v57 = vrot.slane %v8695_v8, 4 }
 0x444   : > { %9003 = vst [vmem:[#allocation16_spill] sm:$0xff] %v7454_v12  ;;  %v9014_v12 = vrot.slane %v8695_v8, 2  ;;  %v9020_v56 = vld [vmem:[#allocation22_spill] sm:$0xff]  ;;  %v9030_v8 = vrot.slane %v8696_v48, 6 }
 0x445   : > { %9011 = vst [vmem:[#allocation37_spill] sm:$0xff] %v7474_v7  ;;  %v7489_v11 = vadd.f32 %v9018_v24, %v9017_v57  ;;  %v7494_v2 = vadd.f32 %v9020_v56, %v9019_v22  ;;  %v9025_v7 = vld [vmem:[#allocation17_spill] sm:$0xff]  ;;  %v9033_v56 = vrot.slane %v8697_v35, 9 }
 0x446   : > { %9013 = vst [vmem:[#allocation24_spill] sm:$0xff] %v7479_v37  ;;  %v7484_v15 = vadd.f32 %v9015_v0, %v9014_v12  ;;  %v9024_v37 = vrot.slane %v8696_v48, 2  ;;  %v9027_v12 = vrot.slane %v8696_v48, 4  ;;  %v9031_v57 = vld [vmem:[#allocation25_spill] sm:$0xff]  ;;  %v9041_v48 = vrot.slane %v8697_v35, 6 }
 0x447   : > { %9021 = vst [vmem:[#allocation14_spill] sm:$0xff] %v7494_v2  ;;  %v7514_v22 = vadd.f32 %v9031_v57, %v9030_v8  ;;  %v7519_v31 = vadd.f32 %v9033_v56, %v8697_v35  ;;  %v9036_v2 = vld [vmem:[#allocation20_spill] sm:$0xff]  ;;  %v9044_v57 = vrot.slane %v8698_v17, 9 }
 0x448   : > { %9016 = vst [vmem:[#allocation19_spill] sm:$0xff] %v7484_v15  ;;  %v7504_v0 = vadd.f32 %v9025_v7, %v9024_v37  ;;  %v9028_v15 = vld [vmem:[#allocation32_spill] sm:$0xff]  ;;  %v9038_v37 = vrot.slane %v8697_v35, 4 }
 0x449   : > { %9023 = vst [vmem:[#allocation28_spill] sm:$0xff] %v7499_v32  ;;  %v7509_v24 = vadd.f32 %v9028_v15, %v9027_v12  ;;  %v9035_v32 = vrot.slane %v8697_v35, 2  ;;  %v9042_v12 = vld [vmem:[#allocation29_spill] sm:$0xff]  ;;  %v7539_v56 = vadd.f32 %v9044_v57, %v8698_v17  ;;  %v9049_v35 = vrot.slane %v8698_v17, 6 }
 0x44a   : > { %9026 = vst [vmem:[#allocation22_spill] sm:$0xff] %v7504_v0  ;;  %v9039_v0 = vld [vmem:[#allocation36_spill] sm:$0xff]  ;;  %v7534_v8 = vadd.f32 %v9042_v12, %v9041_v48  ;;  %v9052_v12 = vrot.slane %v8699_v47, 9 }
 0x44b   : > { %9029 = vst [vmem:[#allocation17_spill] sm:$0xff] %v7509_v24  ;;  %v7524_v7 = vadd.f32 %v9036_v2, %v9035_v32  ;;  %v7529_v15 = vadd.f32 %v9039_v0, %v9038_v37  ;;  %v9047_v32 = vrot.slane %v8698_v17, 4  ;;  %v9050_v37 = vld [vmem:[#allocation59_spill] sm:$0xff]  ;;  %v9058_v24 = vld [vmem:[#allocation61_spill] sm:$0xff] }
 0x44c   : > { %9032 = vst [vmem:[#allocation32_spill] sm:$0xff] %v7514_v22  ;;  %v9046_v22 = vld [vmem:[#allocation57_spill] sm:$0xff]  ;;  %v7554_v48 = vadd.f32 %v9050_v37, %v9049_v35  ;;  %v7559_v57 = vadd.f32 %v9052_v12, %v8699_v47  ;;  %v9062_v37 = vrot.slane %v8700_v4, 9 }
 0x44d   : > { %9034 = vst [vmem:[#allocation25_spill] sm:$0xff] %v7519_v31  ;;  %v9045_v31 = vrot.slane %v8698_v17, 2  ;;  %v9059_v17 = vrot.slane %v8699_v47, 6 }
 0x44e   : > { %9037 = vst [vmem:[#allocation20_spill] sm:$0xff] %v7524_v7  ;;  %v9048_v7 = vld [vmem:[#allocation58_spill] sm:$0xff]  ;;  %v7579_v12 = vadd.f32 %v9062_v37, %v8700_v4 }
 0x44f   : > { %9040 = vst [vmem:[#allocation36_spill] sm:$0xff] %v7529_v15  ;;  %v7544_v2 = vadd.f32 %v9046_v22, %v9045_v31  ;;  %v7549_v0 = vadd.f32 %v9048_v7, %v9047_v32  ;;  %v9055_v15 = vld [vmem:[#allocation60_spill] sm:$0xff]  ;;  %v9057_v31 = vrot.slane %v8699_v47, 4  ;;  %v9060_v32 = vld [vmem:[#allocation62_spill] sm:$0xff] }
 0x450   : > { %9043 = vst [vmem:[#allocation29_spill] sm:$0xff] %v7534_v8  ;;  %v9054_v8 = vrot.slane %v8699_v47, 2  ;;  %v7574_v35 = vadd.f32 %v9060_v32, %v9059_v17  ;;  %v9070_v47 = vrot.slane %v8700_v4, 6  ;;  %v9073_v32 = vrot.slane %v8701_v13, 9 }
 0x451   : > { %9051 = vst [vmem:[#allocation57_spill] sm:$0xff] %v7554_v48  ;;  %v7569_v7 = vadd.f32 %v9058_v24, %v9057_v31  ;;  %v9065_v48 = vld [vmem:[#allocation63_spill] sm:$0xff]  ;;  %v9071_v31 = vld [vmem:[#allocation65_spill] sm:$0xff] }
 0x452   : > { %9053 = vst [vmem:[#allocation58_spill] sm:$0xff] %v7559_v57  ;;  %v7564_v22 = vadd.f32 %v9055_v15, %v9054_v8  ;;  %v9064_v57 = vrot.slane %v8700_v4, 2  ;;  %v9067_v8 = vrot.slane %v8700_v4, 4  ;;  %v7594_v17 = vadd.f32 %v9071_v31, %v9070_v47 }
 0x453   : > { %9061 = vst [vmem:[#allocation60_spill] sm:$0xff] %v7574_v35  ;;  %v7599_v37 = vadd.f32 %v9073_v32, %v8701_v13  ;;  %v9076_v35 = vld [vmem:[#allocation66_spill] sm:$0xff]  ;;  %v9081_v4 = vrot.slane %v8701_v13, 6  ;;  %v9084_v31 = vrot.slane %v8702_v36, 9 }
 0x454   : > { %9056 = vst [vmem:[#allocation59_spill] sm:$0xff] %v7564_v22  ;;  %v7584_v15 = vadd.f32 %v9065_v48, %v9064_v57  ;;  %v9068_v22 = vld [vmem:[#allocation64_spill] sm:$0xff]  ;;  %v9078_v57 = vrot.slane %v8701_v13, 4 }
 0x455   : > { %9063 = vst [vmem:[#allocation61_spill] sm:$0xff] %v7579_v12  ;;  %v7589_v24 = vadd.f32 %v9068_v22, %v9067_v8  ;;  %v9075_v12 = vrot.slane %v8701_v13, 2  ;;  %v9082_v8 = vld [vmem:[#allocation68_spill] sm:$0xff]  ;;  %v7619_v32 = vadd.f32 %v9084_v31, %v8702_v36  ;;  %v9089_v13 = vrot.slane %v8702_v36, 6 }
 0x456   : > { %9066 = vst [vmem:[#allocation62_spill] sm:$0xff] %v7584_v15  ;;  %v9079_v15 = vld [vmem:[#allocation67_spill] sm:$0xff]  ;;  %v7614_v47 = vadd.f32 %v9082_v8, %v9081_v4  ;;  %v9092_v8 = vrot.slane %v8703_v58, 9 }
 0x457   : > { %9069 = vst [vmem:[#allocation63_spill] sm:$0xff] %v7589_v24  ;;  %v7604_v48 = vadd.f32 %v9076_v35, %v9075_v12  ;;  %v7609_v22 = vadd.f32 %v9079_v15, %v9078_v57  ;;  %v9087_v12 = vrot.slane %v8702_v36, 4  ;;  %v9090_v57 = vld [vmem:[#allocation71_spill] sm:$0xff]  ;;  %v9098_v24 = vld [vmem:[#allocation73_spill] sm:$0xff] }
 0x458   : > { %9072 = vst [vmem:[#allocation64_spill] sm:$0xff] %v7594_v17  ;;  %v9086_v17 = vld [vmem:[#allocation69_spill] sm:$0xff]  ;;  %v7634_v4 = vadd.f32 %v9090_v57, %v9089_v13  ;;  %v7639_v31 = vadd.f32 %v9092_v8, %v8703_v58  ;;  %v9102_v57 = vrot.slane %v8704_v49, 9 }
 0x459   : > { %9074 = vst [vmem:[#allocation65_spill] sm:$0xff] %v7599_v37  ;;  %v9085_v37 = vrot.slane %v8702_v36, 2  ;;  %v9099_v36 = vrot.slane %v8703_v58, 6 }
 0x45a   : > { %9077 = vst [vmem:[#allocation66_spill] sm:$0xff] %v7604_v48  ;;  %v9088_v48 = vld [vmem:[#allocation70_spill] sm:$0xff]  ;;  %v7659_v8 = vadd.f32 %v9102_v57, %v8704_v49 }
 0x45b   : > { %9080 = vst [vmem:[#allocation67_spill] sm:$0xff] %v7609_v22  ;;  %v7624_v35 = vadd.f32 %v9086_v17, %v9085_v37  ;;  %v7629_v15 = vadd.f32 %v9088_v48, %v9087_v12  ;;  %v9095_v22 = vld [vmem:[#allocation72_spill] sm:$0xff]  ;;  %v9097_v37 = vrot.slane %v8703_v58, 4  ;;  %v9100_v12 = vld [vmem:[#allocation74_spill] sm:$0xff] }
 0x45c   : > { %9083 = vst [vmem:[#allocation68_spill] sm:$0xff] %v7614_v47  ;;  %v9094_v47 = vrot.slane %v8703_v58, 2  ;;  %v7654_v13 = vadd.f32 %v9100_v12, %v9099_v36  ;;  %v9109_v58 = vrot.slane %v8704_v49, 6  ;;  %v9112_v12 = vrot.slane %v8705_v5, 9 }
 0x45d   : > { %9091 = vst [vmem:[#allocation69_spill] sm:$0xff] %v7634_v4  ;;  %v7649_v48 = vadd.f32 %v9098_v24, %v9097_v37  ;;  %v9105_v4 = vld [vmem:[#allocation75_spill] sm:$0xff]  ;;  %v9110_v37 = vld [vmem:[#allocation77_spill] sm:$0xff] }
 0x45e   : > { %9093 = vst [vmem:[#allocation70_spill] sm:$0xff] %v7639_v31  ;;  %v7644_v17 = vadd.f32 %v9095_v22, %v9094_v47  ;;  %v9104_v31 = vrot.slane %v8704_v49, 2  ;;  %v9107_v47 = vrot.slane %v8704_v49, 4  ;;  %v7674_v36 = vadd.f32 %v9110_v37, %v9109_v58 }
 0x45f   : > { %9101 = vst [vmem:[#allocation72_spill] sm:$0xff] %v7654_v13  ;;  %v7679_v57 = vadd.f32 %v9112_v12, %v8705_v5  ;;  %v9115_v13 = vld [vmem:[#allocation78_spill] sm:$0xff]  ;;  %v9120_v49 = vrot.slane %v8705_v5, 6  ;;  %v9123_v37 = vrot.slane %v8706_v16, 9 }
 0x460   : > { %9096 = vst [vmem:[#allocation71_spill] sm:$0xff] %v7644_v17  ;;  %v7664_v22 = vadd.f32 %v9105_v4, %v9104_v31  ;;  %v9108_v17 = vld [vmem:[#allocation76_spill] sm:$0xff]  ;;  %v9117_v31 = vrot.slane %v8705_v5, 4 }
 0x461   : > { %9103 = vst [vmem:[#allocation73_spill] sm:$0xff] %v7659_v8  ;;  %v7669_v24 = vadd.f32 %v9108_v17, %v9107_v47  ;;  %v9114_v8 = vrot.slane %v8705_v5, 2  ;;  %v9121_v47 = vld [vmem:[#allocation80_spill] sm:$0xff]  ;;  %v7699_v12 = vadd.f32 %v9123_v37, %v8706_v16  ;;  %v9128_v5 = vrot.slane %v8706_v16, 6 }
 0x462   : > { %9106 = vst [vmem:[#allocation74_spill] sm:$0xff] %v7664_v22  ;;  %v9118_v22 = vld [vmem:[#allocation79_spill] sm:$0xff]  ;;  %v7694_v58 = vadd.f32 %v9121_v47, %v9120_v49  ;;  %v9129_v49 = vrot.slane %v8707_v28, 9  ;;  %v9130_v37 = vrot.slane %v8707_v28, 2 }
 0x463   : > { %9111 = vst [vmem:[#allocation75_spill] sm:$0xff] %v7674_v36  ;;  %v7684_v4 = vadd.f32 %v9115_v13, %v9114_v8  ;;  %v7689_v17 = vadd.f32 %v9118_v22, %v9117_v31  ;;  %v9125_v36 = vld [vmem:[#allocation81_spill] sm:$0xff]  ;;  %v9126_v8 = vrot.slane %v8706_v16, 4  ;;  %v7714_v31 = vadd.f32 %v7081_v9, %v9128_v5 }
 0x464   : > { %9113 = vst [vmem:[#allocation76_spill] sm:$0xff] %v7679_v57  ;;  %v9124_v57 = vrot.slane %v8706_v16, 2  ;;  %v7719_v47 = vadd.f32 %v9129_v49, %v8707_v28  ;;  %v9133_v16 = vrot.slane %v8707_v28, 6  ;;  %v9135_v5 = vld [vmem:[#allocation85_spill] sm:$0xff]  ;;  %v7742_v49 = vadd.f32 %v7144_v29, %v7104_v55  ;;  %v9136_v29 = vld [vmem:[#allocation23_spill] sm:$0xff] }
 0x465   : > { %9116 = vst [vmem:[#allocation77_spill] sm:$0xff] %v7684_v4  ;;  %v9127_v4 = vld [vmem:[#allocation82_spill] sm:$0xff]  ;;  %v7762_v55 = vadd.f32 %v7169_v1, %v7129_v44  ;;  %v7782_v44 = vadd.f32 %v9136_v29, %v7194_v54  ;;  %v9149_v29 = vld [vmem:[#allocation15_spill] sm:$0xff] }
 0x466   : > { %9119 = vst [vmem:[#allocation78_spill] sm:$0xff] %v7689_v17  ;;  %v7704_v13 = vadd.f32 %v9125_v36, %v9124_v57  ;;  %v7709_v22 = vadd.f32 %v9127_v4, %v9126_v8  ;;  %v9132_v57 = vrot.slane %v8707_v28, 4  ;;  %v9134_v8 = vld [vmem:[#allocation84_spill] sm:$0xff]  ;;  %v7738_v17 = vadd.f32 %v7139_v10, %v9135_v5 }
 0x467   : > { %9122 = vst [vmem:[#allocation79_spill] sm:$0xff] %v7694_v58  ;;  %v9131_v58 = vld [vmem:[#allocation83_spill] sm:$0xff]  ;;  %v7734_v9 = vadd.f32 %v9134_v8, %v9133_v16  ;;  %v7754_v28 = vadd.f32 %v7159_v19, %v7119_v52  ;;  %v7758_v10 = vadd.f32 %v7164_v59, %v7124_v50  ;;  %v7774_v52 = vadd.f32 %v7224_v14, %v7184_v27  ;;  %v9140_v59 = vld [vmem:[#allocation33_spill] sm:$0xff]  ;;  %v9147_v16 = vld [vmem:[#allocation38_spill] sm:$0xff] }
 0x468   : > { %v7724_v36 = vadd.f32 %v9131_v58, %v9130_v37  ;;  %v7729_v4 = vadd.f32 %v7090_v34, %v9132_v57  ;;  %v7746_v58 = vadd.f32 %v7149_v25, %v7109_v41  ;;  %v7750_v34 = vadd.f32 %v7154_v30, %v7114_v51  ;;  %v9137_v25 = vld [vmem:[#allocation86_spill] sm:$0xff]  ;;  %v9138_v30 = vld [vmem:[#allocation39_spill] sm:$0xff]  ;;  %v9148_v5 = vld [vmem:[#allocation40_spill] sm:$0xff] }
 0x469   : > { %v7766_v41 = vadd.f32 %v7174_v21, %v7134_v3  ;;  %v7770_v51 = vadd.f32 %v7219_v42, %v7179_v6  ;;  %v7778_v50 = vadd.f32 %v7229_v18, %v7189_v43  ;;  %v7786_v3 = vadd.f32 %v9138_v30, %v9137_v25  ;;  %v9139_v19 = vld [vmem:[#allocation87_spill] sm:$0xff]  ;;  %v9141_v21 = vld [vmem:[#allocation88_spill] sm:$0xff]  ;;  %v9143_v42 = vld [vmem:[#allocation89_spill] sm:$0xff] }
 0x46a   : > { %v7790_v1 = vadd.f32 %v9140_v59, %v9139_v19  ;;  %v9142_v6 = vld [vmem:[#allocation27_spill] sm:$0xff]  ;;  %v9145_v18 = vld [vmem:[#allocation90_spill] sm:$0xff]  ;;  %v7810_v8 = vadd.f32 %v7309_v20, %v9147_v16  ;;  %v7814_v25 = vadd.f32 %v9149_v29, %v9148_v5  ;;  %v9151_v19 = vld [vmem:[#allocation45_spill] sm:$0xff]  ;;  %v7838_v16 = vadd.f32 %v7384_v63, %v7344_v38 }
 0x46b   : > { %v7794_v27 = vadd.f32 %v9142_v6, %v9141_v21  ;;  %v9144_v14 = vld [vmem:[#allocation31_spill] sm:$0xff]  ;;  %v7802_v54 = vadd.f32 %v7299_v62, %v9145_v18  ;;  %v9150_v30 = vld [vmem:[#allocation26_spill] sm:$0xff]  ;;  %v9152_v21 = vld [vmem:[#allocation41_spill] sm:$0xff]  ;;  %v7842_v5 = vadd.f32 %v7389_v60, %v7349_v61 }
 0x46c   : > { %v7798_v43 = vadd.f32 %v9144_v14, %v9143_v42  ;;  %v9146_v37 = vld [vmem:[#allocation35_spill] sm:$0xff]  ;;  %v7818_v59 = vadd.f32 %v9151_v19, %v9150_v30  ;;  %v9153_v6 = vld [vmem:[#allocation44_spill] sm:$0xff]  ;;  %v9154_v42 = vld [vmem:[#allocation42_spill] sm:$0xff] }
 0x46d   : > { %v7806_v57 = vadd.f32 %v7304_v39, %v9146_v37  ;;  %v7822_v62 = vadd.f32 %v9153_v6, %v9152_v21  ;;  %v7826_v39 = vadd.f32 %v7329_v26, %v9154_v42  ;;  %v9155_v14 = vld [vmem:[#allocation43_spill] sm:$0xff]  ;;  %v9157_v29 = vld [vmem:[#allocation46_spill] sm:$0xff]  ;;  %v9158_v30 = vld [vmem:[#allocation52_spill] sm:$0xff] }
 0x46e   : > { %v7830_v20 = vadd.f32 %v7334_v40, %v9155_v14  ;;  %v9156_v18 = vld [vmem:[#allocation47_spill] sm:$0xff]  ;;  %v7846_v26 = vadd.f32 %v9158_v30, %v9157_v29  ;;  %v9159_v19 = vld [vmem:[#allocation48_spill] sm:$0xff]  ;;  %v9160_v21 = vld [vmem:[#allocation53_spill] sm:$0xff] }
 0x46f   : > { %v7834_v37 = vadd.f32 %v7379_v46, %v9156_v18  ;;  %v7850_v40 = vadd.f32 %v9160_v21, %v9159_v19  ;;  %v9161_v6 = vld [vmem:[#allocation49_spill] sm:$0xff]  ;;  %v9162_v42 = vld [vmem:[#allocation55_spill] sm:$0xff]  ;;  %v9164_v14 = vld [vmem:[#allocation50_spill] sm:$0xff] }
 0x470   : > { %v7854_v46 = vadd.f32 %v9162_v42, %v9161_v6  ;;  %v7858_v38 = vadd.f32 %v7409_v53, %v9164_v14  ;;  %v9166_v63 = vld [vmem:[#allocation51_spill] sm:$0xff]  ;;  %v9167_v18 = vld [vmem:[#allocation54_spill] sm:$0xff]  ;;  %v9169_v60 = vld [vmem:[#allocation56_spill] sm:$0xff] }
 0x471   : > { %v7862_v61 = vadd.f32 %v9167_v18, %v9166_v63  ;;  %v7866_v29 = vadd.f32 %v7459_v23, %v9169_v60  ;;  %v9170_v30 = vld [vmem:[#allocation12_spill] sm:$0xff]  ;;  %v9172_v21 = vld [vmem:[#allocation30_spill] sm:$0xff]  ;;  %v9175_v14 = vld [vmem:[#allocation13_spill] sm:$0xff] }
 0x472   : > { %9163 = vst [vmem:[#allocation80_spill] sm:$0xff] %v7854_v46  ;;  %v7870_v19 = vadd.f32 %v7464_v33, %v9170_v30  ;;  %v7874_v6 = vadd.f32 %v7469_v45, %v9172_v21  ;;  %v9173_v42 = vld [vmem:[#allocation18_spill] sm:$0xff]  ;;  %v9174_v46 = vld [vmem:[#allocation37_spill] sm:$0xff]  ;;  %v9182_v30 = vld [vmem:[#allocation16_spill] sm:$0xff] }
 0x473   : > { %9165 = vst [vmem:[#allocation81_spill] sm:$0xff] %v7858_v38  ;;  %v7878_v53 = vadd.f32 %v9174_v46, %v9173_v42  ;;  %v9176_v38 = vld [vmem:[#allocation24_spill] sm:$0xff]  ;;  %v9177_v18 = vld [vmem:[#allocation34_spill] sm:$0xff]  ;;  %v9180_v60 = vld [vmem:[#allocation21_spill] sm:$0xff] }
 0x474   : > { %9168 = vst [vmem:[#allocation82_spill] sm:$0xff] %v7862_v61  ;;  %v7882_v63 = vadd.f32 %v9176_v38, %v9175_v14  ;;  %v9178_v61 = vld [vmem:[#allocation19_spill] sm:$0xff]  ;;  %v7890_v33 = vadd.f32 %v7489_v11, %v9180_v60  ;;  %v9185_v21 = vld [vmem:[#allocation28_spill] sm:$0xff]  ;;  %v9186_v42 = vld [vmem:[#allocation22_spill] sm:$0xff] }
 0x475   : > { %9171 = vst [vmem:[#allocation83_spill] sm:$0xff] %v7870_v19  ;;  %v7886_v23 = vadd.f32 %v9178_v61, %v9177_v18  ;;  %v9183_v19 = vld [vmem:[#allocation14_spill] sm:$0xff]  ;;  %v7898_v46 = vadd.f32 %v7539_v56, %v9185_v21  ;;  %v7902_v38 = vadd.f32 %v7544_v2, %v9186_v42  ;;  %v9188_v14 = vld [vmem:[#allocation17_spill] sm:$0xff]  ;;  %v9189_v18 = vld [vmem:[#allocation32_spill] sm:$0xff] }
 0x476   : > { %9181 = vst [vmem:[#allocation85_spill] sm:$0xff] %v7890_v33  ;;  %v7894_v45 = vadd.f32 %v9183_v19, %v9182_v30  ;;  %v7906_v61 = vadd.f32 %v7549_v0, %v9188_v14  ;;  %v9191_v60 = vld [vmem:[#allocation25_spill] sm:$0xff]  ;;  %v9192_v33 = vld [vmem:[#allocation58_spill] sm:$0xff]  ;;  %v9193_v30 = vld [vmem:[#allocation20_spill] sm:$0xff] }
 0x477   : > { %9179 = vst [vmem:[#allocation84_spill] sm:$0xff] %v7886_v23  ;;  %v9190_v23 = vld [vmem:[#allocation57_spill] sm:$0xff]  ;;  %v7914_v19 = vadd.f32 %v9192_v33, %v9191_v60  ;;  %v9196_v21 = vld [vmem:[#allocation36_spill] sm:$0xff]  ;;  %v9204_v60 = vld [vmem:[#allocation63_spill] sm:$0xff] }
 0x478   : > { %9184 = vst [vmem:[#allocation23_spill] sm:$0xff] %v7894_v45  ;;  %v7910_v11 = vadd.f32 %v9190_v23, %v9189_v18  ;;  %v9194_v45 = vld [vmem:[#allocation59_spill] sm:$0xff]  ;;  %v7922_v2 = vadd.f32 %v7569_v7, %v9196_v21  ;;  %v9198_v42 = vld [vmem:[#allocation29_spill] sm:$0xff]  ;;  %v9202_v18 = vld [vmem:[#allocation62_spill] sm:$0xff] }
 0x479   : > { %9187 = vst [vmem:[#allocation86_spill] sm:$0xff] %v7902_v38  ;;  %v7918_v56 = vadd.f32 %v9194_v45, %v9193_v30  ;;  %v9199_v38 = vld [vmem:[#allocation60_spill] sm:$0xff]  ;;  %v9201_v14 = vld [vmem:[#allocation61_spill] sm:$0xff]  ;;  %v7934_v33 = vadd.f32 %v7624_v35, %v9202_v18  ;;  %v7938_v45 = vadd.f32 %v7629_v15, %v9204_v60 }
 0x47a   : > { %9197 = vst [vmem:[#allocation87_spill] sm:$0xff] %v7922_v2  ;;  %v7926_v0 = vadd.f32 %v9199_v38, %v9198_v42  ;;  %v7930_v23 = vadd.f32 %v7619_v32, %v9201_v14  ;;  %v9205_v30 = vld [vmem:[#allocation64_spill] sm:$0xff]  ;;  %v9207_v21 = vld [vmem:[#allocation65_spill] sm:$0xff]  ;;  %v9208_v2 = vld [vmem:[#allocation70_spill] sm:$0xff] }
 0x47b   : > { %9195 = vst [vmem:[#allocation39_spill] sm:$0xff] %v7918_v56  ;;  %v9206_v56 = vld [vmem:[#allocation69_spill] sm:$0xff]  ;;  %v7946_v38 = vadd.f32 %v9208_v2, %v9207_v21  ;;  %v9209_v42 = vld [vmem:[#allocation66_spill] sm:$0xff]  ;;  %v9211_v14 = vld [vmem:[#allocation67_spill] sm:$0xff] }
 0x47c   : > { %9200 = vst [vmem:[#allocation33_spill] sm:$0xff] %v7926_v0  ;;  %v7942_v7 = vadd.f32 %v9206_v56, %v9205_v30  ;;  %v9210_v0 = vld [vmem:[#allocation71_spill] sm:$0xff]  ;;  %v7954_v35 = vadd.f32 %v7649_v48, %v9211_v14  ;;  %v9212_v18 = vld [vmem:[#allocation68_spill] sm:$0xff]  ;;  %v9214_v60 = vld [vmem:[#allocation73_spill] sm:$0xff] }
 0x47d   : > { %9203 = vst [vmem:[#allocation88_spill] sm:$0xff] %v7934_v33  ;;  %v7950_v32 = vadd.f32 %v9210_v0, %v9209_v42  ;;  %v9213_v33 = vld [vmem:[#allocation72_spill] sm:$0xff]  ;;  %v7962_v56 = vadd.f32 %v7699_v12, %v9214_v60  ;;  %v9215_v30 = vld [vmem:[#allocation74_spill] sm:$0xff]  ;;  %v7970_v0 = vadd.f32 %v7709_v22, %v7669_v24  ;;  %v9216_v21 = vld [vmem:[#allocation75_spill] sm:$0xff]  ;;  %v7993_v22 = vmul.f32 0.25, %v7738_v17 }
 0x47e   : > { %v7958_v15 = vadd.f32 %v9213_v33, %v9212_v18  ;;  %v7966_v2 = vadd.f32 %v7704_v13, %v9215_v30  ;;  %v7974_v48 = vadd.f32 %v7714_v31, %v9216_v21  ;;  %v9217_v42 = vld [vmem:[#allocation76_spill] sm:$0xff]  ;;  %v9218_v14 = vld [vmem:[#allocation77_spill] sm:$0xff]  ;;  %v9219_v18 = vld [vmem:[#allocation78_spill] sm:$0xff]  ;;  %v7996_v31 = vmul.f32 0.25, %v7742_v49 }
 0x47f   : > { %v7978_v33 = vadd.f32 %v7719_v47, %v9217_v42  ;;  %v7982_v12 = vadd.f32 %v7724_v36, %v9218_v14  ;;  %v7986_v13 = vadd.f32 %v7729_v4, %v9219_v18  ;;  %v9220_v60 = vld [vmem:[#allocation79_spill] sm:$0xff]  ;;  %v7999_v47 = vmul.f32 0.25, %v7746_v58 }
 0x480   : > { %v7990_v24 = vadd.f32 %v7734_v9, %v9220_v60  ;;  %v8002_v36 = vmul.f32 0.25, %v7750_v34  ;;  %v8005_v30 = vmul.f32 0.25, %v7754_v28  ;;  %v8008_v4 = vmul.f32 0.25, %v7758_v10 }
 0x481   : > { %v8011_v9 = vmul.f32 0.25, %v7762_v55  ;;  %v8014_v17 = vmul.f32 0.25, %v7766_v41  ;;  %v8017_v49 = vmul.f32 0.25, %v7770_v51  ;;  %v8020_v58 = vmul.f32 0.25, %v7774_v52 }
 0x482   : > { %v8023_v34 = vmul.f32 0.25, %v7778_v50  ;;  %v8026_v28 = vmul.f32 0.25, %v7782_v44  ;;  %v8029_v10 = vmul.f32 0.25, %v7786_v3  ;;  %v8032_v55 = vmul.f32 0.25, %v7790_v1 }
 0x483   : > { %v8035_v41 = vmul.f32 0.25, %v7794_v27  ;;  %v8038_v51 = vmul.f32 0.25, %v7798_v43  ;;  %v8041_v52 = vmul.f32 0.25, %v7802_v54  ;;  %v8044_v50 = vmul.f32 0.25, %v7806_v57 }
 0x484   : > { %v8047_v44 = vmul.f32 0.25, %v7810_v8  ;;  %v8050_v3 = vmul.f32 0.25, %v7814_v25  ;;  %v8053_v1 = vmul.f32 0.25, %v7818_v59  ;;  %v8056_v27 = vmul.f32 0.25, %v7822_v62 }
 0x485   : > { %9221 = vst [vmem:[#allocation27_spill] sm:$0xff] %v8035_v41  ;;  %v8059_v43 = vmul.f32 0.25, %v7826_v39  ;;  %v8062_v54 = vmul.f32 0.25, %v7830_v20  ;;  %v8065_v57 = vmul.f32 0.25, %v7834_v37  ;;  %v8068_v8 = vmul.f32 0.25, %v7838_v16  ;;  %v9226_v39 = vld [vmem:[#allocation80_spill] sm:$0xff] }
 0x486   : > { %9222 = vst [vmem:[#allocation89_spill] sm:$0xff] %v8038_v51  ;;  %v8071_v25 = vmul.f32 0.25, %v7842_v5  ;;  %v8074_v59 = vmul.f32 0.25, %v7846_v26  ;;  %v8077_v62 = vmul.f32 0.25, %v7850_v40  ;;  %v8080_v21 = vmul.f32 0.25, %v9226_v39  ;;  %v9228_v20 = vld [vmem:[#allocation81_spill] sm:$0xff] }
 0x487   : > { %9223 = vst [vmem:[#allocation31_spill] sm:$0xff] %v8056_v27  ;;  %v8083_v42 = vmul.f32 0.25, %v9228_v20  ;;  %v9229_v37 = vld [vmem:[#allocation82_spill] sm:$0xff]  ;;  %v8089_v16 = vmul.f32 0.25, %v7866_v29  ;;  %v9232_v5 = vld [vmem:[#allocation83_spill] sm:$0xff]  ;;  %v8095_v26 = vmul.f32 0.25, %v7874_v6 }
 0x488   : > { %9224 = vst [vmem:[#allocation90_spill] sm:$0xff] %v8059_v43  ;;  %v8086_v14 = vmul.f32 0.25, %v9229_v37  ;;  %v8092_v18 = vmul.f32 0.25, %v9232_v5  ;;  %v8098_v40 = vmul.f32 0.25, %v7878_v53  ;;  %v8101_v60 = vmul.f32 0.25, %v7882_v63  ;;  %v9234_v39 = vld [vmem:[#allocation84_spill] sm:$0xff] }
 0x489   : > { %9225 = vst [vmem:[#allocation35_spill] sm:$0xff] %v8062_v54  ;;  %v8104_v20 = vmul.f32 0.25, %v9234_v39  ;;  %v9235_v37 = vld [vmem:[#allocation85_spill] sm:$0xff]  ;;  %v9237_v29 = vld [vmem:[#allocation23_spill] sm:$0xff]  ;;  %v8113_v5 = vmul.f32 0.25, %v7898_v46  ;;  %v9240_v6 = vld [vmem:[#allocation86_spill] sm:$0xff] }
 0x48a   : > { %9227 = vst [vmem:[#allocation38_spill] sm:$0xff] %v8080_v21  ;;  %v8119_v53 = vmul.f32 0.25, %v7906_v61  ;;  %v8122_v63 = vmul.f32 0.25, %v7910_v11  ;;  %v8125_v39 = vmul.f32 0.25, %v7914_v19  ;;  %v9246_v46 = vld [vmem:[#allocation33_spill] sm:$0xff]  ;;  %v9248_v61 = vld [vmem:[#allocation88_spill] sm:$0xff] }
 0x48b   : > { %9230 = vst [vmem:[#allocation40_spill] sm:$0xff] %v8086_v14  ;;  %v8107_v14 = vmul.f32 0.25, %v9235_v37  ;;  %v9242_v37 = vld [vmem:[#allocation39_spill] sm:$0xff]  ;;  %v8143_v11 = vmul.f32 0.25, %v7938_v45  ;;  %v8146_v19 = vmul.f32 0.25, %v7942_v7  ;;  %v8164_v45 = vmul.f32 0.25, %v7966_v2 }
 0x48c   : > { %9231 = vst [vmem:[#allocation15_spill] sm:$0xff] %v8089_v16  ;;  %v8110_v16 = vmul.f32 0.25, %v9237_v29  ;;  %v9244_v29 = vld [vmem:[#allocation87_spill] sm:$0xff]  ;;  %v8167_v7 = vmul.f32 0.25, %v7970_v0 }
 0x48d   : > { %9233 = vst [vmem:[#allocation26_spill] sm:$0xff] %v8095_v26  ;;  %v8116_v26 = vmul.f32 0.25, %v9240_v6  ;;  %v8137_v6 = vmul.f32 0.25, %v7930_v23  ;;  %v8158_v23 = vmul.f32 0.25, %v7958_v15  ;;  %v8179_v15 = vmul.f32 0.25, %v7986_v13 }
 0x48e   : > { %9236 = vst [vmem:[#allocation45_spill] sm:$0xff] %v8107_v14  ;;  %v8128_v14 = vmul.f32 0.25, %v9242_v37  ;;  %v8149_v37 = vmul.f32 0.25, %v7946_v38  ;;  %v8170_v38 = vmul.f32 0.25, %v7974_v48  ;;  %v4121_v13 = vperm.slane %v8044_v50, 0 }
 0x48f   : > { %9238 = vst [vmem:[#allocation41_spill] sm:$0xff] %v8110_v16  ;;  %v8131_v16 = vmul.f32 0.25, %v9244_v29  ;;  %v8152_v29 = vmul.f32 0.25, %v7950_v32  ;;  %v8173_v32 = vmul.f32 0.25, %v7978_v33  ;;  %v4128_v33 = vperm.slane %v8065_v57, 0 }
 0x490   : > { %9239 = vst [vmem:[#allocation44_spill] sm:$0xff] %v8113_v5  ;;  %v8134_v5 = vmul.f32 0.25, %v9246_v46  ;;  %v8155_v46 = vmul.f32 0.25, %v7954_v35  ;;  %v8176_v35 = vmul.f32 0.25, %v7982_v12  ;;  %v4120_v12 = vperm.slane %v8041_v52, 0 }
 0x491   : > { %9241 = vst [vmem:[#allocation42_spill] sm:$0xff] %v8119_v53  ;;  %v8140_v53 = vmul.f32 0.25, %v9248_v61  ;;  %v8161_v61 = vmul.f32 0.25, %v7962_v56  ;;  %v8182_v56 = vmul.f32 0.25, %v7990_v24  ;;  %v4130_v52 = vperm.slane %v8071_v25, 0 }
 0x492   : > { %9243 = vst [vmem:[#allocation43_spill] sm:$0xff] %v8128_v14  ;;  %v4131_v50 = vperm.slane %v8074_v59, 0  ;;  %v4154_v2 = vperm.slane %v8143_v11, 0  ;;  %v4161_v59 = vperm.slane %v8164_v45, 0  ;;  %v4165_v0 = vperm.slane %v8176_v35, 0 }
 0x493   : > { %9245 = vst [vmem:[#allocation47_spill] sm:$0xff] %v8131_v16  ;;  %v9253_v41 = vld [vmem:[#allocation15_spill] sm:$0xff]  ;;  %v4153_v24 = vperm.slane %v8140_v53, 0  ;;  %v4160_v25 = vperm.slane %v8161_v61, 0  ;;  %v4163_v53 = vperm.slane %v8170_v38, 0  ;;  %v9262_v57 = vperm.slane %v7993_v22, 0 }
 0x494   : > { %9247 = vst [vmem:[#allocation46_spill] sm:$0xff] %v8134_v5  ;;  %v9254_v54 = vld [vmem:[#allocation26_spill] sm:$0xff]  ;;  %v9259_v5 = vmov %v8167_v7  ;;  %v9265_v45 = vperm.slane %v8002_v36, 0  ;;  %v9266_v22 = vperm.slane %v8017_v49, 0 }
 0x495   : > { %9249 = vst [vmem:[#allocation52_spill] sm:$0xff] %v8167_v7  ;;  %v9255_v43 = vld [vmem:[#allocation45_spill] sm:$0xff] }
 0x496   : > { %9250 = vst [vmem:[#allocation48_spill] sm:$0xff] %v8173_v32  ;;  %v4129_v32 = vperm.slane %v8068_v8, 0  ;;  %v9256_v27 = vld [vmem:[#allocation41_spill] sm:$0xff]  ;;  %v9263_v8 = vperm.slane %v7996_v31, 0  ;;  %v9267_v31 = vperm.slane %v8020_v58, 0  ;;  %v9270_v58 = vperm.slane %v8008_v4, 0 }
 0x497   : > { %9251 = vst [vmem:[#allocation53_spill] sm:$0xff] %v8179_v15  ;;  %v4122_v15 = vperm.slane %v8047_v44, 0  ;;  %v4132_v44 = vperm.slane %v8077_v62, 0  ;;  %v9257_v21 = vld [vmem:[#allocation44_spill] sm:$0xff]  ;;  %v4152_v62 = vperm.slane %v8137_v6, 0  ;;  %v4162_v6 = vperm.slane %v9259_v5, 0 }
 0x498   : > { %v9258_v51 = vld [vmem:[#allocation42_spill] sm:$0xff]  ;;  %v4169_v61 = vsel %vm4168_vm11, %v9263_v8, %v9262_v57  ;;  %v9264_v5 = vperm.slane %v7999_v47, 0  ;;  %v4182_v57 = vsel %vm4168_vm11, %v9267_v31, %v9266_v22  ;;  %v4189_v8 = vsel %vm4168_vm11, %v4121_v13, %v4120_v12  ;;  %v9278_v31 = vld [vmem:[#allocation31_spill] sm:$0xff] }
 0x499   : > { %v4196_v48 = vsel %vm4168_vm11, %v4129_v32, %v4128_v33  ;;  %v9268_v47 = vperm.slane %v8005_v30, 0  ;;  %v9271_v12 = vperm.slane %v8026_v28, 0  ;;  %v9272_v30 = vperm.slane %v8050_v3, 0 }
 0x49a   : > { %v4197_v49 = vsel %vm4170_vm12, %v4130_v52, %v4196_v48  ;;  %v9273_v13 = vperm.slane %v8011_v9, 0  ;;  %v9274_v48 = vperm.slane %v8029_v10, 0  ;;  %v9275_v52 = vperm.slane %v8053_v1, 0 }
 0x49b   : > { %v9276_v3 = vperm.slane %v8014_v17, 0  ;;  %v9284_v17 = vld [vmem:[#allocation90_spill] sm:$0xff] }
 0x49d   : > { %v9260_v16 = vld [vmem:[#allocation48_spill] sm:$0xff] }
 0x49e   : > { %v4164_v11 = vperm.slane %v9260_v16, 0  ;;  %v9261_v14 = vld [vmem:[#allocation53_spill] sm:$0xff]  ;;  %v4171_v16 = vsel %vm4170_vm12, %v9264_v5, %v4169_v61  ;;  %v9269_v5 = vperm.slane %v8023_v34, 0  ;;  %v4198_v34 = vsel %vm4172_vm13, %v4131_v50, %v4197_v49 }
 0x49f   : > { %v4166_v7 = vperm.slane %v9261_v14, 0  ;;  %v4173_v38 = vsel %vm4172_vm13, %v9265_v45, %v4171_v16  ;;  %v4190_v16 = vsel %vm4170_vm12, %v4122_v15, %v4189_v8  ;;  %v9277_v50 = vperm.slane %v8032_v55, 0  ;;  %v9280_v8 = vld [vmem:[#allocation38_spill] sm:$0xff] }
 0x4a0   : > { %v4175_v61 = vsel %vm4174_vm14, %v9268_v47, %v4173_v38  ;;  %v4183_v36 = vsel %vm4170_vm12, %v9269_v5, %v4182_v57  ;;  %v4191_v33 = vsel %vm4172_vm13, %v9272_v30, %v4190_v16  ;;  %v4199_v38 = vsel %vm4174_vm14, %v4132_v44, %v4198_v34  ;;  %v9291_v34 = vld [vmem:[#allocation35_spill] sm:$0xff] }
 0x4a1   : > { %v4177_v45 = vsel %vm4176_vm15, %v9270_v58, %v4175_v61  ;;  %v4184_v32 = vsel %vm4172_vm13, %v9271_v12, %v4183_v36  ;;  %v4192_v28 = vsel %vm4174_vm14, %v9275_v52, %v4191_v33  ;;  %v9279_v57 = vperm.slane %v9278_v31, 0  ;;  %v9282_v61 = vld [vmem:[#allocation27_spill] sm:$0xff] }
 0x4a2   : > { %v4179_v15 = vsel %vm4178_vm0, %v9273_v13, %v4177_v45  ;;  %v4185_v4 = vsel %vm4174_vm14, %v9274_v48, %v4184_v32  ;;  %v9281_v47 = vperm.slane %v9280_v8, 0  ;;  %v9283_v5 = vperm.slane %v9282_v61, 0  ;;  %v9289_v32 = vld [vmem:[#allocation89_spill] sm:$0xff] }
 0x4a3   : > { %v4181_v22 = vsel %vm4180_vm1, %v9276_v3, %v4179_v15  ;;  %v4186_v9 = vsel %vm4176_vm15, %v9277_v50, %v4185_v4  ;;  %v4193_v10 = vsel %vm4176_vm15, %v9279_v57, %v4192_v28  ;;  %v9285_v36 = vperm.slane %v9284_v17, 0  ;;  %v9311_v17 = vld [vmem:[#allocation47_spill] sm:$0xff] }
 0x4a4   : > { %v4200_v1 = vsel %vm4176_vm15, %v9281_v47, %v4199_v38  ;;  %v4187_v44 = vsel %vm4178_vm0, %v9283_v5, %v4186_v9  ;;  %v9286_v55 = vperm.slane %v8083_v42, 0  ;;  %v9287_v58 = vperm.slane %v9253_v41, 0  ;;  %4239 = vst.msk [vmem:[%s5076_s12] sm:$0xff] %vm2999_vm9, %v4181_v22  ;;  %v9293_v42 = vld [vmem:[#allocation40_spill] sm:$0xff] }
 0x4a5   : > { %v4194_v16 = vsel %vm4178_vm0, %v9285_v36, %v4193_v10  ;;  %v9288_v45 = vperm.slane %v8092_v18, 0  ;;  %v9290_v30 = vperm.slane %v9289_v32, 0  ;;  %v9292_v13 = vperm.slane %v9291_v34, 0 }
 0x4a6   : > { %v4201_v49 = vsel %vm4178_vm0, %v9286_v55, %v4200_v1  ;;  %v9294_v48 = vperm.slane %v9293_v42, 0  ;;  %v9295_v41 = vperm.slane %v9254_v54, 0  ;;  %v9296_v52 = vperm.slane %v8098_v40, 0 }
 0x4a7   : > { %v4203_v12 = vsel %vm4168_vm11, %v9288_v45, %v9287_v58  ;;  %v4188_v33 = vsel %vm4180_vm1, %v9290_v30, %v4187_v44  ;;  %v4195_v15 = vsel %vm4180_vm1, %v9292_v13, %v4194_v16  ;;  %v9297_v38 = vperm.slane %v9257_v21, 0 }
 0x4a8   : > { %v4202_v4 = vsel %vm4180_vm1, %v9294_v48, %v4201_v49  ;;  %v4204_v18 = vsel %vm4170_vm12, %v9295_v41, %v4203_v12  ;;  %v9298_v3 = vperm.slane %v8116_v26, 0  ;;  %v4217_v50 = vsel %vm4168_vm11, %v4153_v24, %v4152_v62  ;;  %4240 = vst.msk [vmem:[%s5076_s12 + $0x8] sm:$0xff] %vm2999_vm9, %v4188_v33 }
 0x4a9   : > { %v4205_v28 = vsel %vm4172_vm13, %v9296_v52, %v4204_v18  ;;  %v4224_v9 = vsel %vm4168_vm11, %v4161_v59, %v4160_v25  ;;  %v9299_v54 = vperm.slane %v8101_v60, 0  ;;  %v9300_v40 = vperm.slane %v9258_v51, 0  ;;  %4241 = vst.msk [vmem:[%s5076_s12 + $0x10] sm:$0xff] %vm2999_vm9, %v4195_v15 }
 0x4aa   : > { %v4210_v22 = vsel %vm4168_vm11, %v9298_v3, %v9297_v38  ;;  %v4218_v21 = vsel %vm4170_vm12, %v4154_v2, %v4217_v50  ;;  %v4225_v26 = vsel %vm4170_vm12, %v4162_v6, %v4224_v9  ;;  %v9301_v24 = vperm.slane %v8104_v20, 0  ;;  %4242 = vst.msk [vmem:[%s5076_s12 + $0x18] sm:$0xff] %vm2999_vm9, %v4202_v4 }
 0x4ab   : > { %v4206_v31 = vsel %vm4174_vm14, %v9299_v54, %v4205_v28  ;;  %v4211_v57 = vsel %vm4170_vm12, %v9300_v40, %v4210_v22  ;;  %v9302_v59 = vperm.slane %v8122_v63, 0  ;;  %v9303_v62 = vperm.slane %v8146_v19, 0 }
 0x4ac   : > { %v4207_v25 = vsel %vm4176_vm15, %v9301_v24, %v4206_v31  ;;  %v4226_v10 = vsel %vm4172_vm13, %v4163_v53, %v4225_v26  ;;  %v9304_v2 = vperm.slane %v9255_v43, 0  ;;  %v9305_v6 = vperm.slane %v8125_v39, 0  ;;  %v9308_v43 = vld [vmem:[#allocation43_spill] sm:$0xff] }
 0x4ad   : > { %v4212_v60 = vsel %vm4172_vm13, %v9302_v59, %v4211_v57  ;;  %v4219_v51 = vsel %vm4172_vm13, %v9303_v62, %v4218_v21  ;;  %v9306_v8 = vperm.slane %v8149_v37, 0  ;;  %v4227_v47 = vsel %vm4174_vm14, %v4164_v11, %v4226_v10 }
 0x4ae   : > { %v4208_v20 = vsel %vm4178_vm0, %v9304_v2, %v4207_v25  ;;  %v4213_v63 = vsel %vm4174_vm14, %v9305_v6, %v4212_v60  ;;  %v9307_v53 = vperm.slane %v9256_v27, 0  ;;  %v9309_v61 = vperm.slane %v9308_v43, 0 }
 0x4af   : > { %v4220_v19 = vsel %vm4174_vm14, %v9306_v8, %v4219_v51  ;;  %v9310_v39 = vperm.slane %v8152_v29, 0  ;;  %v4228_v37 = vsel %vm4176_vm15, %v4165_v0, %v4227_v47  ;;  %v9312_v36 = vperm.slane %v9311_v17, 0  ;;  %v9314_v29 = vld [vmem:[#allocation46_spill] sm:$0xff] }
 0x4b0   : > { %v4209_v1 = vsel %vm4180_vm1, %v9307_v53, %v4208_v20  ;;  %v4214_v5 = vsel %vm4176_vm15, %v9309_v61, %v4213_v63  ;;  %v9313_v27 = vperm.slane %v8155_v46, 0  ;;  %v4229_v55 = vsel %vm4178_vm0, %v4166_v7, %v4228_v37 }
 0x4b1   : > { %v4221_v44 = vsel %vm4176_vm15, %v9310_v39, %v4220_v19  ;;  %v4215_v11 = vsel %vm4178_vm0, %v9312_v36, %v4214_v5  ;;  %4243 = vst.msk [vmem:[%s5076_s12 + $0x20] sm:$0xff] %vm2999_vm9, %v4209_v1  ;;  %v9315_v49 = vperm.slane %v9314_v29, 0  ;;  %v9316_v0 = vperm.slane %v8158_v23, 0 }
 0x4b2   : > { %v4222_v16 = vsel %vm4178_vm0, %v9313_v27, %v4221_v44  ;;  %v9317_v45 = vperm.slane %v8182_v56, 0  ;;  %4250 = sbr.rel (%p4821_p12) target bundleno = 1241 (0x4d9), region = 48 }
 0x4b3   : > { %v4216_v35 = vsel %vm4180_vm1, %v9315_v49, %v4215_v11  ;;  %v4223_v58 = vsel %vm4180_vm1, %v9316_v0, %v4222_v16 }
 0x4b4   : > { %v4230_v46 = vsel %vm4180_vm1, %v9317_v45, %v4229_v55  ;;  %4244 = vst.msk [vmem:[%s5076_s12 + $0x28] sm:$0xff] %vm2999_vm9, %v4216_v35 }
 0x4b5   : > { %4245 = vst.msk [vmem:[%s5076_s12 + $0x30] sm:$0xff] %vm2999_vm9, %v4223_v58 }
 0x4b6   : > { %4246 = vst.msk [vmem:[%s5076_s12 + $0x38] sm:$0xff] %vm2999_vm9, %v4230_v46 }
 0x4b7   : > { %v4251_v14 = vld [vmem:[#allocation2] sm:$0x1]  ;;  %v4253_v7 = vld [vmem:[#allocation3] sm:$0x1]  ;;  %v4257_v48 = vld [vmem:[#allocation4] sm:$0x1] }
 0x4b8   : > { %v4252_v12 = vmul.f32 0.001953125, %v4251_v14  ;;  %v4254_v32 = vmul.f32 0.001953125, %v4253_v7  ;;  %v4259_v4 = vld [vmem:[%s8470_s2] sm:$0x1] }
 0x4b9   : > { %v4272_v38 = vld [vmem:[%s8471_s3] sm:$0x1] }
 0x4ba   : > { %v4255_v23 = vmul.f32 %v4252_v12, %v4252_v12  ;;  %v4258_v18 = vadd.f32 %v4257_v48, %v4252_v12 }
 0x4bc   : > { %v4256_v30 = vsub.f32 %v4254_v32, %v4255_v23 }
 0x4be   : > { %v4260_v33 = vadd.f32 1e-05, %v4256_v30 }
 0x4c0   : > { %4884 = vrsqrt.f32 %v4260_v33  ;;  %vm4267_vm2 = vweird.f32 %v4260_v33 }
 0x4c6   : > { %v4885_v56 = vpop.eup %4884 }
 0x4c7   : > { %v4262_v34 = vmul.f32 %v4885_v56, %v4260_v33  ;;  %vm4268_vm5 = vweird.f32 %v4885_v56 }
 0x4c8   : > { %vm4269_vm6 = vmor %vm4267_vm2, %vm4268_vm5 }
 0x4c9   : > { %v4263_v13 = vmul.f32 %v4885_v56, %v4262_v34 }
 0x4cb   : > { %v4264_v15 = vmul.f32 0.5, %v4263_v13 }
 0x4cd   : > { %v4265_v42 = vsub.f32 1.5, %v4264_v15 }
 0x4cf   : > { %v4266_v41 = vmul.f32 %v4885_v56, %v4265_v42 }
 0x4d1   : > { %v4270_v52 = vsel %vm4269_vm6, %v4885_v56, %v4266_v41 }
 0x4d2   : > { %v4271_v28 = vmul.f32 %v4270_v52, %v4259_v4 }
 0x4d4   : > { %4275 = vst.msk [vmem:[#allocation8] sm:$0x1] %vm3070_vm10, %v4271_v28  ;;  %v4273_v3 = vmul.f32 %v4271_v28, %v4258_v18 }
 0x4d6   : > { %v4274_v22 = vsub.f32 %v4272_v38, %v4273_v3 }
 0x4d8   : > { %4276 = vst.msk [vmem:[#allocation8 + $0x1] sm:$0x1] %vm3070_vm10, %v4274_v22 }
 0x4d9 PF: > { %s4830_s6 = sshll.u32 %s5037_s22, 6  ;;  %s4290_s10 = sshll.u32 %s5076_s12, 4  ;;  %s4291_s10 = int_to_ptr.vmem [resolvable:$true] %s4290_s10 }
 0x4da   : > { %s4289_s9 = scalar_lea.hbm %s8472_s4, %s4830_s6  ;;  %s4278_s14 = scalar_lea.sflag [#allocation7], %s212_s30 }
 0x4db   : > { %s4292_s13 = sshll.u32 %s4289_s9, 4  ;;  %s4906_s23 = scalar_lea.hbm %s8472_s4, 128  ;;  %s4293_s13 = int_to_ptr.hbm [resolvable:$true] %s4292_s13 }
 0x4dc   : > { %s4900_s15 = sshra.s32 %s4293_s13, 4  ;;  %s4901_s15 = int_to_ptr.hbm [resolvable:$true] %s4900_s15 }
 0x4dd   : > { %s4902_s16 = scalar_lea.hbm %s4901_s15, 64  ;;  %p4907_p3 = scmp.lt.s32.totalorder %s4901_s15, %s8472_s4 }
 0x4de   : > { %p4903_p13 = scmp.ne.s32.totalorder %s4901_s15, %s4902_s16  ;;  %p4908_p4 = scmp.lt.s32.totalorder %s4906_s23, %s4902_s16 }
 0x4e0   : > { %p4904_p0 = pnand %p4903_p13, %p5056_p5  ;;  %p4909_p7 = por %p4908_p4, %p4907_p3 }
 0x4e2   : > { %p4905_p1 = pneg %p4904_p0 }
 0x4e4   : > { %p4910_p8 = pnand %p4909_p7, %p4905_p1 }
 0x4e6   : > { %4913 = shalt.err (!%p4910_p8)
}
 0x4e7   : > { %s4983_s30 = smov 128   ;;  %s4984_s12 = smov 8  }
 0x4e8   : > { %4834 = dma.vmem_to_hbm [thread:$0]  (%p5056_p5), %s4291_s10, 1024, %s4293_s13, %s4278_s14, %s4983_s30, %s4983_s30, %s4984_s12  }
 0x4e9   : > { %s4985_s6 = smov [#allocation8]   ;;  %s4307_s17 = sshll.u32 %s8473_s5, 4  ;;  %s4308_s17 = int_to_ptr.hbm [resolvable:$true] %s4307_s17 }
 0x4ea   : > { %s4305_s7 = sshll.u32 %s4985_s6, 4  ;;  %s4306_s7 = int_to_ptr.vmem [resolvable:$true] %s4305_s7 }
 0x4eb   : > { %4836 = dma.vmem_to_hbm [thread:$0]  (%p127_p2), %s4306_s7, 32, %s4308_s17, [#allocation9]  }
 0x4ec   : > { %4959 = dma.done.wait (%p127_p2), [#allocation9], 32  }
 0x4ed   : > { %4961 = vsyncadd (%p127_p2), [#allocation9], 4294967264 }
 0x4ee PF: > { %p4846_p5 = scmp.ge.s32.totalorder %s4980_s21, 2  ;;  %s4324_s28 = sand.u32 1, %s4968_s18  }
 0x4ef   : > { %s4325_s10 = scalar_lea.sflag [#allocation7], %s4324_s28 }
 0x4f0   : > { %p4841_p9 = pnand %p4846_p5, %p5060_p6 }
 0x4f2   : > { %p4842_p10 = pneg %p4841_p9 }
 0x4f4   : > { %4963 = dma.done.wait (%p4842_p10), %s4325_s10, 1024  }
 0x4f5   : > { %4965 = vsyncadd (%p4842_p10), %s4325_s10, 4294966272  ;;  %p17_p11 = scmp.ge.s32.totalorder %s5041_s24, 4   ;;  %s9318_s18 = smov %s4972_s19 }
 0x4f6   : > { %s9319_s19 = smov %s4976_s20  ;;  %s9320_s20 = smov %s5052_s27 }
 0x4f7   : > { %s9321_s21 = smov %s5041_s24  ;;  %19 = sbr.rel (!%p17_p11) target bundleno = 4 (0x4), region = 101 }
 0x4fc   :  { %4331 = vsyncpa [#allocation7], 1 }
 0x4fd   :  { %4333 = vsyncpa [#allocation7 + $0x1], 1 }
 0x4fe   :  { %4334 = vsyncpa [#allocation9], 1 }

</bundles_post_ra>
